<compile_context>
chip_gen: v7x
topology: tpu7x:2x2x1
jax: 0.10.0
libtpu: 0.0.40
codegen_flags: <defaults>
</compile_context>

<pallas_src>
import functools

import jax
import jax.numpy as jnp
from jax import lax
from jax.experimental import pallas as pl
from jax.experimental.pallas import tpu as pltpu

_LANE = 128


def _round_up(n, m=_LANE):
    return ((n + m - 1) // m) * m


# ---------------------------------------------------------------------------
# Conv-stage kernel: 3x3 same-padding conv on one (batch, row-tile) block.
# ---------------------------------------------------------------------------
def _conv3x3_kernel(x_ref, top_ref, bot_ref, w_ref, scale_ref, shift_ref,
                    y_ref, psum_ref, pssq_ref, xp_scr, *, fuse_pre_bn_relu):
    """One (batch n, row-tile t) grid step.

    x_ref     : (1, TH, W, C)   input row tile (storage dtype)
    top_ref   : (1, 1, W, C)    input row t*TH-1 (clamped; zeroed here at t==0)
    bot_ref   : (1, 1, W, C)    input row (t+1)*TH (clamped; zeroed at last t)
    w_ref     : (9, C, Cop)     per-tap weights, resident across the grid
    scale_ref : (1, C) f32      previous-stage BN scale (used when fused)
    shift_ref : (1, C) f32      previous-stage BN shift
    y_ref     : (1, TH, W, Cop) raw conv output (pre-BN), storage dtype
    psum_ref  : (1, 1, 1, Cop)  per-(n, t) channel sums from the f32 accumulator
    pssq_ref  : (1, 1, 1, Cop)  per-(n, t) channel sums of squares
    xp_scr    : (TH+2, W+2, C)  zero-halo padded tile (VMEM scratch)
    """
    _, TH, W, C = x_ref.shape
    Cop = y_ref.shape[3]
    dt = xp_scr.dtype
    t = pl.program_id(1)
    n_t = pl.num_programs(1)

    scale = scale_ref[0]          # (C,) f32
    shift = shift_ref[0]

    def pre(v):  # fused previous-stage BatchNorm + ReLU, applied BEFORE the
        # zero halo so the halo stays exactly zero (PyTorch conv zero-padding).
        if fuse_pre_bn_relu:
            return jnp.maximum(v * scale + shift, 0.0)
        return v

    # ---- build the zero-halo padded tile in scratch (no concat copies) -----
    zcol = jnp.zeros((TH + 2, 1, C), dt)
    xp_scr[:, 0:1, :] = zcol                        # left halo column
    xp_scr[:, W + 1:W + 2, :] = zcol                # right halo column

    top = pre(top_ref[0, 0, :, :].astype(jnp.float32))      # (W, C)
    top = jnp.where(t > 0, top, 0.0)                # true zero pad at image top
    xp_scr[0:1, 1:W + 1, :] = top[None].astype(dt)

    bot = pre(bot_ref[0, 0, :, :].astype(jnp.float32))
    bot = jnp.where(t < n_t - 1, bot, 0.0)          # true zero pad at bottom
    xp_scr[TH + 1:TH + 2, 1:W + 1, :] = bot[None].astype(dt)

    core = pre(x_ref[0].astype(jnp.float32))        # (TH, W, C)
    xp_scr[1:TH + 1, 1:W + 1, :] = core.astype(dt)

    # ---- 3x3 conv as 9 accumulated MXU matmuls (no im2col materialisation) --
    acc = jnp.zeros((TH * W, Cop), jnp.float32)
    tap = 0
    for ky in range(3):
        for kx in range(3):
            patch = xp_scr[ky:ky + TH, kx:kx + W, :].reshape(TH * W, C)
            acc = acc + jnp.dot(patch, w_ref[tap],
                                preferred_element_type=jnp.float32)
            tap += 1

    y_ref[0] = acc.reshape(TH, W, Cop).astype(y_ref.dtype)

    # Per-(batch, row-tile) BN partial statistics from the f32 accumulator;
    # reduced over (N, tiles) in the wrapper so both grid axes stay "parallel".
    psum_ref[...] = jnp.sum(acc, axis=0).reshape(1, 1, 1, Cop)
    pssq_ref[...] = jnp.sum(acc * acc, axis=0).reshape(1, 1, 1, Cop)


# ---------------------------------------------------------------------------
# pallas_call wrapper for one conv stage
# ---------------------------------------------------------------------------
def _stage_vmem_limit(TH, W, C, Cop, in_isz, out_isz):
    lane_c = max(C, _LANE)  # scratch layout is lane-padded
    blk = ((TH * W * C + 2 * W * C + 9 * C * Cop) * in_isz
           + TH * W * Cop * out_isz + 2 * Cop * 4 + 2 * C * 4)
    scratch = (TH + 2) * (W + 2) * lane_c * in_isz
    acc = TH * W * Cop * 4
    need = 2 * blk + scratch + acc + (4 << 20)
    # v5e/v6e have 128 MiB physical VMEM; v7x only 64 MiB -> cap at 96 MiB and
    # keep the 32 MiB floor.  Tile sizes should be chosen so `need` <~ 48 MiB
    # on v7x.  TODO(synk): derive per-generation caps from pltpu.get_tpu_info().
    return int(min(96 << 20, max(32 << 20, need)))


def _conv_stage(x, w, scale_in, shift_in, *, fuse_pre_bn_relu, row_tile,
                out_dtype):
    N, H, W, C = x.shape
    _, _, Cop = w.shape
    TH = row_tile
    assert H % TH == 0, "row_tile must divide H"  # TODO(synk): ragged last tile
    nTH = H // TH

    kern = functools.partial(_conv3x3_kernel,
                             fuse_pre_bn_relu=fuse_pre_bn_relu)
    isz = jnp.dtype(x.dtype).itemsize
    osz = jnp.dtype(out_dtype).itemsize

    return pl.pallas_call(
        kern,
        grid=(N, nTH),
        in_specs=[
            # core row tile (auto-pipelined)
            pl.BlockSpec((1, TH, W, C), lambda n, t: (n, t, 0, 0)),
            # one-row top / bottom halos: block size 1 along rows, so the block
            # index IS the row index; clamp at the border (zeroed in-kernel).
            pl.BlockSpec((1, 1, W, C),
                         lambda n, t: (n, jnp.maximum(t * TH - 1, 0), 0, 0)),
            pl.BlockSpec((1, 1, W, C),
                         lambda n, t: (n, jnp.minimum((t + 1) * TH, H - 1), 0, 0)),
            # resident per-tap weights + previous-stage BN scale/shift
            pl.BlockSpec((9, C, Cop), lambda n, t: (0, 0, 0)),
            pl.BlockSpec((1, C), lambda n, t: (0, 0)),
            pl.BlockSpec((1, C), lambda n, t: (0, 0)),
        ],
        out_specs=(
            pl.BlockSpec((1, TH, W, Cop), lambda n, t: (n, t, 0, 0)),
            pl.BlockSpec((1, 1, 1, Cop), lambda n, t: (n, t, 0, 0)),
            pl.BlockSpec((1, 1, 1, Cop), lambda n, t: (n, t, 0, 0)),
        ),
        out_shape=(
            jax.ShapeDtypeStruct((N, H, W, Cop), out_dtype),
            jax.ShapeDtypeStruct((N, nTH, 1, Cop), jnp.float32),
            jax.ShapeDtypeStruct((N, nTH, 1, Cop), jnp.float32),
        ),
        scratch_shapes=[pltpu.VMEM((TH + 2, W + 2, C), x.dtype)],
        compiler_params=pltpu.CompilerParams(
            dimension_semantics=("parallel", "parallel"),
            vmem_limit_bytes=_stage_vmem_limit(TH, W, C, Cop, isz, osz)),
    )(x, x, x, w,
      scale_in.reshape(1, C).astype(jnp.float32),
      shift_in.reshape(1, C).astype(jnp.float32))


def _bn_scale_shift(psum, pssq, gamma, beta, count, eps):
    total = jnp.sum(psum, axis=(0, 1, 2))
    total_sq = jnp.sum(pssq, axis=(0, 1, 2))
    mean = total / count
    # Single-pass variance in f32 (partials are per batch/row-tile block).
    # TODO(synk): switch to a two-pass / Welford reduction for very large N*H*W.
    var = jnp.maximum(total_sq / count - mean * mean, 0.0)
    scale = gamma / jnp.sqrt(var + eps)
    shift = beta - mean * scale
    return scale, shift


# ---------------------------------------------------------------------------
# DoubleConv: (conv => BN => ReLU) * 2, NCHW in / NCHW out (PyTorch convention)
# ---------------------------------------------------------------------------
@functools.partial(jax.jit, static_argnames=("storage_dtype", "row_tile"))
def double_conv(x_nchw, params, storage_dtype=jnp.bfloat16, row_tile=None):
    """storage_dtype = HBM dtype of activations/weights; MXU accumulates in f32.

    Conv biases are intentionally omitted: under train-mode BatchNorm the
    per-channel bias cancels exactly out of (y - mean)."""
    eps = 1e-5
    x = jnp.transpose(x_nchw, (0, 2, 3, 1))           # NCHW -> NHWC
    N, H, W, Cin = x.shape
    Cmid = params["g1"].shape[0]
    Cout = params["g2"].shape[0]
    Cpm, Cpo = _round_up(Cmid), _round_up(Cout)       # lane-pad OUTPUT channels

    if row_tile is None:
        row_tile = next((t for t in (32, 16, 8) if H % t == 0), H)
        # TODO(synk): pick row_tile per generation (v7x: keep live VMEM <~48MiB).

    # No HBM lane-pad of the input: stage 1 runs at the true Cin.
    x = x.astype(storage_dtype)

    # Weights -> (tap, Cin, Cout_padded); output (and stage-2 input) channels
    # zero-padded to the 128-lane width so matmul N-dims and stores are dense.
    w1 = jnp.pad(params["w1"], ((0, 0), (0, 0), (0, 0), (0, Cpm - Cmid)))
    w1 = w1.reshape(9, Cin, Cpm).astype(storage_dtype)
    w2 = jnp.pad(params["w2"],
                 ((0, 0), (0, 0), (0, Cpm - Cmid), (0, Cpo - Cout)))
    w2 = w2.reshape(9, Cpm, Cpo).astype(storage_dtype)
    g1 = jnp.pad(params["g1"], (0, Cpm - Cmid)).astype(jnp.float32)
    be1 = jnp.pad(params["be1"], (0, Cpm - Cmid)).astype(jnp.float32)
    g2 = jnp.pad(params["g2"], (0, Cpo - Cout)).astype(jnp.float32)
    be2 = jnp.pad(params["be2"], (0, Cpo - Cout)).astype(jnp.float32)

    count = float(N * H * W)

    # Stage 1: conv + per-(batch, row-tile) BN partial statistics.
    ones1 = jnp.ones((Cin,), jnp.float32)
    zeros1 = jnp.zeros((Cin,), jnp.float32)
    y1, s1, ss1 = _conv_stage(x, w1, ones1, zeros1,
                              fuse_pre_bn_relu=False, row_tile=row_tile,
                              out_dtype=storage_dtype)
    scale1, shift1 = _bn_scale_shift(s1, ss1, g1, be1, count, eps)

    # Stage 2: conv with stage-1 BN+ReLU fused into the input read.
    y2, s2, ss2 = _conv_stage(y1, w2, scale1, shift1,
                              fuse_pre_bn_relu=True, row_tile=row_tile,
                              out_dtype=storage_dtype)
    scale2, shift2 = _bn_scale_shift(s2, ss2, g2, be2, count, eps)

    # Final BN + ReLU + channel slice + NHWC->NCHW transpose: one XLA fusion
    # (replaces the old extra full-tensor _bn_relu pallas pass).
    out = jnp.maximum(y2.astype(jnp.float32) * scale2 + shift2, 0.0)
    out = out[..., :Cout]
    return jnp.transpose(out, (0, 3, 1, 2))


# ---------------------------------------------------------------------------
# Pure-JAX reference (mirrors PyTorch training-mode forward) for validation
# ---------------------------------------------------------------------------
def _ref_stage(x_nchw, w_oihw, b, gamma, beta, eps=1e-5):
    y = lax.conv_general_dilated(
        x_nchw, w_oihw, window_strides=(1, 1), padding="SAME",
        dimension_numbers=("NCHW", "OIHW", "NCHW"))
    y = y + b[None, :, None, None]
    mean = jnp.mean(y, axis=(0, 2, 3))
    var = jnp.var(y, axis=(0, 2, 3))  # biased, matches BN training mode
    y = (y - mean[None, :, None, None]) / jnp.sqrt(var + eps)[None, :, None, None]
    y = y * gamma[None, :, None, None] + beta[None, :, None, None]
    return jnp.maximum(y, 0.0)


def ref_double_conv(x, pt):
    h = _ref_stage(x, pt["w1_oihw"], pt["b1"], pt["g1"], pt["be1"])
    h = _ref_stage(h, pt["w2_oihw"], pt["b2"], pt["g2"], pt["be2"])
    return h


# ---------------------------------------------------------------------------
if __name__ == "__main__":
    # Small shapes: DoubleConv(in_channels=4, out_channels=8) -> mid_channels=8
    N, Cin, H, W = 2, 4, 16, 16
    Cmid, Cout = 8, 8

    key = jax.random.PRNGKey(0)
    kx, kw1, kb1, kw2, kb2 = jax.random.split(key, 5)

    x = jax.random.normal(kx, (N, Cin, H, W), jnp.float32)

    # PyTorch-layout (OIHW) weights, deterministic init
    w1_oihw = 0.1 * jax.random.normal(kw1, (Cmid, Cin, 3, 3), jnp.float32)
    b1 = 0.1 * jax.random.normal(kb1, (Cmid,), jnp.float32)
    w2_oihw = 0.1 * jax.random.normal(kw2, (Cout, Cmid, 3, 3), jnp.float32)
    b2 = 0.1 * jax.random.normal(kb2, (Cout,), jnp.float32)
    g1, be1 = jnp.ones((Cmid,), jnp.float32), jnp.zeros((Cmid,), jnp.float32)
    g2, be2 = jnp.ones((Cout,), jnp.float32), jnp.zeros((Cout,), jnp.float32)

    params = {
        # kernel layout: (kh, kw, Cin, Cout); biases omitted on purpose (they
        # cancel exactly under train-mode BatchNorm, see double_conv docstring)
        "w1": jnp.transpose(w1_oihw, (2, 3, 1, 0)), "g1": g1, "be1": be1,
        "w2": jnp.transpose(w2_oihw, (2, 3, 1, 0)), "g2": g2, "be2": be2,
    }
    pt = {"w1_oihw": w1_oihw, "b1": b1, "g1": g1, "be1": be1,
          "w2_oihw": w2_oihw, "b2": b2, "g2": g2, "be2": be2}

    ref = jax.block_until_ready(ref_double_conv(x, pt))

    # Strict numerics check: f32 storage path (row-tiled: TH=8 -> 2 row tiles,
    # exercising the halo logic).
    out_f32 = jax.block_until_ready(
        double_conv(x, params, storage_dtype=jnp.float32, row_tile=8))
    if not bool(jnp.allclose(out_f32, ref, atol=1e-3, rtol=1e-3)):
        raise AssertionError("Pallas DoubleConv (f32) mismatch vs JAX reference")

    # Fast path: bf16 storage + f32 MXU accumulation (loose tolerance covers
    # bf16 rounding of inputs/weights/intermediates).
    out_bf16 = jax.block_until_ready(
        double_conv(x, params, storage_dtype=jnp.bfloat16, row_tile=8))
    if not bool(jnp.allclose(out_bf16, ref, atol=1e-1, rtol=1e-1)):
        raise AssertionError("Pallas DoubleConv (bf16) mismatch vs JAX reference")

    print("KERNEL_OK")
</pallas_src>

<mosaic_0001>
module attributes {stable_mosaic.version = 11 : i64} {
  func.func @_conv3x3_kernel(%arg0: i32, %arg1: i32, %arg2: memref<1x8x16x4xf32, #tpu.memory_space<vmem>>, %arg3: memref<1x1x16x4xf32, #tpu.memory_space<vmem>>, %arg4: memref<1x1x16x4xf32, #tpu.memory_space<vmem>>, %arg5: memref<9x4x128xf32, #tpu.memory_space<vmem>>, %arg6: memref<1x4xf32, #tpu.memory_space<vmem>>, %arg7: memref<1x4xf32, #tpu.memory_space<vmem>>, %arg8: memref<1x8x16x128xf32, #tpu.memory_space<vmem>>, %arg9: memref<1x1x1x128xf32, #tpu.memory_space<vmem>>, %arg10: memref<1x1x1x128xf32, #tpu.memory_space<vmem>>, %arg11: memref<10x18x4xf32, #tpu.memory_space<vmem>>) attributes {dimension_semantics = [#tpu.dimension_semantics<parallel>, #tpu.dimension_semantics<parallel>], iteration_bounds = array<i64: 2, 2>, scalar_prefetch = 0 : i64, scratch_operands = 1 : i64, tpu.core_type = #tpu.core_type<tc>, window_params = [{transform_indices = @transform_0, window_bounds = array<i64: 1, 8, 16, 4>}, {transform_indices = @transform_1, window_bounds = array<i64: 1, 1, 16, 4>}, {transform_indices = @transform_2, window_bounds = array<i64: 1, 1, 16, 4>}, {pipeline_mode = #tpu.pipeline_mode<synchronous>, transform_indices = @transform_3, window_bounds = array<i64: 9, 4, 128>}, {pipeline_mode = #tpu.pipeline_mode<synchronous>, transform_indices = @transform_4, window_bounds = array<i64: 1, 4>}, {pipeline_mode = #tpu.pipeline_mode<synchronous>, transform_indices = @transform_5, window_bounds = array<i64: 1, 4>}, {transform_indices = @transform_6, window_bounds = array<i64: 1, 8, 16, 128>}, {transform_indices = @transform_7, window_bounds = array<i64: 1, 1, 1, 128>}, {transform_indices = @transform_8, window_bounds = array<i64: 1, 1, 1, 128>}]} {
    %cst = arith.constant 0.000000e+00 : f32
    %0 = vector.broadcast %cst : f32 to vector<10x1x4xf32>
    %c0 = arith.constant 0 : index
    %c0_0 = arith.constant 0 : index
    %c0_1 = arith.constant 0 : index
    %1 = vector.load %arg11[%c0, %c0_0, %c0_1] : memref<10x18x4xf32, #tpu.memory_space<vmem>>, vector<10x1x4xf32>
    tpu.vector_store %arg11[%c0, %c0_0, %c0_1], %0 {strides = array<i32>} : memref<10x18x4xf32, #tpu.memory_space<vmem>>, vector<10x1x4xf32>,
    %c0_2 = arith.constant 0 : index
    %c17 = arith.constant 17 : index
    %c0_3 = arith.constant 0 : index
    %2 = vector.load %arg11[%c0_2, %c17, %c0_3] : memref<10x18x4xf32, #tpu.memory_space<vmem>>, vector<10x1x4xf32>
    tpu.vector_store %arg11[%c0_2, %c17, %c0_3], %0 {strides = array<i32>} : memref<10x18x4xf32, #tpu.memory_space<vmem>>, vector<10x1x4xf32>,
    %c0_4 = arith.constant 0 : index
    %c0_5 = arith.constant 0 : index
    %c0_6 = arith.constant 0 : index
    %c0_7 = arith.constant 0 : index
    %3 = vector.load %arg3[%c0_4, %c0_5, %c0_6, %c0_7] : memref<1x1x16x4xf32, #tpu.memory_space<vmem>>, vector<1x1x16x4xf32>
    %4 = vector.shape_cast %3 : vector<1x1x16x4xf32> to vector<16x4xf32>
    %c0_i32 = arith.constant 0 : i32
    %5 = arith.cmpi sgt, %arg1, %c0_i32 : i32
    %cst_8 = arith.constant 0.000000e+00 : f32
    %6 = vector.broadcast %cst_8 : f32 to vector<16x4xf32>
    %7 = arith.select %5, %4, %6 : vector<16x4xf32>
    %8 = vector.shape_cast %7 : vector<16x4xf32> to vector<1x16x4xf32>
    %c0_9 = arith.constant 0 : index
    %c1 = arith.constant 1 : index
    %c0_10 = arith.constant 0 : index
    %9 = vector.load %arg11[%c0_9, %c1, %c0_10] : memref<10x18x4xf32, #tpu.memory_space<vmem>>, vector<1x16x4xf32>
    tpu.vector_store %arg11[%c0_9, %c1, %c0_10], %8 {strides = array<i32>} : memref<10x18x4xf32, #tpu.memory_space<vmem>>, vector<1x16x4xf32>,
    %c0_11 = arith.constant 0 : index
    %c0_12 = arith.constant 0 : index
    %c0_13 = arith.constant 0 : index
    %c0_14 = arith.constant 0 : index
    %10 = vector.load %arg4[%c0_11, %c0_12, %c0_13, %c0_14] : memref<1x1x16x4xf32, #tpu.memory_space<vmem>>, vector<1x1x16x4xf32>
    %11 = vector.shape_cast %10 : vector<1x1x16x4xf32> to vector<16x4xf32>
    %c1_i32 = arith.constant 1 : i32
    %12 = arith.cmpi slt, %arg1, %c1_i32 : i32
    %cst_15 = arith.constant 0.000000e+00 : f32
    %13 = vector.broadcast %cst_15 : f32 to vector<16x4xf32>
    %14 = arith.select %12, %11, %13 : vector<16x4xf32>
    %15 = vector.shape_cast %14 : vector<16x4xf32> to vector<1x16x4xf32>
    %c9 = arith.constant 9 : index
    %c1_16 = arith.constant 1 : index
    %c0_17 = arith.constant 0 : index
    %16 = vector.load %arg11[%c9, %c1_16, %c0_17] : memref<10x18x4xf32, #tpu.memory_space<vmem>>, vector<1x16x4xf32>
    tpu.vector_store %arg11[%c9, %c1_16, %c0_17], %15 {strides = array<i32>} : memref<10x18x4xf32, #tpu.memory_space<vmem>>, vector<1x16x4xf32>,
    %c0_18 = arith.constant 0 : index
    %c0_19 = arith.constant 0 : index
    %c0_20 = arith.constant 0 : index
    %c0_21 = arith.constant 0 : index
    %17 = vector.load %arg2[%c0_18, %c0_19, %c0_20, %c0_21] : memref<1x8x16x4xf32, #tpu.memory_space<vmem>>, vector<1x8x16x4xf32>
    %18 = vector.shape_cast %17 : vector<1x8x16x4xf32> to vector<8x16x4xf32>
    %c1_22 = arith.constant 1 : index
    %c1_23 = arith.constant 1 : index
    %c0_24 = arith.constant 0 : index
    %19 = vector.load %arg11[%c1_22, %c1_23, %c0_24] : memref<10x18x4xf32, #tpu.memory_space<vmem>>, vector<8x16x4xf32>
    tpu.vector_store %arg11[%c1_22, %c1_23, %c0_24], %18 {strides = array<i32>} : memref<10x18x4xf32, #tpu.memory_space<vmem>>, vector<8x16x4xf32>,
    %cst_25 = arith.constant 0.000000e+00 : f32
    %20 = vector.broadcast %cst_25 : f32 to vector<128x128xf32>
    %c0_26 = arith.constant 0 : index
    %c0_27 = arith.constant 0 : index
    %c0_28 = arith.constant 0 : index
    %21 = vector.load %arg11[%c0_26, %c0_27, %c0_28] : memref<10x18x4xf32, #tpu.memory_space<vmem>>, vector<8x16x4xf32>
    %22 = vector.shape_cast %21 : vector<8x16x4xf32> to vector<128x4xf32>
    %c0_29 = arith.constant 0 : index
    %c0_30 = arith.constant 0 : index
    %c0_31 = arith.constant 0 : index
    %23 = vector.load %arg5[%c0_29, %c0_30, %c0_31] : memref<9x4x128xf32, #tpu.memory_space<vmem>>, vector<1x4x128xf32>
    %24 = vector.shape_cast %23 : vector<1x4x128xf32> to vector<4x128xf32>
    %cst_32 = arith.constant dense<0.000000e+00> : vector<128x128xf32>
    %25 = tpu.matmul %22, %24, %cst_32 {dimension_numbers = #tpu.dot_dimension_numbers<[1], [0], [0], [1], [0, 0, 1, 1], [], []>} : vector<128x4xf32>, vector<4x128xf32>, vector<128x128xf32> -> vector<128x128xf32>
    %26 = arith.addf %20, %25 : vector<128x128xf32>
    %c0_33 = arith.constant 0 : index
    %c1_34 = arith.constant 1 : index
    %c0_35 = arith.constant 0 : index
    %27 = vector.load %arg11[%c0_33, %c1_34, %c0_35] : memref<10x18x4xf32, #tpu.memory_space<vmem>>, vector<8x16x4xf32>
    %28 = vector.shape_cast %27 : vector<8x16x4xf32> to vector<128x4xf32>
    %c1_36 = arith.constant 1 : index
    %c0_37 = arith.constant 0 : index
    %c0_38 = arith.constant 0 : index
    %29 = vector.load %arg5[%c1_36, %c0_37, %c0_38] : memref<9x4x128xf32, #tpu.memory_space<vmem>>, vector<1x4x128xf32>
    %30 = vector.shape_cast %29 : vector<1x4x128xf32> to vector<4x128xf32>
    %cst_39 = arith.constant dense<0.000000e+00> : vector<128x128xf32>
    %31 = tpu.matmul %28, %30, %cst_39 {dimension_numbers = #tpu.dot_dimension_numbers<[1], [0], [0], [1], [0, 0, 1, 1], [], []>} : vector<128x4xf32>, vector<4x128xf32>, vector<128x128xf32> -> vector<128x128xf32>
    %32 = arith.addf %26, %31 : vector<128x128xf32>
    %c0_40 = arith.constant 0 : index
    %c2 = arith.constant 2 : index
    %c0_41 = arith.constant 0 : index
    %33 = vector.load %arg11[%c0_40, %c2, %c0_41] : memref<10x18x4xf32, #tpu.memory_space<vmem>>, vector<8x16x4xf32>
    %34 = vector.shape_cast %33 : vector<8x16x4xf32> to vector<128x4xf32>
    %c2_42 = arith.constant 2 : index
    %c0_43 = arith.constant 0 : index
    %c0_44 = arith.constant 0 : index
    %35 = vector.load %arg5[%c2_42, %c0_43, %c0_44] : memref<9x4x128xf32, #tpu.memory_space<vmem>>, vector<1x4x128xf32>
    %36 = vector.shape_cast %35 : vector<1x4x128xf32> to vector<4x128xf32>
    %cst_45 = arith.constant dense<0.000000e+00> : vector<128x128xf32>
    %37 = tpu.matmul %34, %36, %cst_45 {dimension_numbers = #tpu.dot_dimension_numbers<[1], [0], [0], [1], [0, 0, 1, 1], [], []>} : vector<128x4xf32>, vector<4x128xf32>, vector<128x128xf32> -> vector<128x128xf32>
    %38 = arith.addf %32, %37 : vector<128x128xf32>
    %c1_46 = arith.constant 1 : index
    %c0_47 = arith.constant 0 : index
    %c0_48 = arith.constant 0 : index
    %39 = vector.load %arg11[%c1_46, %c0_47, %c0_48] : memref<10x18x4xf32, #tpu.memory_space<vmem>>, vector<8x16x4xf32>
    %40 = vector.shape_cast %39 : vector<8x16x4xf32> to vector<128x4xf32>
    %c3 = arith.constant 3 : index
    %c0_49 = arith.constant 0 : index
    %c0_50 = arith.constant 0 : index
    %41 = vector.load %arg5[%c3, %c0_49, %c0_50] : memref<9x4x128xf32, #tpu.memory_space<vmem>>, vector<1x4x128xf32>
    %42 = vector.shape_cast %41 : vector<1x4x128xf32> to vector<4x128xf32>
    %cst_51 = arith.constant dense<0.000000e+00> : vector<128x128xf32>
    %43 = tpu.matmul %40, %42, %cst_51 {dimension_numbers = #tpu.dot_dimension_numbers<[1], [0], [0], [1], [0, 0, 1, 1], [], []>} : vector<128x4xf32>, vector<4x128xf32>, vector<128x128xf32> -> vector<128x128xf32>
    %44 = arith.addf %38, %43 : vector<128x128xf32>
    %c1_52 = arith.constant 1 : index
    %c1_53 = arith.constant 1 : index
    %c0_54 = arith.constant 0 : index
    %45 = vector.load %arg11[%c1_52, %c1_53, %c0_54] : memref<10x18x4xf32, #tpu.memory_space<vmem>>, vector<8x16x4xf32>
    %46 = vector.shape_cast %45 : vector<8x16x4xf32> to vector<128x4xf32>
    %c4 = arith.constant 4 : index
    %c0_55 = arith.constant 0 : index
    %c0_56 = arith.constant 0 : index
    %47 = vector.load %arg5[%c4, %c0_55, %c0_56] : memref<9x4x128xf32, #tpu.memory_space<vmem>>, vector<1x4x128xf32>
    %48 = vector.shape_cast %47 : vector<1x4x128xf32> to vector<4x128xf32>
    %cst_57 = arith.constant dense<0.000000e+00> : vector<128x128xf32>
    %49 = tpu.matmul %46, %48, %cst_57 {dimension_numbers = #tpu.dot_dimension_numbers<[1], [0], [0], [1], [0, 0, 1, 1], [], []>} : vector<128x4xf32>, vector<4x128xf32>, vector<128x128xf32> -> vector<128x128xf32>
    %50 = arith.addf %44, %49 : vector<128x128xf32>
    %c1_58 = arith.constant 1 : index
    %c2_59 = arith.constant 2 : index
    %c0_60 = arith.constant 0 : index
    %51 = vector.load %arg11[%c1_58, %c2_59, %c0_60] : memref<10x18x4xf32, #tpu.memory_space<vmem>>, vector<8x16x4xf32>
    %52 = vector.shape_cast %51 : vector<8x16x4xf32> to vector<128x4xf32>
    %c5 = arith.constant 5 : index
    %c0_61 = arith.constant 0 : index
    %c0_62 = arith.constant 0 : index
    %53 = vector.load %arg5[%c5, %c0_61, %c0_62] : memref<9x4x128xf32, #tpu.memory_space<vmem>>, vector<1x4x128xf32>
    %54 = vector.shape_cast %53 : vector<1x4x128xf32> to vector<4x128xf32>
    %cst_63 = arith.constant dense<0.000000e+00> : vector<128x128xf32>
    %55 = tpu.matmul %52, %54, %cst_63 {dimension_numbers = #tpu.dot_dimension_numbers<[1], [0], [0], [1], [0, 0, 1, 1], [], []>} : vector<128x4xf32>, vector<4x128xf32>, vector<128x128xf32> -> vector<128x128xf32>
    %56 = arith.addf %50, %55 : vector<128x128xf32>
    %c2_64 = arith.constant 2 : index
    %c0_65 = arith.constant 0 : index
    %c0_66 = arith.constant 0 : index
    %57 = vector.load %arg11[%c2_64, %c0_65, %c0_66] : memref<10x18x4xf32, #tpu.memory_space<vmem>>, vector<8x16x4xf32>
    %58 = vector.shape_cast %57 : vector<8x16x4xf32> to vector<128x4xf32>
    %c6 = arith.constant 6 : index
    %c0_67 = arith.constant 0 : index
    %c0_68 = arith.constant 0 : index
    %59 = vector.load %arg5[%c6, %c0_67, %c0_68] : memref<9x4x128xf32, #tpu.memory_space<vmem>>, vector<1x4x128xf32>
    %60 = vector.shape_cast %59 : vector<1x4x128xf32> to vector<4x128xf32>
    %cst_69 = arith.constant dense<0.000000e+00> : vector<128x128xf32>
    %61 = tpu.matmul %58, %60, %cst_69 {dimension_numbers = #tpu.dot_dimension_numbers<[1], [0], [0], [1], [0, 0, 1, 1], [], []>} : vector<128x4xf32>, vector<4x128xf32>, vector<128x128xf32> -> vector<128x128xf32>
    %62 = arith.addf %56, %61 : vector<128x128xf32>
    %c2_70 = arith.constant 2 : index
    %c1_71 = arith.constant 1 : index
    %c0_72 = arith.constant 0 : index
    %63 = vector.load %arg11[%c2_70, %c1_71, %c0_72] : memref<10x18x4xf32, #tpu.memory_space<vmem>>, vector<8x16x4xf32>
    %64 = vector.shape_cast %63 : vector<8x16x4xf32> to vector<128x4xf32>
    %c7 = arith.constant 7 : index
    %c0_73 = arith.constant 0 : index
    %c0_74 = arith.constant 0 : index
    %65 = vector.load %arg5[%c7, %c0_73, %c0_74] : memref<9x4x128xf32, #tpu.memory_space<vmem>>, vector<1x4x128xf32>
    %66 = vector.shape_cast %65 : vector<1x4x128xf32> to vector<4x128xf32>
    %cst_75 = arith.constant dense<0.000000e+00> : vector<128x128xf32>
    %67 = tpu.matmul %64, %66, %cst_75 {dimension_numbers = #tpu.dot_dimension_numbers<[1], [0], [0], [1], [0, 0, 1, 1], [], []>} : vector<128x4xf32>, vector<4x128xf32>, vector<128x128xf32> -> vector<128x128xf32>
    %68 = arith.addf %62, %67 : vector<128x128xf32>
    %c2_76 = arith.constant 2 : index
    %c2_77 = arith.constant 2 : index
    %c0_78 = arith.constant 0 : index
    %69 = vector.load %arg11[%c2_76, %c2_77, %c0_78] : memref<10x18x4xf32, #tpu.memory_space<vmem>>, vector<8x16x4xf32>
    %70 = vector.shape_cast %69 : vector<8x16x4xf32> to vector<128x4xf32>
    %c8 = arith.constant 8 : index
    %c0_79 = arith.constant 0 : index
    %c0_80 = arith.constant 0 : index
    %71 = vector.load %arg5[%c8, %c0_79, %c0_80] : memref<9x4x128xf32, #tpu.memory_space<vmem>>, vector<1x4x128xf32>
    %72 = vector.shape_cast %71 : vector<1x4x128xf32> to vector<4x128xf32>
    %cst_81 = arith.constant dense<0.000000e+00> : vector<128x128xf32>
    %73 = tpu.matmul %70, %72, %cst_81 {dimension_numbers = #tpu.dot_dimension_numbers<[1], [0], [0], [1], [0, 0, 1, 1], [], []>} : vector<128x4xf32>, vector<4x128xf32>, vector<128x128xf32> -> vector<128x128xf32>
    %74 = arith.addf %68, %73 : vector<128x128xf32>
    %75 = vector.shape_cast %74 : vector<128x128xf32> to vector<8x16x128xf32>
    %c0_82 = arith.constant 0 : index
    %c0_83 = arith.constant 0 : index
    %c0_84 = arith.constant 0 : index
    %c0_85 = arith.constant 0 : index
    %76 = vector.load %arg8[%c0_82, %c0_83, %c0_84, %c0_85] : memref<1x8x16x128xf32, #tpu.memory_space<vmem>>, vector<1x8x16x128xf32>
    %77 = vector.shape_cast %76 : vector<1x8x16x128xf32> to vector<8x16x128xf32>
    %78 = vector.shape_cast %75 : vector<8x16x128xf32> to vector<1x8x16x128xf32>
    tpu.vector_store %arg8[%c0_82, %c0_83, %c0_84, %c0_85], %78 {strides = array<i32>} : memref<1x8x16x128xf32, #tpu.memory_space<vmem>>, vector<1x8x16x128xf32>,
    %cst_86 = arith.constant dense<0.000000e+00> : vector<128xf32>
    %79 = vector.multi_reduction <add>, %74, %cst_86 [0] : vector<128x128xf32> to vector<128xf32>
    %80 = vector.shape_cast %79 : vector<128xf32> to vector<1x1x1x128xf32>
    %c0_87 = arith.constant 0 : index
    %c0_88 = arith.constant 0 : index
    %c0_89 = arith.constant 0 : index
    %c0_90 = arith.constant 0 : index
    %81 = vector.load %arg9[%c0_87, %c0_88, %c0_89, %c0_90] : memref<1x1x1x128xf32, #tpu.memory_space<vmem>>, vector<1x1x1x128xf32>
    tpu.vector_store %arg9[%c0_87, %c0_88, %c0_89, %c0_90], %80 {strides = array<i32>} : memref<1x1x1x128xf32, #tpu.memory_space<vmem>>, vector<1x1x1x128xf32>,
    %82 = arith.mulf %74, %74 : vector<128x128xf32>
    %cst_91 = arith.constant dense<0.000000e+00> : vector<128xf32>
    %83 = vector.multi_reduction <add>, %82, %cst_91 [0] : vector<128x128xf32> to vector<128xf32>
    %84 = vector.shape_cast %83 : vector<128xf32> to vector<1x1x1x128xf32>
    %c0_92 = arith.constant 0 : index
    %c0_93 = arith.constant 0 : index
    %c0_94 = arith.constant 0 : index
    %c0_95 = arith.constant 0 : index
    %85 = vector.load %arg10[%c0_92, %c0_93, %c0_94, %c0_95] : memref<1x1x1x128xf32, #tpu.memory_space<vmem>>, vector<1x1x1x128xf32>
    tpu.vector_store %arg10[%c0_92, %c0_93, %c0_94, %c0_95], %84 {strides = array<i32>} : memref<1x1x1x128xf32, #tpu.memory_space<vmem>>, vector<1x1x1x128xf32>,
    return
  }
  func.func @transform_0(%arg0: i32, %arg1: i32) -> (i32, i32, i32, i32) {
    %c0_i32 = arith.constant 0 : i32
    %c0_i32_0 = arith.constant 0 : i32
    %c0_i32_1 = arith.constant 0 : i32
    return %arg0, %arg1, %c0_i32, %c0_i32_0 : i32, i32, i32, i32
  }
  func.func @transform_1(%arg0: i32, %arg1: i32) -> (i32, i32, i32, i32) {
    %c8_i32 = arith.constant 8 : i32
    %0 = arith.muli %arg1, %c8_i32 : i32
    %c1_i32 = arith.constant 1 : i32
    %1 = arith.subi %0, %c1_i32 : i32
    %c0_i32 = arith.constant 0 : i32
    %2 = arith.maxsi %1, %c0_i32 : i32
    %c0_i32_0 = arith.constant 0 : i32
    %c0_i32_1 = arith.constant 0 : i32
    %c0_i32_2 = arith.constant 0 : i32
    return %arg0, %2, %c0_i32_0, %c0_i32_1 : i32, i32, i32, i32
  }
  func.func @transform_2(%arg0: i32, %arg1: i32) -> (i32, i32, i32, i32) {
    %c1_i32 = arith.constant 1 : i32
    %0 = arith.addi %arg1, %c1_i32 : i32
    %c8_i32 = arith.constant 8 : i32
    %1 = arith.muli %0, %c8_i32 : i32
    %c15_i32 = arith.constant 15 : i32
    %2 = arith.minsi %1, %c15_i32 : i32
    %c0_i32 = arith.constant 0 : i32
    %c0_i32_0 = arith.constant 0 : i32
    %c0_i32_1 = arith.constant 0 : i32
    return %arg0, %2, %c0_i32, %c0_i32_0 : i32, i32, i32, i32
  }
  func.func @transform_3(%arg0: i32, %arg1: i32) -> (i32, i32, i32) {
    %c0_i32 = arith.constant 0 : i32
    %c0_i32_0 = arith.constant 0 : i32
    %c0_i32_1 = arith.constant 0 : i32
    %c0_i32_2 = arith.constant 0 : i32
    return %c0_i32, %c0_i32_0, %c0_i32_1 : i32, i32, i32
  }
  func.func @transform_4(%arg0: i32, %arg1: i32) -> (i32, i32) {
    %c0_i32 = arith.constant 0 : i32
    %c0_i32_0 = arith.constant 0 : i32
    %c0_i32_1 = arith.constant 0 : i32
    return %c0_i32, %c0_i32_0 : i32, i32
  }
  func.func @transform_5(%arg0: i32, %arg1: i32) -> (i32, i32) {
    %c0_i32 = arith.constant 0 : i32
    %c0_i32_0 = arith.constant 0 : i32
    %c0_i32_1 = arith.constant 0 : i32
    return %c0_i32, %c0_i32_0 : i32, i32
  }
  func.func @transform_6(%arg0: i32, %arg1: i32) -> (i32, i32, i32, i32) {
    %c0_i32 = arith.constant 0 : i32
    %c0_i32_0 = arith.constant 0 : i32
    %c0_i32_1 = arith.constant 0 : i32
    return %arg0, %arg1, %c0_i32, %c0_i32_0 : i32, i32, i32, i32
  }
  func.func @transform_7(%arg0: i32, %arg1: i32) -> (i32, i32, i32, i32) {
    %c0_i32 = arith.constant 0 : i32
    %c0_i32_0 = arith.constant 0 : i32
    %c0_i32_1 = arith.constant 0 : i32
    return %arg0, %arg1, %c0_i32, %c0_i32_0 : i32, i32, i32, i32
  }
  func.func @transform_8(%arg0: i32, %arg1: i32) -> (i32, i32, i32, i32) {
    %c0_i32 = arith.constant 0 : i32
    %c0_i32_0 = arith.constant 0 : i32
    %c0_i32_1 = arith.constant 0 : i32
    return %arg0, %arg1, %c0_i32, %c0_i32_0 : i32, i32, i32, i32
  }
}

module attributes {stable_mosaic.version = 11 : i64} {
  func.func @_conv3x3_kernel(%arg0: i32, %arg1: i32, %arg2: memref<1x8x16x128xf32, #tpu.memory_space<vmem>>, %arg3: memref<1x1x16x128xf32, #tpu.memory_space<vmem>>, %arg4: memref<1x1x16x128xf32, #tpu.memory_space<vmem>>, %arg5: memref<9x128x128xf32, #tpu.memory_space<vmem>>, %arg6: memref<1x128xf32, #tpu.memory_space<vmem>>, %arg7: memref<1x128xf32, #tpu.memory_space<vmem>>, %arg8: memref<1x8x16x128xf32, #tpu.memory_space<vmem>>, %arg9: memref<1x1x1x128xf32, #tpu.memory_space<vmem>>, %arg10: memref<1x1x1x128xf32, #tpu.memory_space<vmem>>, %arg11: memref<10x18x128xf32, #tpu.memory_space<vmem>>) attributes {dimension_semantics = [#tpu.dimension_semantics<parallel>, #tpu.dimension_semantics<parallel>], iteration_bounds = array<i64: 2, 2>, scalar_prefetch = 0 : i64, scratch_operands = 1 : i64, tpu.core_type = #tpu.core_type<tc>, window_params = [{transform_indices = @transform_0, window_bounds = array<i64: 1, 8, 16, 128>}, {transform_indices = @transform_1, window_bounds = array<i64: 1, 1, 16, 128>}, {transform_indices = @transform_2, window_bounds = array<i64: 1, 1, 16, 128>}, {pipeline_mode = #tpu.pipeline_mode<synchronous>, transform_indices = @transform_3, window_bounds = array<i64: 9, 128, 128>}, {pipeline_mode = #tpu.pipeline_mode<synchronous>, transform_indices = @transform_4, window_bounds = array<i64: 1, 128>}, {pipeline_mode = #tpu.pipeline_mode<synchronous>, transform_indices = @transform_5, window_bounds = array<i64: 1, 128>}, {transform_indices = @transform_6, window_bounds = array<i64: 1, 8, 16, 128>}, {transform_indices = @transform_7, window_bounds = array<i64: 1, 1, 1, 128>}, {transform_indices = @transform_8, window_bounds = array<i64: 1, 1, 1, 128>}]} {
    %c0 = arith.constant 0 : index
    %c0_0 = arith.constant 0 : index
    %0 = vector.load %arg6[%c0, %c0_0] : memref<1x128xf32, #tpu.memory_space<vmem>>, vector<1x128xf32>
    %1 = vector.shape_cast %0 : vector<1x128xf32> to vector<128xf32>
    %c0_1 = arith.constant 0 : index
    %c0_2 = arith.constant 0 : index
    %2 = vector.load %arg7[%c0_1, %c0_2] : memref<1x128xf32, #tpu.memory_space<vmem>>, vector<1x128xf32>
    %3 = vector.shape_cast %2 : vector<1x128xf32> to vector<128xf32>
    %cst = arith.constant 0.000000e+00 : f32
    %4 = vector.broadcast %cst : f32 to vector<10x1x128xf32>
    %c0_3 = arith.constant 0 : index
    %c0_4 = arith.constant 0 : index
    %c0_5 = arith.constant 0 : index
    %5 = vector.load %arg11[%c0_3, %c0_4, %c0_5] : memref<10x18x128xf32, #tpu.memory_space<vmem>>, vector<10x1x128xf32>
    tpu.vector_store %arg11[%c0_3, %c0_4, %c0_5], %4 {strides = array<i32>} : memref<10x18x128xf32, #tpu.memory_space<vmem>>, vector<10x1x128xf32>,
    %c0_6 = arith.constant 0 : index
    %c17 = arith.constant 17 : index
    %c0_7 = arith.constant 0 : index
    %6 = vector.load %arg11[%c0_6, %c17, %c0_7] : memref<10x18x128xf32, #tpu.memory_space<vmem>>, vector<10x1x128xf32>
    tpu.vector_store %arg11[%c0_6, %c17, %c0_7], %4 {strides = array<i32>} : memref<10x18x128xf32, #tpu.memory_space<vmem>>, vector<10x1x128xf32>,
    %c0_8 = arith.constant 0 : index
    %c0_9 = arith.constant 0 : index
    %c0_10 = arith.constant 0 : index
    %c0_11 = arith.constant 0 : index
    %7 = vector.load %arg3[%c0_8, %c0_9, %c0_10, %c0_11] : memref<1x1x16x128xf32, #tpu.memory_space<vmem>>, vector<1x1x16x128xf32>
    %8 = vector.shape_cast %7 : vector<1x1x16x128xf32> to vector<16x128xf32>
    %9 = vector.shape_cast %1 : vector<128xf32> to vector<1x128xf32>
    %10 = vector.broadcast %9 : vector<1x128xf32> to vector<16x128xf32>
    %11 = arith.mulf %8, %10 : vector<16x128xf32>
    %12 = vector.shape_cast %3 : vector<128xf32> to vector<1x128xf32>
    %13 = vector.broadcast %12 : vector<1x128xf32> to vector<16x128xf32>
    %14 = arith.addf %11, %13 : vector<16x128xf32>
    %cst_12 = arith.constant 0.000000e+00 : f32
    %15 = vector.broadcast %cst_12 : f32 to vector<16x128xf32>
    %16 = arith.maximumf %14, %15 : vector<16x128xf32>
    %c0_i32 = arith.constant 0 : i32
    %17 = arith.cmpi sgt, %arg1, %c0_i32 : i32
    %cst_13 = arith.constant 0.000000e+00 : f32
    %18 = vector.broadcast %cst_13 : f32 to vector<16x128xf32>
    %19 = arith.select %17, %16, %18 : vector<16x128xf32>
    %20 = vector.shape_cast %19 : vector<16x128xf32> to vector<1x16x128xf32>
    %c0_14 = arith.constant 0 : index
    %c1 = arith.constant 1 : index
    %c0_15 = arith.constant 0 : index
    %21 = vector.load %arg11[%c0_14, %c1, %c0_15] : memref<10x18x128xf32, #tpu.memory_space<vmem>>, vector<1x16x128xf32>
    tpu.vector_store %arg11[%c0_14, %c1, %c0_15], %20 {strides = array<i32>} : memref<10x18x128xf32, #tpu.memory_space<vmem>>, vector<1x16x128xf32>,
    %c0_16 = arith.constant 0 : index
    %c0_17 = arith.constant 0 : index
    %c0_18 = arith.constant 0 : index
    %c0_19 = arith.constant 0 : index
    %22 = vector.load %arg4[%c0_16, %c0_17, %c0_18, %c0_19] : memref<1x1x16x128xf32, #tpu.memory_space<vmem>>, vector<1x1x16x128xf32>
    %23 = vector.shape_cast %22 : vector<1x1x16x128xf32> to vector<16x128xf32>
    %24 = vector.shape_cast %1 : vector<128xf32> to vector<1x128xf32>
    %25 = vector.broadcast %24 : vector<1x128xf32> to vector<16x128xf32>
    %26 = arith.mulf %23, %25 : vector<16x128xf32>
    %27 = vector.shape_cast %3 : vector<128xf32> to vector<1x128xf32>
    %28 = vector.broadcast %27 : vector<1x128xf32> to vector<16x128xf32>
    %29 = arith.addf %26, %28 : vector<16x128xf32>
    %cst_20 = arith.constant 0.000000e+00 : f32
    %30 = vector.broadcast %cst_20 : f32 to vector<16x128xf32>
    %31 = arith.maximumf %29, %30 : vector<16x128xf32>
    %c1_i32 = arith.constant 1 : i32
    %32 = arith.cmpi slt, %arg1, %c1_i32 : i32
    %cst_21 = arith.constant 0.000000e+00 : f32
    %33 = vector.broadcast %cst_21 : f32 to vector<16x128xf32>
    %34 = arith.select %32, %31, %33 : vector<16x128xf32>
    %35 = vector.shape_cast %34 : vector<16x128xf32> to vector<1x16x128xf32>
    %c9 = arith.constant 9 : index
    %c1_22 = arith.constant 1 : index
    %c0_23 = arith.constant 0 : index
    %36 = vector.load %arg11[%c9, %c1_22, %c0_23] : memref<10x18x128xf32, #tpu.memory_space<vmem>>, vector<1x16x128xf32>
    tpu.vector_store %arg11[%c9, %c1_22, %c0_23], %35 {strides = array<i32>} : memref<10x18x128xf32, #tpu.memory_space<vmem>>, vector<1x16x128xf32>,
    %c0_24 = arith.constant 0 : index
    %c0_25 = arith.constant 0 : index
    %c0_26 = arith.constant 0 : index
    %c0_27 = arith.constant 0 : index
    %37 = vector.load %arg2[%c0_24, %c0_25, %c0_26, %c0_27] : memref<1x8x16x128xf32, #tpu.memory_space<vmem>>, vector<1x8x16x128xf32>
    %38 = vector.shape_cast %37 : vector<1x8x16x128xf32> to vector<8x16x128xf32>
    %39 = vector.shape_cast %1 : vector<128xf32> to vector<1x1x128xf32>
    %40 = vector.broadcast %39 : vector<1x1x128xf32> to vector<8x16x128xf32>
    %41 = arith.mulf %38, %40 : vector<8x16x128xf32>
    %42 = vector.shape_cast %3 : vector<128xf32> to vector<1x1x128xf32>
    %43 = vector.broadcast %42 : vector<1x1x128xf32> to vector<8x16x128xf32>
    %44 = arith.addf %41, %43 : vector<8x16x128xf32>
    %cst_28 = arith.constant 0.000000e+00 : f32
    %45 = vector.broadcast %cst_28 : f32 to vector<8x16x128xf32>
    %46 = arith.maximumf %44, %45 : vector<8x16x128xf32>
    %c1_29 = arith.constant 1 : index
    %c1_30 = arith.constant 1 : index
    %c0_31 = arith.constant 0 : index
    %47 = vector.load %arg11[%c1_29, %c1_30, %c0_31] : memref<10x18x128xf32, #tpu.memory_space<vmem>>, vector<8x16x128xf32>
    tpu.vector_store %arg11[%c1_29, %c1_30, %c0_31], %46 {strides = array<i32>} : memref<10x18x128xf32, #tpu.memory_space<vmem>>, vector<8x16x128xf32>,
    %cst_32 = arith.constant 0.000000e+00 : f32
    %48 = vector.broadcast %cst_32 : f32 to vector<128x128xf32>
    %c0_33 = arith.constant 0 : index
    %c0_34 = arith.constant 0 : index
    %c0_35 = arith.constant 0 : index
    %49 = vector.load %arg11[%c0_33, %c0_34, %c0_35] : memref<10x18x128xf32, #tpu.memory_space<vmem>>, vector<8x16x128xf32>
    %50 = vector.shape_cast %49 : vector<8x16x128xf32> to vector<128x128xf32>
    %c0_36 = arith.constant 0 : index
    %c0_37 = arith.constant 0 : index
    %c0_38 = arith.constant 0 : index
    %51 = vector.load %arg5[%c0_36, %c0_37, %c0_38] : memref<9x128x128xf32, #tpu.memory_space<vmem>>, vector<1x128x128xf32>
    %52 = vector.shape_cast %51 : vector<1x128x128xf32> to vector<128x128xf32>
    %cst_39 = arith.constant dense<0.000000e+00> : vector<128x128xf32>
    %53 = tpu.matmul %50, %52, %cst_39 {dimension_numbers = #tpu.dot_dimension_numbers<[1], [0], [0], [1], [0, 0, 1, 1], [], []>} : vector<128x128xf32>, vector<128x128xf32>, vector<128x128xf32> -> vector<128x128xf32>
    %54 = arith.addf %48, %53 : vector<128x128xf32>
    %c0_40 = arith.constant 0 : index
    %c1_41 = arith.constant 1 : index
    %c0_42 = arith.constant 0 : index
    %55 = vector.load %arg11[%c0_40, %c1_41, %c0_42] : memref<10x18x128xf32, #tpu.memory_space<vmem>>, vector<8x16x128xf32>
    %56 = vector.shape_cast %55 : vector<8x16x128xf32> to vector<128x128xf32>
    %c1_43 = arith.constant 1 : index
    %c0_44 = arith.constant 0 : index
    %c0_45 = arith.constant 0 : index
    %57 = vector.load %arg5[%c1_43, %c0_44, %c0_45] : memref<9x128x128xf32, #tpu.memory_space<vmem>>, vector<1x128x128xf32>
    %58 = vector.shape_cast %57 : vector<1x128x128xf32> to vector<128x128xf32>
    %cst_46 = arith.constant dense<0.000000e+00> : vector<128x128xf32>
    %59 = tpu.matmul %56, %58, %cst_46 {dimension_numbers = #tpu.dot_dimension_numbers<[1], [0], [0], [1], [0, 0, 1, 1], [], []>} : vector<128x128xf32>, vector<128x128xf32>, vector<128x128xf32> -> vector<128x128xf32>
    %60 = arith.addf %54, %59 : vector<128x128xf32>
    %c0_47 = arith.constant 0 : index
    %c2 = arith.constant 2 : index
    %c0_48 = arith.constant 0 : index
    %61 = vector.load %arg11[%c0_47, %c2, %c0_48] : memref<10x18x128xf32, #tpu.memory_space<vmem>>, vector<8x16x128xf32>
    %62 = vector.shape_cast %61 : vector<8x16x128xf32> to vector<128x128xf32>
    %c2_49 = arith.constant 2 : index
    %c0_50 = arith.constant 0 : index
    %c0_51 = arith.constant 0 : index
    %63 = vector.load %arg5[%c2_49, %c0_50, %c0_51] : memref<9x128x128xf32, #tpu.memory_space<vmem>>, vector<1x128x128xf32>
    %64 = vector.shape_cast %63 : vector<1x128x128xf32> to vector<128x128xf32>
    %cst_52 = arith.constant dense<0.000000e+00> : vector<128x128xf32>
    %65 = tpu.matmul %62, %64, %cst_52 {dimension_numbers = #tpu.dot_dimension_numbers<[1], [0], [0], [1], [0, 0, 1, 1], [], []>} : vector<128x128xf32>, vector<128x128xf32>, vector<128x128xf32> -> vector<128x128xf32>
    %66 = arith.addf %60, %65 : vector<128x128xf32>
    %c1_53 = arith.constant 1 : index
    %c0_54 = arith.constant 0 : index
    %c0_55 = arith.constant 0 : index
    %67 = vector.load %arg11[%c1_53, %c0_54, %c0_55] : memref<10x18x128xf32, #tpu.memory_space<vmem>>, vector<8x16x128xf32>
    %68 = vector.shape_cast %67 : vector<8x16x128xf32> to vector<128x128xf32>
    %c3 = arith.constant 3 : index
    %c0_56 = arith.constant 0 : index
    %c0_57 = arith.constant 0 : index
    %69 = vector.load %arg5[%c3, %c0_56, %c0_57] : memref<9x128x128xf32, #tpu.memory_space<vmem>>, vector<1x128x128xf32>
    %70 = vector.shape_cast %69 : vector<1x128x128xf32> to vector<128x128xf32>
    %cst_58 = arith.constant dense<0.000000e+00> : vector<128x128xf32>
    %71 = tpu.matmul %68, %70, %cst_58 {dimension_numbers = #tpu.dot_dimension_numbers<[1], [0], [0], [1], [0, 0, 1, 1], [], []>} : vector<128x128xf32>, vector<128x128xf32>, vector<128x128xf32> -> vector<128x128xf32>
    %72 = arith.addf %66, %71 : vector<128x128xf32>
    %c1_59 = arith.constant 1 : index
    %c1_60 = arith.constant 1 : index
    %c0_61 = arith.constant 0 : index
    %73 = vector.load %arg11[%c1_59, %c1_60, %c0_61] : memref<10x18x128xf32, #tpu.memory_space<vmem>>, vector<8x16x128xf32>
    %74 = vector.shape_cast %73 : vector<8x16x128xf32> to vector<128x128xf32>
    %c4 = arith.constant 4 : index
    %c0_62 = arith.constant 0 : index
    %c0_63 = arith.constant 0 : index
    %75 = vector.load %arg5[%c4, %c0_62, %c0_63] : memref<9x128x128xf32, #tpu.memory_space<vmem>>, vector<1x128x128xf32>
    %76 = vector.shape_cast %75 : vector<1x128x128xf32> to vector<128x128xf32>
    %cst_64 = arith.constant dense<0.000000e+00> : vector<128x128xf32>
    %77 = tpu.matmul %74, %76, %cst_64 {dimension_numbers = #tpu.dot_dimension_numbers<[1], [0], [0], [1], [0, 0, 1, 1], [], []>} : vector<128x128xf32>, vector<128x128xf32>, vector<128x128xf32> -> vector<128x128xf32>
    %78 = arith.addf %72, %77 : vector<128x128xf32>
    %c1_65 = arith.constant 1 : index
    %c2_66 = arith.constant 2 : index
    %c0_67 = arith.constant 0 : index
    %79 = vector.load %arg11[%c1_65, %c2_66, %c0_67] : memref<10x18x128xf32, #tpu.memory_space<vmem>>, vector<8x16x128xf32>
    %80 = vector.shape_cast %79 : vector<8x16x128xf32> to vector<128x128xf32>
    %c5 = arith.constant 5 : index
    %c0_68 = arith.constant 0 : index
    %c0_69 = arith.constant 0 : index
    %81 = vector.load %arg5[%c5, %c0_68, %c0_69] : memref<9x128x128xf32, #tpu.memory_space<vmem>>, vector<1x128x128xf32>
    %82 = vector.shape_cast %81 : vector<1x128x128xf32> to vector<128x128xf32>
    %cst_70 = arith.constant dense<0.000000e+00> : vector<128x128xf32>
    %83 = tpu.matmul %80, %82, %cst_70 {dimension_numbers = #tpu.dot_dimension_numbers<[1], [0], [0], [1], [0, 0, 1, 1], [], []>} : vector<128x128xf32>, vector<128x128xf32>, vector<128x128xf32> -> vector<128x128xf32>
    %84 = arith.addf %78, %83 : vector<128x128xf32>
    %c2_71 = arith.constant 2 : index
    %c0_72 = arith.constant 0 : index
    %c0_73 = arith.constant 0 : index
    %85 = vector.load %arg11[%c2_71, %c0_72, %c0_73] : memref<10x18x128xf32, #tpu.memory_space<vmem>>, vector<8x16x128xf32>
    %86 = vector.shape_cast %85 : vector<8x16x128xf32> to vector<128x128xf32>
    %c6 = arith.constant 6 : index
    %c0_74 = arith.constant 0 : index
    %c0_75 = arith.constant 0 : index
    %87 = vector.load %arg5[%c6, %c0_74, %c0_75] : memref<9x128x128xf32, #tpu.memory_space<vmem>>, vector<1x128x128xf32>
    %88 = vector.shape_cast %87 : vector<1x128x128xf32> to vector<128x128xf32>
    %cst_76 = arith.constant dense<0.000000e+00> : vector<128x128xf32>
    %89 = tpu.matmul %86, %88, %cst_76 {dimension_numbers = #tpu.dot_dimension_numbers<[1], [0], [0], [1], [0, 0, 1, 1], [], []>} : vector<128x128xf32>, vector<128x128xf32>, vector<128x128xf32> -> vector<128x128xf32>
    %90 = arith.addf %84, %89 : vector<128x128xf32>
    %c2_77 = arith.constant 2 : index
    %c1_78 = arith.constant 1 : index
    %c0_79 = arith.constant 0 : index
    %91 = vector.load %arg11[%c2_77, %c1_78, %c0_79] : memref<10x18x128xf32, #tpu.memory_space<vmem>>, vector<8x16x128xf32>
    %92 = vector.shape_cast %91 : vector<8x16x128xf32> to vector<128x128xf32>
    %c7 = arith.constant 7 : index
    %c0_80 = arith.constant 0 : index
    %c0_81 = arith.constant 0 : index
    %93 = vector.load %arg5[%c7, %c0_80, %c0_81] : memref<9x128x128xf32, #tpu.memory_space<vmem>>, vector<1x128x128xf32>
    %94 = vector.shape_cast %93 : vector<1x128x128xf32> to vector<128x128xf32>
    %cst_82 = arith.constant dense<0.000000e+00> : vector<128x128xf32>
    %95 = tpu.matmul %92, %94, %cst_82 {dimension_numbers = #tpu.dot_dimension_numbers<[1], [0], [0], [1], [0, 0, 1, 1], [], []>} : vector<128x128xf32>, vector<128x128xf32>, vector<128x128xf32> -> vector<128x128xf32>
    %96 = arith.addf %90, %95 : vector<128x128xf32>
    %c2_83 = arith.constant 2 : index
    %c2_84 = arith.constant 2 : index
    %c0_85 = arith.constant 0 : index
    %97 = vector.load %arg11[%c2_83, %c2_84, %c0_85] : memref<10x18x128xf32, #tpu.memory_space<vmem>>, vector<8x16x128xf32>
    %98 = vector.shape_cast %97 : vector<8x16x128xf32> to vector<128x128xf32>
    %c8 = arith.constant 8 : index
    %c0_86 = arith.constant 0 : index
    %c0_87 = arith.constant 0 : index
    %99 = vector.load %arg5[%c8, %c0_86, %c0_87] : memref<9x128x128xf32, #tpu.memory_space<vmem>>, vector<1x128x128xf32>
    %100 = vector.shape_cast %99 : vector<1x128x128xf32> to vector<128x128xf32>
    %cst_88 = arith.constant dense<0.000000e+00> : vector<128x128xf32>
    %101 = tpu.matmul %98, %100, %cst_88 {dimension_numbers = #tpu.dot_dimension_numbers<[1], [0], [0], [1], [0, 0, 1, 1], [], []>} : vector<128x128xf32>, vector<128x128xf32>, vector<128x128xf32> -> vector<128x128xf32>
    %102 = arith.addf %96, %101 : vector<128x128xf32>
    %103 = vector.shape_cast %102 : vector<128x128xf32> to vector<8x16x128xf32>
    %c0_89 = arith.constant 0 : index
    %c0_90 = arith.constant 0 : index
    %c0_91 = arith.constant 0 : index
    %c0_92 = arith.constant 0 : index
    %104 = vector.load %arg8[%c0_89, %c0_90, %c0_91, %c0_92] : memref<1x8x16x128xf32, #tpu.memory_space<vmem>>, vector<1x8x16x128xf32>
    %105 = vector.shape_cast %104 : vector<1x8x16x128xf32> to vector<8x16x128xf32>
    %106 = vector.shape_cast %103 : vector<8x16x128xf32> to vector<1x8x16x128xf32>
    tpu.vector_store %arg8[%c0_89, %c0_90, %c0_91, %c0_92], %106 {strides = array<i32>} : memref<1x8x16x128xf32, #tpu.memory_space<vmem>>, vector<1x8x16x128xf32>,
    %cst_93 = arith.constant dense<0.000000e+00> : vector<128xf32>
    %107 = vector.multi_reduction <add>, %102, %cst_93 [0] : vector<128x128xf32> to vector<128xf32>
    %108 = vector.shape_cast %107 : vector<128xf32> to vector<1x1x1x128xf32>
    %c0_94 = arith.constant 0 : index
    %c0_95 = arith.constant 0 : index
    %c0_96 = arith.constant 0 : index
    %c0_97 = arith.constant 0 : index
    %109 = vector.load %arg9[%c0_94, %c0_95, %c0_96, %c0_97] : memref<1x1x1x128xf32, #tpu.memory_space<vmem>>, vector<1x1x1x128xf32>
    tpu.vector_store %arg9[%c0_94, %c0_95, %c0_96, %c0_97], %108 {strides = array<i32>} : memref<1x1x1x128xf32, #tpu.memory_space<vmem>>, vector<1x1x1x128xf32>,
    %110 = arith.mulf %102, %102 : vector<128x128xf32>
    %cst_98 = arith.constant dense<0.000000e+00> : vector<128xf32>
    %111 = vector.multi_reduction <add>, %110, %cst_98 [0] : vector<128x128xf32> to vector<128xf32>
    %112 = vector.shape_cast %111 : vector<128xf32> to vector<1x1x1x128xf32>
    %c0_99 = arith.constant 0 : index
    %c0_100 = arith.constant 0 : index
    %c0_101 = arith.constant 0 : index
    %c0_102 = arith.constant 0 : index
    %113 = vector.load %arg10[%c0_99, %c0_100, %c0_101, %c0_102] : memref<1x1x1x128xf32, #tpu.memory_space<vmem>>, vector<1x1x1x128xf32>
    tpu.vector_store %arg10[%c0_99, %c0_100, %c0_101, %c0_102], %112 {strides = array<i32>} : memref<1x1x1x128xf32, #tpu.memory_space<vmem>>, vector<1x1x1x128xf32>,
    return
  }
  func.func @transform_0(%arg0: i32, %arg1: i32) -> (i32, i32, i32, i32) {
    %c0_i32 = arith.constant 0 : i32
    %c0_i32_0 = arith.constant 0 : i32
    %c0_i32_1 = arith.constant 0 : i32
    return %arg0, %arg1, %c0_i32, %c0_i32_0 : i32, i32, i32, i32
  }
  func.func @transform_1(%arg0: i32, %arg1: i32) -> (i32, i32, i32, i32) {
    %c8_i32 = arith.constant 8 : i32
    %0 = arith.muli %arg1, %c8_i32 : i32
    %c1_i32 = arith.constant 1 : i32
    %1 = arith.subi %0, %c1_i32 : i32
    %c0_i32 = arith.constant 0 : i32
    %2 = arith.maxsi %1, %c0_i32 : i32
    %c0_i32_0 = arith.constant 0 : i32
    %c0_i32_1 = arith.constant 0 : i32
    %c0_i32_2 = arith.constant 0 : i32
    return %arg0, %2, %c0_i32_0, %c0_i32_1 : i32, i32, i32, i32
  }
  func.func @transform_2(%arg0: i32, %arg1: i32) -> (i32, i32, i32, i32) {
    %c1_i32 = arith.constant 1 : i32
    %0 = arith.addi %arg1, %c1_i32 : i32
    %c8_i32 = arith.constant 8 : i32
    %1 = arith.muli %0, %c8_i32 : i32
    %c15_i32 = arith.constant 15 : i32
    %2 = arith.minsi %1, %c15_i32 : i32
    %c0_i32 = arith.constant 0 : i32
    %c0_i32_0 = arith.constant 0 : i32
    %c0_i32_1 = arith.constant 0 : i32
    return %arg0, %2, %c0_i32, %c0_i32_0 : i32, i32, i32, i32
  }
  func.func @transform_3(%arg0: i32, %arg1: i32) -> (i32, i32, i32) {
    %c0_i32 = arith.constant 0 : i32
    %c0_i32_0 = arith.constant 0 : i32
    %c0_i32_1 = arith.constant 0 : i32
    %c0_i32_2 = arith.constant 0 : i32
    return %c0_i32, %c0_i32_0, %c0_i32_1 : i32, i32, i32
  }
  func.func @transform_4(%arg0: i32, %arg1: i32) -> (i32, i32) {
    %c0_i32 = arith.constant 0 : i32
    %c0_i32_0 = arith.constant 0 : i32
    %c0_i32_1 = arith.constant 0 : i32
    return %c0_i32, %c0_i32_0 : i32, i32
  }
  func.func @transform_5(%arg0: i32, %arg1: i32) -> (i32, i32) {
    %c0_i32 = arith.constant 0 : i32
    %c0_i32_0 = arith.constant 0 : i32
    %c0_i32_1 = arith.constant 0 : i32
    return %c0_i32, %c0_i32_0 : i32, i32
  }
  func.func @transform_6(%arg0: i32, %arg1: i32) -> (i32, i32, i32, i32) {
    %c0_i32 = arith.constant 0 : i32
    %c0_i32_0 = arith.constant 0 : i32
    %c0_i32_1 = arith.constant 0 : i32
    return %arg0, %arg1, %c0_i32, %c0_i32_0 : i32, i32, i32, i32
  }
  func.func @transform_7(%arg0: i32, %arg1: i32) -> (i32, i32, i32, i32) {
    %c0_i32 = arith.constant 0 : i32
    %c0_i32_0 = arith.constant 0 : i32
    %c0_i32_1 = arith.constant 0 : i32
    return %arg0, %arg1, %c0_i32, %c0_i32_0 : i32, i32, i32, i32
  }
  func.func @transform_8(%arg0: i32, %arg1: i32) -> (i32, i32, i32, i32) {
    %c0_i32 = arith.constant 0 : i32
    %c0_i32_0 = arith.constant 0 : i32
    %c0_i32_1 = arith.constant 0 : i32
    return %arg0, %arg1, %c0_i32, %c0_i32_0 : i32, i32, i32, i32
  }
}

</mosaic_0001>

<bundles_post_ra>
// kernel: double_conv.2
= control target key start
LH: loop header
LB: loop body
LE: loop exit
PB: predicated region body
PF: predicated region fallthrough
CT: control target
= control target key end

     0   :  { %s3790_s27 = smov 0   ;;  %s3792_s28 = smov 0   ;;  %s4404_s0 = inlined_call_operand.vmem [shape: f32[2,16,16,4], index: 0, kind: input, shape index: {}, may-alias: {0,1,2}]   ;;  %s4405_s1 = inlined_call_operand.vmem [shape: f32[2,16,16,4], index: 1, kind: input, shape index: {}, may-alias: {0,1,2}]   ;;  %s4406_s2 = inlined_call_operand.vmem [shape: f32[2,16,16,4], index: 2, kind: input, shape index: {}, may-alias: {0,1,2}]   ;;  %s4407_s3 = inlined_call_operand.vmem [shape: f32[9,4,128], index: 3, kind: input, shape index: {}]   ;;  %s4408_s4 = inlined_call_operand.vmem [shape: f32[1,4], index: 4, kind: input, shape index: {}]   ;;  %s4409_s5 = inlined_call_operand.vmem [shape: f32[1,4], index: 5, kind: input, shape index: {}]   ;;  %s4410_s6 = inlined_call_operand.vmem [shape: f32[2,16,16,128], index: 6, kind: output, shape index: {0}]   ;;  %s4411_s7 = inlined_call_operand.vmem [shape: f32[2,2,1,128], index: 7, kind: output, shape index: {1}]   ;;  %s4412_s8 = inlined_call_operand.vmem [shape: f32[2,2,1,128], index: 8, kind: output, shape index: {2}]  }
   0x1   :  { %s3794_s29 = smov 0   ;;  %s3796_s30 = smov 0  }
   0x2   :  { %s3798_s4 = smov 0  }
   0x3 LB: > { %s28_s5 = sadd.s32 1, %s3734_s29  ;;  %s31_s9 = sadd.s32 1, %s3738_s30  ;;  %s3742_s4 = sphi %s3798_s4, %s19_s4   ;;  %s3738_s30 = sphi %s3796_s30, %s4417_s30   ;;  %s3734_s29 = sphi %s3794_s29, %s4416_s29   ;;  %s3730_s28 = sphi %s3792_s28, %s4415_s28   ;;  %s3726_s27 = sphi %s3790_s27, %s4414_s27  }
   0x4   : > { %p29_p0 = scmp.ge.s32.totalorder %s28_s5, 2  ;;  %p2935_p1 = scmp.ge.s32.totalorder %s3742_s4, 1 }
   0x5   : > { %p357_p2 = scmp.lt.s32.totalorder %s3742_s4, 5 }
   0x6   : > { %s4419_s5 = smov (%p29_p0, %s28_s5), 0  ;;  %s4421_s9 = smov (!%p29_p0, %s31_s9), %s3738_s30 }
   0x7   : > { %p358_p3 = pnand %p2935_p1, %p357_p2  ;;  %p33_p4 = scmp.ge.s32.totalorder %s4421_s9, 2 }
   0x8   : > { %vm670_vm0 = vcmask (!%p358_p3), 1043456   ;;  %v3825_v0 = vld [vmem:[%s4407_s3 + $0x10] sm:$0xf] (!%p358_p3)  ;;  %s3828_s12 = sshll.u32 (!%p358_p3), %s3726_s27, 3  ;;  %p442_p5 = scmp.lt.s32.totalorder (!%p358_p3), %s3730_s28, 1  ;;  %vm511_vm1 = vcmask (!%p358_p3), 24576  }
   0x9   : > { %s4423_s9 = smov (%p33_p4, %s4421_s9), 0  ;;  %361 = sbr.rel (%p358_p3) target bundleno = 415 (0x19f), region = 44 }
   0xa   : > { %3391 = vmatprep.subr.msk.mxu0 (!%p358_p3), %vm670_vm0, %v3825_v0  ;;  %p444_p6 = scmp.lt.s32.totalorder (!%p358_p3), %s3828_s12, 15  ;;  %v2963_v1 = vld [vmem:[%s4407_s3 + $0x4] sm:$0xf] (!%p358_p3)  ;;  %s3837_s15 = sadd.s32 (!%p358_p3), 4294967295, %s3828_s12  ;;  %v3842_v2 = vld [vmem:[%s4407_s3] sm:$0xf] (!%p358_p3) }
   0xb   : > { %3392 = vmatpush3.msk.msra.mxu0 (!%p358_p3), %vm670_vm0, %v3825_v0  ;;  %3287 = vmatprep.subr.msk.mxu1 (!%p358_p3), %vm670_vm0, %v2963_v1  ;;  %v3852_v3 = vld [vmem:[%s4407_s3 + $0x14] sm:$0xf] (!%p358_p3)  ;;  %v3744_v4 = vmov (!%p358_p3), 0.0   ;;  %p454_p7 = scmp.gt.s32.totalorder (!%p358_p3), %s3837_s15, 0  ;;  %p534_p8 = scmp.gt.s32.totalorder (!%p358_p3), %s3726_s27, 0  ;;  %vm540_vm2 = vcmask (!%p358_p3), 31744  }
   0xc   : > { %3288 = vmatpush3.msk.msra.mxu1 (!%p358_p3), %vm670_vm0, %v2963_v1  ;;  %3417 = vmatprep.subr.msk.mxu0 (!%p358_p3), %vm670_vm0, %v3852_v3  ;;  %523 = vst.msk [vmem:[#allocation2 + $0x29] sm:$0x1] (!%p358_p3), %vm511_vm1, %v3744_v4  ;;  %512 = vst.msk [vmem:[#allocation2] sm:$0x1] (!%p358_p3), %vm511_vm1, %v3744_v4  ;;  %p2942_p9 = scmp.lt.s32.totalorder (!%p358_p3), %s3837_s15, 15  ;;  %s3133_s11 = sadd.s32 (!%p358_p3), 8, %s3828_s12 }
   0xd   : > { %513 = vst.msk [vmem:[#allocation2 + $0x18] sm:$0x1] (!%p358_p3), %vm511_vm1, %v3744_v4  ;;  %514 = vst.msk [vmem:[#allocation2 + $0x30] sm:$0x1] (!%p358_p3), %vm511_vm1, %v3744_v4  ;;  %3313 = vmatprep.subr.msk.mxu1 (!%p358_p3), %vm670_vm0, %v3842_v2  ;;  %p3935_p10 = scmp.lt.s32.totalorder (!%p358_p3), %s3133_s11, 15  ;;  %p499_p11 = scmp.lt.s32.totalorder (!%p358_p3), %s3726_s27, 1 }
   0xe   : > { %515 = vst.msk [vmem:[#allocation2 + $0x48] sm:$0x1] (!%p358_p3), %vm511_vm1, %v3744_v4  ;;  %516 = vst.msk [vmem:[#allocation2 + $0x60] sm:$0x1] (!%p358_p3), %vm511_vm1, %v3744_v4  ;;  %v3070_v24 = vld [vmem:[%s4407_s3 + $0x18] sm:$0xf] (!%p358_p3) }
   0xf   : > { %517 = vst.msk [vmem:[#allocation2 + $0x78] sm:$0x1] (!%p358_p3), %vm511_vm1, %v3744_v4  ;;  %518 = vst.msk [vmem:[#allocation2 + $0x90] sm:$0x1] (!%p358_p3), %vm511_vm1, %v3744_v4  ;;  %v3986_v34 = vld [vmem:[%s4407_s3 + $0x8] sm:$0xf] (!%p358_p3) }
  0x10   : > { %s4425_s28 = smov (!%p442_p5, %s3730_s28), 1  ;;  %519 = vst.msk [vmem:[#allocation2 + $0xa8] sm:$0x1] %vm511_vm1, %v3744_v4  ;;  %520 = vst.msk [vmem:[#allocation2 + $0xc0] sm:$0x1] %vm511_vm1, %v3744_v4  ;;  %s4427_s15 = smov (!%p454_p7, %s3837_s15), 0 }
  0x11   : > { %s3855_s20 = scalar_select %p444_p6, %s3828_s12, 15  ;;  %521 = vst.msk [vmem:[#allocation2 + $0xd8] sm:$0x1] %vm511_vm1, %v3744_v4  ;;  %522 = vst.msk [vmem:[#allocation2 + $0x11] sm:$0x1] %vm511_vm1, %v3744_v4 }
  0x12   : > { %524 = vst.msk [vmem:[#allocation2 + $0x41] sm:$0x1] %vm511_vm1, %v3744_v4  ;;  %525 = vst.msk [vmem:[#allocation2 + $0x59] sm:$0x1] %vm511_vm1, %v3744_v4  ;;  %s3881_s21 = sshll.u32 %s4425_s28, 5  ;;  %s4429_s15 = smov (!%p2942_p9, %s4427_s15), 15 }
  0x13   : > { %526 = vst.msk [vmem:[#allocation2 + $0x71] sm:$0x1] %vm511_vm1, %v3744_v4  ;;  %527 = vst.msk [vmem:[#allocation2 + $0x89] sm:$0x1] %vm511_vm1, %v3744_v4  ;;  %s2937_s22 = sshll.u32 %s3855_s20, 1  ;;  %s2947_s13 = sshll.u32 %s4429_s15, 1 }
  0x14   : > { %528 = vst.msk [vmem:[#allocation2 + $0xa1] sm:$0x1] %vm511_vm1, %v3744_v4  ;;  %529 = vst.msk [vmem:[#allocation2 + $0xb9] sm:$0x1] %vm511_vm1, %v3744_v4  ;;  %s3888_s23 = sadd.s32 %s3881_s21, %s2937_s22  ;;  %s462_s14 = sadd.s32 %s2947_s13, %s3881_s21  ;;  %v4015_v38 = vld [vmem:[%s4407_s3 + $0x1c] sm:$0xf] }
  0x15   : > { %530 = vst.msk [vmem:[#allocation2 + $0xd1] sm:$0x1] %vm511_vm1, %v3744_v4  ;;  %531 = vst.msk [vmem:[#allocation2 + $0xe9] sm:$0x1] %vm511_vm1, %v3744_v4  ;;  %s2939_s24 = sshll.u32 %s3888_s23, 3  ;;  %s2949_s12 = sshll.u32 %s462_s14, 3 }
  0x16   : > { %s3898_s10 = scalar_lea.vmem %s4404_s0, %s2939_s24  ;;  %s464_s18 = scalar_lea.vmem %s4405_s1, %s2949_s12  ;;  %v3016_v63 = vld [vmem:[%s4407_s3 + $0xc] sm:$0xf]  ;;  %v3106_v4 = vld [vmem:[%s4407_s3 + $0x20] sm:$0xf] }
  0x17   : > { %v554_v5 = vld [vmem:[%s3898_s10] sm:$0xff]  ;;  %v555_v6 = vld [vmem:[%s3898_s10 + $0x8] sm:$0xff]  ;;  %v556_v7 = vld [vmem:[%s3898_s10 + $0x10] sm:$0xff]  ;;  %s3693_s19 = scalar_select %p534_p8, 255, 0 }
  0x18   : > { %571 = vst.msk [vmem:[#allocation2 + $0x19] sm:$0xff] %vm540_vm2, %v554_v5  ;;  %572 = vst.msk [vmem:[#allocation2 + $0x21] sm:$0xff] %vm540_vm2, %v555_v6  ;;  %v557_v8 = vld [vmem:[%s3898_s10 + $0x18] sm:$0xff]  ;;  %v558_v9 = vld [vmem:[%s3898_s10 + $0x20] sm:$0xff]  ;;  %s4431_s11 = smov (!%p3935_p10, %s3133_s11), 15  ;;  %s4435_s27 = smov (!%p499_p11, %s3726_s27), 1 }
  0x19   : > { %573 = vst.msk [vmem:[#allocation2 + $0x31] sm:$0xff] %vm540_vm2, %v556_v7  ;;  %v559_v10 = vld [vmem:[%s3898_s10 + $0x28] sm:$0xff]  ;;  %574 = vst.msk [vmem:[#allocation2 + $0x39] sm:$0xff] %vm540_vm2, %v557_v8  ;;  %v560_v11 = vld [vmem:[%s3898_s10 + $0x30] sm:$0xff]  ;;  %s4433_s11 = smov (!%p3935_p10, %s4431_s11), 15  ;;  %s2961_s23 = sshll.u32 %s4425_s28, 1 }
  0x1a   : > { %575 = vst.msk [vmem:[#allocation2 + $0x49] sm:$0xff] %vm540_vm2, %v558_v9  ;;  %576 = vst.msk [vmem:[#allocation2 + $0x51] sm:$0xff] %vm540_vm2, %v559_v10  ;;  %v561_v12 = vld [vmem:[%s3898_s10 + $0x38] sm:$0xff]  ;;  %v562_v13 = vld [vmem:[%s3898_s10 + $0x40] sm:$0xff]  ;;  %s2954_s25 = sshll.u32 %s4433_s11, 1 }
  0x1b   : > { %577 = vst.msk [vmem:[#allocation2 + $0x61] sm:$0xff] %vm540_vm2, %v560_v11  ;;  %578 = vst.msk [vmem:[#allocation2 + $0x69] sm:$0xff] %vm540_vm2, %v561_v12  ;;  %v563_v14 = vld [vmem:[%s3898_s10 + $0x48] sm:$0xff]  ;;  %v564_v15 = vld [vmem:[%s3898_s10 + $0x50] sm:$0xff]  ;;  %s479_s26 = sadd.s32 %s2954_s25, %s3881_s21 }
  0x1c   : > { %579 = vst.msk [vmem:[#allocation2 + $0x79] sm:$0xff] %vm540_vm2, %v562_v13  ;;  %v565_v16 = vld [vmem:[%s3898_s10 + $0x58] sm:$0xff]  ;;  %580 = vst.msk [vmem:[#allocation2 + $0x81] sm:$0xff] %vm540_vm2, %v563_v14  ;;  %v566_v17 = vld [vmem:[%s3898_s10 + $0x60] sm:$0xff]  ;;  %s2956_s21 = sshll.u32 %s479_s26, 3 }
  0x1d   : > { %581 = vst.msk [vmem:[#allocation2 + $0x91] sm:$0xff] %vm540_vm2, %v564_v15  ;;  %582 = vst.msk [vmem:[#allocation2 + $0x99] sm:$0xff] %vm540_vm2, %v565_v16  ;;  %v567_v18 = vld [vmem:[%s3898_s10 + $0x68] sm:$0xff]  ;;  %v568_v19 = vld [vmem:[%s3898_s10 + $0x70] sm:$0xff]  ;;  %s3699_s13 = scalar_select %p499_p11, 255, 0 }
  0x1e   : > { %583 = vst.msk [vmem:[#allocation2 + $0xa9] sm:$0xff] %vm540_vm2, %v566_v17  ;;  %584 = vst.msk [vmem:[#allocation2 + $0xb1] sm:$0xff] %vm540_vm2, %v567_v18  ;;  %v569_v20 = vld [vmem:[%s3898_s10 + $0x78] sm:$0xff]  ;;  %v3694_v25 = vld [vmem:[%s464_s18] sm:%s3693_s19]  ;;  %s481_s15 = scalar_lea.vmem %s4406_s2, %s2956_s21  ;;  %s4361_s10 = scalar_lea.vmem %s4410_s6, %s2939_s24 }
  0x1f   : > { %585 = vst.msk [vmem:[#allocation2 + $0xc1] sm:$0xff] %vm540_vm2, %v568_v19  ;;  %586 = vst.msk [vmem:[#allocation2 + $0xc9] sm:$0xff] %vm540_vm2, %v569_v20  ;;  %v1475_v21 = vld [vmem:[#allocation2 + $0x19] sm:$0xff]  ;;  %v1476_v22 = vld [vmem:[#allocation2 + $0x21] sm:$0xff]  ;;  %s502_s24 = sadd.s32 %s2961_s23, %s4435_s27 }
  0x20   : > { %v3945_v23 = vld [vmem:[#allocation2 + $0x31] sm:$0xff]  ;;  %3393 = vmatprep.mubr.msk.f32.mxu0 %vm540_vm2, %v1475_v21  ;;  %v3697_v26 = vld [vmem:[%s464_s18 + $0x8] sm:%s3693_s19]  ;;  %541 = vst.msk [vmem:[#allocation2 + $0x1] sm:$0xff] %vm540_vm2, %v3694_v25  ;;  %v3957_v27 = vld [vmem:[#allocation2 + $0x39] sm:$0xff] }
  0x21   : > { %3394 = vmatmul.mubr.msk.f32.vlgmr.msra.gmra.mrb[0].mxu0 %vm540_vm2, %v1476_v22  ;;  %542 = vst.msk [vmem:[#allocation2 + $0x9] sm:$0xff] %vm540_vm2, %v3697_v26  ;;  %v3962_v28 = vld [vmem:[#allocation2 + $0x49] sm:$0xff]  ;;  %v3971_v29 = vld [vmem:[#allocation2 + $0x51] sm:$0xff]  ;;  %v3989_v35 = vld [vmem:[#allocation2 + $0x1a] sm:$0xff] }
  0x22   : > { %3396 = vmatprep.mubr.msk.f32.mxu0 %vm540_vm2, %v3945_v23  ;;  %3418 = vmatpush3.msk.msra.mxu0 %vm670_vm0, %v3852_v3  ;;  %v3973_v30 = vld [vmem:[#allocation2 + $0x61] sm:$0xff]  ;;  %v3981_v33 = vld [vmem:[#allocation2 + $0x69] sm:$0xff]  ;;  %v4008_v37 = vld [vmem:[#allocation2 + $0x32] sm:$0xff] }
  0x23   : > { %3443 = vmatprep.subr.msk.mxu0 %vm670_vm0, %v3070_v24  ;;  %v4002_v36 = vld [vmem:[#allocation2 + $0x22] sm:$0xff]  ;;  %v4021_v41 = vld [vmem:[#allocation2 + $0x3a] sm:$0xff]  ;;  %v4028_v42 = vld [vmem:[#allocation2 + $0x4a] sm:$0xff] }
  0x24   : > { %v3700_v39 = vld [vmem:[%s481_s15] sm:%s3699_s13]  ;;  %v3703_v40 = vld [vmem:[%s481_s15 + $0x8] sm:%s3699_s13]  ;;  %v4038_v43 = vld [vmem:[#allocation2 + $0x52] sm:$0xff]  ;;  %s503_s13 = scalar_lea.vmem %s4411_s7, %s502_s24  ;;  %s510_s15 = scalar_lea.vmem %s4412_s8, %s502_s24 }
  0x25   : > { %3397 = vmatmul.mubr.msk.f32.gmra.mrb[2].mxu0 %vm540_vm2, %v3957_v27  ;;  %552 = vst.msk [vmem:[#allocation2 + $0xd9] sm:$0xff] %vm540_vm2, %v3700_v39  ;;  %553 = vst.msk [vmem:[#allocation2 + $0xe1] sm:$0xff] %vm540_vm2, %v3703_v40  ;;  %v4042_v44 = vld [vmem:[#allocation2 + $0x62] sm:$0xff]  ;;  %v4046_v45 = vld [vmem:[#allocation2 + $0x79] sm:$0xff] }
  0x26   : > { %3399 = vmatprep.mubr.msk.f32.mxu0 %vm540_vm2, %v3962_v28  ;;  %v4052_v46 = vld [vmem:[#allocation2 + $0x6a] sm:$0xff]  ;;  %v4056_v47 = vld [vmem:[#allocation2 + $0x7a] sm:$0xff]  ;;  %v4068_v50 = vld [vmem:[#allocation2 + $0x82] sm:$0xff] }
  0x27   : > { %v604_v31 = vld [vmem:[#allocation2 + $0x1] sm:$0xff]  ;;  %v4062_v49 = vld [vmem:[#allocation2 + $0x91] sm:$0xff]  ;;  %v4076_v52 = vld [vmem:[#allocation2 + $0x99] sm:$0xff] }
  0x28   : > { %3289 = vmatprep.mubr.msk.f32.mxu1 %vm540_vm2, %v604_v31  ;;  %v605_v32 = vld [vmem:[#allocation2 + $0x9] sm:$0xff]  ;;  %v4060_v48 = vld [vmem:[#allocation2 + $0x81] sm:$0xff]  ;;  %v4072_v51 = vld [vmem:[#allocation2 + $0x92] sm:$0xff] }
  0x29   : > { %3400 = vmatmul.mubr.msk.f32.gmra.mrb[4].mxu0 %vm540_vm2, %v3971_v29  ;;  %3290 = vmatmul.mubr.msk.f32.vlgmr.msra.gmra.mrb[0].mxu1 %vm540_vm2, %v605_v32  ;;  %v4078_v53 = vld [vmem:[#allocation2 + $0xa9] sm:$0xff]  ;;  %v4084_v54 = vld [vmem:[#allocation2 + $0x9a] sm:$0xff]  ;;  %v4092_v56 = vld [vmem:[#allocation2 + $0xb1] sm:$0xff] }
  0x2a   : > { %3402 = vmatprep.mubr.msk.f32.mxu0 %vm540_vm2, %v3973_v30  ;;  %3314 = vmatpush3.msk.msra.mxu1 %vm670_vm0, %v3842_v2  ;;  %v4088_v55 = vld [vmem:[#allocation2 + $0xaa] sm:$0xff]  ;;  %v587_v57 = vld [vmem:[#allocation2] sm:$0xff]  ;;  %v4098_v58 = vld [vmem:[#allocation2 + $0xb2] sm:$0xff] }
  0x2b   : > { %3292 = vmatprep.mubr.msk.f32.mxu1 %vm540_vm2, %v1475_v21  ;;  %3339 = vmatprep.subr.msk.mxu1 %vm670_vm0, %v3986_v34  ;;  %v4102_v59 = vld [vmem:[#allocation2 + $0xc2] sm:$0xff]  ;;  %v4105_v61 = vld [vmem:[#allocation2 + $0x18] sm:$0xff]  ;;  %v4111_v62 = vld [vmem:[#allocation2 + $0xca] sm:$0xff] }
  0x2c   : > { %v588_v60 = vld [vmem:[#allocation2 + $0x8] sm:$0xff]  ;;  %v4121_v1 = vld [vmem:[#allocation2 + $0x20] sm:$0xff]  ;;  %v4123_v2 = vld [vmem:[#allocation2 + $0x30] sm:$0xff] }
  0x2d   : > { %3403 = vmatmul.mubr.msk.f32.gmra.mrb[6].mxu0 %vm540_vm2, %v3981_v33  ;;  %3293 = vmatmul.mubr.msk.f32.gmra.mrb[2].mxu1 %vm540_vm2, %v1476_v22  ;;  %v4134_v3 = vld [vmem:[#allocation2 + $0x38] sm:$0xff]  ;;  %v4139_v5 = vld [vmem:[#allocation2 + $0x48] sm:$0xff]  ;;  %v4152_v6 = vld [vmem:[#allocation2 + $0x50] sm:$0xff] }
  0x2e   : > { %3419 = vmatprep.mubr.msk.f32.mxu0 %vm540_vm2, %v3989_v35  ;;  %3295 = vmatprep.mubr.msk.f32.mxu1 %vm540_vm2, %v3945_v23  ;;  %v4154_v7 = vld [vmem:[#allocation2 + $0x60] sm:$0xff]  ;;  %v4164_v8 = vld [vmem:[#allocation2 + $0x68] sm:$0xff]  ;;  %v4166_v9 = vld [vmem:[#allocation2 + $0x78] sm:$0xff] }
  0x2f   : > { %v4176_v10 = vld [vmem:[#allocation2 + $0x80] sm:$0xff]  ;;  %v4178_v11 = vld [vmem:[#allocation2 + $0x90] sm:$0xff]  ;;  %v4188_v12 = vld [vmem:[#allocation2 + $0x98] sm:$0xff] }
  0x30   : > { %v4190_v13 = vld [vmem:[#allocation2 + $0xa8] sm:$0xff]  ;;  %v4198_v14 = vld [vmem:[#allocation2 + $0xc0] sm:$0xff]  ;;  %v4202_v15 = vld [vmem:[#allocation2 + $0xb0] sm:$0xff] }
  0x31   : > { %3420 = vmatmul.mubr.msk.f32.vlgmr.msra.gmra.mrb[0].mxu0 %vm540_vm2, %v4002_v36  ;;  %3296 = vmatmul.mubr.msk.f32.gmra.mrb[4].mxu1 %vm540_vm2, %v3957_v27  ;;  %v1015_v16 = vld [vmem:[#allocation2 + $0x2] sm:$0xff]  ;;  %v1950_v18 = vld [vmem:[#allocation2 + $0xd8] sm:$0xff]  ;;  %v1016_v19 = vld [vmem:[#allocation2 + $0xa] sm:$0xff] }
  0x32   : > { %3422 = vmatprep.mubr.msk.f32.mxu0 %vm540_vm2, %v4008_v37  ;;  %3444 = vmatpush3.msk.msra.mxu0 %vm670_vm0, %v3070_v24  ;;  %v4208_v17 = vld [vmem:[#allocation2 + $0xc8] sm:$0xff]  ;;  %v1951_v20 = vld [vmem:[#allocation2 + $0xe0] sm:$0xff] }
  0x33   : > { %3469 = vmatprep.subr.msk.mxu0 %vm670_vm0, %v4015_v38  ;;  %3298 = vmatprep.mubr.msk.f32.mxu1 %vm540_vm2, %v3962_v28  ;;  %v2178_v21 = vld [vmem:[#allocation2 + $0xc1] sm:$0xff]  ;;  %v2179_v22 = vld [vmem:[#allocation2 + $0xc9] sm:$0xff] }
  0x34   : > { %v2181_v24 = vld [vmem:[#allocation2 + $0xe1] sm:$0xff] }
  0x35   : > { %3423 = vmatmul.mubr.msk.f32.gmra.mrb[2].mxu0 %vm540_vm2, %v4021_v41  ;;  %3299 = vmatmul.mubr.msk.f32.gmra.mrb[6].mxu1 %vm540_vm2, %v3971_v29  ;;  %v2411_v25 = vld [vmem:[#allocation2 + $0xe2] sm:$0xff] }
  0x36   : > { %3425 = vmatprep.mubr.msk.f32.mxu0 %vm540_vm2, %v4028_v42  ;;  %3301 = vmatprep.mubr.msk.f32.mxu1 %vm540_vm2, %v3973_v30 }
  0x39   : > { %3426 = vmatmul.mubr.msk.f32.gmra.mrb[4].mxu0 %vm540_vm2, %v4038_v43  ;;  %3302 = vmatmul.mubr.msk.f32.gmra.mrb[8].mxu1 %vm540_vm2, %v3981_v33 }
  0x3a   : > { %3428 = vmatprep.mubr.msk.f32.mxu0 %vm540_vm2, %v4042_v44  ;;  %3304 = vmatprep.mubr.msk.f32.mxu1 %vm540_vm2, %v4046_v45 }
  0x3d   : > { %3429 = vmatmul.mubr.msk.f32.gmra.mrb[6].mxu0 %vm540_vm2, %v4052_v46  ;;  %3305 = vmatmul.mubr.msk.f32.gmra.mrb[10].mxu1 %vm540_vm2, %v4060_v48 }
  0x3e   : > { %3431 = vmatprep.mubr.msk.f32.mxu0 %vm540_vm2, %v4056_v47  ;;  %3307 = vmatprep.mubr.msk.f32.mxu1 %vm540_vm2, %v4062_v49 }
  0x41   : > { %3432 = vmatmul.mubr.msk.f32.gmra.mrb[8].mxu0 %vm540_vm2, %v4068_v50  ;;  %3308 = vmatmul.mubr.msk.f32.gmra.mrb[12].mxu1 %vm540_vm2, %v4076_v52 }
  0x42   : > { %3434 = vmatprep.mubr.msk.f32.mxu0 %vm540_vm2, %v4072_v51  ;;  %3310 = vmatprep.mubr.msk.f32.mxu1 %vm540_vm2, %v4078_v53 }
  0x45   : > { %3435 = vmatmul.mubr.msk.f32.gmra.mrb[10].mxu0 %vm540_vm2, %v4084_v54  ;;  %3311 = vmatmul.mubr.msk.f32.gmra.mrb[14].mxu1 %vm540_vm2, %v4092_v56 }
  0x46   : > { %3437 = vmatprep.mubr.msk.f32.mxu0 %vm540_vm2, %v4088_v55  ;;  %3315 = vmatprep.mubr.msk.f32.mxu1 %vm540_vm2, %v587_v57 }
  0x49   : > { %3438 = vmatmul.mubr.msk.f32.gmra.mrb[12].mxu0 %vm540_vm2, %v4098_v58  ;;  %3316 = vmatmul.mubr.msk.f32.vlgmr.msra.gmra.mrb[0].mxu1 %vm540_vm2, %v588_v60 }
  0x4a   : > { %3440 = vmatprep.mubr.msk.f32.mxu0 %vm540_vm2, %v4102_v59  ;;  %3340 = vmatpush3.msk.msra.mxu1 %vm670_vm0, %v3986_v34 }
  0x4b   : > { %3318 = vmatprep.mubr.msk.f32.mxu1 %vm540_vm2, %v4105_v61  ;;  %3365 = vmatprep.subr.msk.mxu1 %vm670_vm0, %v3016_v63 }
  0x4d   : > { %3441 = vmatmul.mubr.msk.f32.gmra.mrb[14].mxu0 %vm540_vm2, %v4111_v62  ;;  %3319 = vmatmul.mubr.msk.f32.gmra.mrb[2].mxu1 %vm540_vm2, %v4121_v1 }
  0x4e   : > { %3445 = vmatprep.mubr.msk.f32.mxu0 %vm540_vm2, %v4123_v2  ;;  %3321 = vmatprep.mubr.msk.f32.mxu1 %vm540_vm2, %v4123_v2 }
  0x51   : > { %3446 = vmatmul.mubr.msk.f32.vlgmr.msra.gmra.mrb[0].mxu0 %vm540_vm2, %v4134_v3  ;;  %3322 = vmatmul.mubr.msk.f32.gmra.mrb[4].mxu1 %vm540_vm2, %v4134_v3 }
  0x52   : > { %3448 = vmatprep.mubr.msk.f32.mxu0 %vm540_vm2, %v4139_v5  ;;  %3470 = vmatpush3.msk.msra.mxu0 %vm670_vm0, %v4015_v38 }
  0x53   : > { %3495 = vmatprep.subr.msk.mxu0 %vm670_vm0, %v3106_v4  ;;  %3324 = vmatprep.mubr.msk.f32.mxu1 %vm540_vm2, %v4139_v5 }
  0x55   : > { %3449 = vmatmul.mubr.msk.f32.gmra.mrb[2].mxu0 %vm540_vm2, %v4152_v6  ;;  %3325 = vmatmul.mubr.msk.f32.gmra.mrb[6].mxu1 %vm540_vm2, %v4152_v6 }
  0x56   : > { %3451 = vmatprep.mubr.msk.f32.mxu0 %vm540_vm2, %v4154_v7  ;;  %3327 = vmatprep.mubr.msk.f32.mxu1 %vm540_vm2, %v4154_v7 }
  0x59   : > { %3452 = vmatmul.mubr.msk.f32.gmra.mrb[4].mxu0 %vm540_vm2, %v4164_v8  ;;  %3328 = vmatmul.mubr.msk.f32.gmra.mrb[8].mxu1 %vm540_vm2, %v4164_v8 }
  0x5a   : > { %3454 = vmatprep.mubr.msk.f32.mxu0 %vm540_vm2, %v4166_v9  ;;  %3330 = vmatprep.mubr.msk.f32.mxu1 %vm540_vm2, %v4166_v9 }
  0x5d   : > { %3455 = vmatmul.mubr.msk.f32.gmra.mrb[6].mxu0 %vm540_vm2, %v4176_v10  ;;  %3331 = vmatmul.mubr.msk.f32.gmra.mrb[10].mxu1 %vm540_vm2, %v4176_v10 }
  0x5e   : > { %3457 = vmatprep.mubr.msk.f32.mxu0 %vm540_vm2, %v4178_v11  ;;  %3333 = vmatprep.mubr.msk.f32.mxu1 %vm540_vm2, %v4178_v11 }
  0x61   : > { %3458 = vmatmul.mubr.msk.f32.gmra.mrb[8].mxu0 %vm540_vm2, %v4188_v12  ;;  %3334 = vmatmul.mubr.msk.f32.gmra.mrb[12].mxu1 %vm540_vm2, %v4188_v12 }
  0x62   : > { %3460 = vmatprep.mubr.msk.f32.mxu0 %vm540_vm2, %v4190_v13  ;;  %3336 = vmatprep.mubr.msk.f32.mxu1 %vm540_vm2, %v4190_v13 }
  0x65   : > { %3461 = vmatmul.mubr.msk.f32.gmra.mrb[10].mxu0 %vm540_vm2, %v4202_v15  ;;  %3337 = vmatmul.mubr.msk.f32.gmra.mrb[14].mxu1 %vm540_vm2, %v4202_v15 }
  0x66   : > { %3463 = vmatprep.mubr.msk.f32.mxu0 %vm540_vm2, %v4198_v14  ;;  %3341 = vmatprep.mubr.msk.f32.mxu1 %vm540_vm2, %v1015_v16 }
  0x69   : > { %3464 = vmatmul.mubr.msk.f32.gmra.mrb[12].mxu0 %vm540_vm2, %v4208_v17  ;;  %3342 = vmatmul.mubr.msk.f32.vlgmr.msra.gmra.mrb[0].mxu1 %vm540_vm2, %v1016_v19 }
  0x6a   : > { %3466 = vmatprep.mubr.msk.f32.mxu0 %vm540_vm2, %v1950_v18  ;;  %3366 = vmatpush3.msk.msra.mxu1 %vm670_vm0, %v3016_v63 }
  0x6b   : > { %3344 = vmatprep.mubr.msk.f32.mxu1 %vm540_vm2, %v3989_v35  ;;  %3521 = vmatprep.subr.msk.mxu1 %vm670_vm0, %v3825_v0 }
  0x6d   : > { %3467 = vmatmul.mubr.msk.f32.gmra.mrb[14].mxu0 %vm540_vm2, %v1951_v20  ;;  %3345 = vmatmul.mubr.msk.f32.gmra.mrb[2].mxu1 %vm540_vm2, %v4002_v36 }
  0x6e   : > { %3471 = vmatprep.mubr.msk.f32.mxu0 %vm540_vm2, %v3945_v23  ;;  %3347 = vmatprep.mubr.msk.f32.mxu1 %vm540_vm2, %v4008_v37  ;;  %v2180_v23 = vld [vmem:[#allocation2 + $0xd9] sm:$0xff] }
  0x71   : > { %3472 = vmatmul.mubr.msk.f32.vlgmr.msra.gmra.mrb[0].mxu0 %vm540_vm2, %v3957_v27  ;;  %3348 = vmatmul.mubr.msk.f32.gmra.mrb[4].mxu1 %vm540_vm2, %v4021_v41 }
  0x72   : > { %3474 = vmatprep.mubr.msk.f32.mxu0 %vm540_vm2, %v3962_v28  ;;  %3496 = vmatpush3.msk.msra.mxu0 %vm670_vm0, %v3106_v4 }
  0x73   : > { %3350 = vmatprep.mubr.msk.f32.mxu1 %vm540_vm2, %v4028_v42 }
  0x75   : > { %3475 = vmatmul.mubr.msk.f32.gmra.mrb[2].mxu0 %vm540_vm2, %v3971_v29  ;;  %3351 = vmatmul.mubr.msk.f32.gmra.mrb[6].mxu1 %vm540_vm2, %v4038_v43 }
  0x76   : > { %3477 = vmatprep.mubr.msk.f32.mxu0 %vm540_vm2, %v3973_v30  ;;  %3353 = vmatprep.mubr.msk.f32.mxu1 %vm540_vm2, %v4042_v44 }
  0x79   : > { %3478 = vmatmul.mubr.msk.f32.gmra.mrb[4].mxu0 %vm540_vm2, %v3981_v33  ;;  %3354 = vmatmul.mubr.msk.f32.gmra.mrb[8].mxu1 %vm540_vm2, %v4052_v46 }
  0x7a   : > { %3480 = vmatprep.mubr.msk.f32.mxu0 %vm540_vm2, %v4046_v45  ;;  %3356 = vmatprep.mubr.msk.f32.mxu1 %vm540_vm2, %v4056_v47 }
  0x7d   : > { %3481 = vmatmul.mubr.msk.f32.gmra.mrb[6].mxu0 %vm540_vm2, %v4060_v48  ;;  %3357 = vmatmul.mubr.msk.f32.gmra.mrb[10].mxu1 %vm540_vm2, %v4068_v50 }
  0x7e   : > { %3483 = vmatprep.mubr.msk.f32.mxu0 %vm540_vm2, %v4062_v49  ;;  %3359 = vmatprep.mubr.msk.f32.mxu1 %vm540_vm2, %v4072_v51 }
  0x81   : > { %3484 = vmatmul.mubr.msk.f32.gmra.mrb[8].mxu0 %vm540_vm2, %v4076_v52  ;;  %3360 = vmatmul.mubr.msk.f32.gmra.mrb[12].mxu1 %vm540_vm2, %v4084_v54 }
  0x82   : > { %3486 = vmatprep.mubr.msk.f32.mxu0 %vm540_vm2, %v4078_v53  ;;  %3362 = vmatprep.mubr.msk.f32.mxu1 %vm540_vm2, %v4088_v55 }
  0x85   : > { %3487 = vmatmul.mubr.msk.f32.gmra.mrb[10].mxu0 %vm540_vm2, %v4092_v56  ;;  %3363 = vmatmul.mubr.msk.f32.gmra.mrb[14].mxu1 %vm540_vm2, %v4098_v58 }
  0x86   : > { %3489 = vmatprep.mubr.msk.f32.mxu0 %vm540_vm2, %v2178_v21  ;;  %3367 = vmatprep.mubr.msk.f32.mxu1 %vm540_vm2, %v4105_v61 }
  0x89   : > { %3490 = vmatmul.mubr.msk.f32.gmra.mrb[12].mxu0 %vm540_vm2, %v2179_v22  ;;  %3368 = vmatmul.mubr.msk.f32.vlgmr.msra.gmra.mrb[0].mxu1 %vm540_vm2, %v4121_v1 }
  0x8a   : > { %3492 = vmatprep.mubr.msk.f32.mxu0 %vm540_vm2, %v2180_v23  ;;  %3522 = vmatpush3.msk.msra.mxu1 %vm670_vm0, %v3825_v0  ;;  %v2410_v0 = vld [vmem:[#allocation2 + $0xda] sm:$0xff] }
  0x8b   : > { %3370 = vmatprep.mubr.msk.f32.mxu1 %vm540_vm2, %v4123_v2 }
  0x8d   : > { %3493 = vmatmul.mubr.msk.f32.gmra.mrb[14].mxu0 %vm540_vm2, %v2181_v24  ;;  %3371 = vmatmul.mubr.msk.f32.gmra.mrb[2].mxu1 %vm540_vm2, %v4134_v3 }
  0x8e   : > { %3497 = vmatprep.mubr.msk.f32.mxu0 %vm540_vm2, %v4008_v37  ;;  %3373 = vmatprep.mubr.msk.f32.mxu1 %vm540_vm2, %v4139_v5 }
  0x91   : > { %3498 = vmatmul.mubr.msk.f32.vlgmr.msra.gmra.mrb[0].mxu0 %vm540_vm2, %v4021_v41  ;;  %3374 = vmatmul.mubr.msk.f32.gmra.mrb[4].mxu1 %vm540_vm2, %v4152_v6 }
  0x92   : > { %3500 = vmatprep.mubr.msk.f32.mxu0 %vm540_vm2, %v4028_v42  ;;  %3376 = vmatprep.mubr.msk.f32.mxu1 %vm540_vm2, %v4154_v7 }
  0x95   : > { %3501 = vmatmul.mubr.msk.f32.gmra.mrb[2].mxu0 %vm540_vm2, %v4038_v43  ;;  %3377 = vmatmul.mubr.msk.f32.gmra.mrb[6].mxu1 %vm540_vm2, %v4164_v8 }
  0x96   : > { %3503 = vmatprep.mubr.msk.f32.mxu0 %vm540_vm2, %v4042_v44  ;;  %3379 = vmatprep.mubr.msk.f32.mxu1 %vm540_vm2, %v4166_v9 }
  0x99   : > { %3504 = vmatmul.mubr.msk.f32.gmra.mrb[4].mxu0 %vm540_vm2, %v4052_v46  ;;  %3380 = vmatmul.mubr.msk.f32.gmra.mrb[8].mxu1 %vm540_vm2, %v4176_v10 }
  0x9a   : > { %3506 = vmatprep.mubr.msk.f32.mxu0 %vm540_vm2, %v4056_v47  ;;  %3382 = vmatprep.mubr.msk.f32.mxu1 %vm540_vm2, %v4178_v11 }
  0x9d   : > { %3507 = vmatmul.mubr.msk.f32.gmra.mrb[6].mxu0 %vm540_vm2, %v4068_v50  ;;  %3383 = vmatmul.mubr.msk.f32.gmra.mrb[10].mxu1 %vm540_vm2, %v4188_v12 }
  0x9e   : > { %3509 = vmatprep.mubr.msk.f32.mxu0 %vm540_vm2, %v4072_v51  ;;  %3385 = vmatprep.mubr.msk.f32.mxu1 %vm540_vm2, %v4190_v13 }
  0xa1   : > { %3510 = vmatmul.mubr.msk.f32.gmra.mrb[8].mxu0 %vm540_vm2, %v4084_v54  ;;  %3386 = vmatmul.mubr.msk.f32.gmra.mrb[12].mxu1 %vm540_vm2, %v4202_v15 }
  0xa2   : > { %3512 = vmatprep.mubr.msk.f32.mxu0 %vm540_vm2, %v4088_v55  ;;  %3388 = vmatprep.mubr.msk.f32.mxu1 %vm540_vm2, %v4198_v14 }
  0xa5   : > { %3513 = vmatmul.mubr.msk.f32.gmra.mrb[10].mxu0 %vm540_vm2, %v4098_v58  ;;  %3389 = vmatmul.mubr.msk.f32.gmra.mrb[14].mxu1 %vm540_vm2, %v4208_v17 }
  0xa6   : > { %3515 = vmatprep.mubr.msk.f32.mxu0 %vm540_vm2, %v4102_v59  ;;  %3405 = vmatprep.mubr.msk.f32.mxu1 %vm540_vm2, %v4046_v45 }
  0xa9   : > { %3516 = vmatmul.mubr.msk.f32.gmra.mrb[12].mxu0 %vm540_vm2, %v4111_v62  ;;  %3406 = vmatmul.mubr.msk.f32.vlgmr.msra.gmra.mrb[8].mxu1 %vm540_vm2, %v4060_v48 }
  0xaa   : > { %3518 = vmatprep.mubr.msk.f32.mxu0 %vm540_vm2, %v2410_v0  ;;  %3408 = vmatprep.mubr.msk.f32.mxu1 %vm540_vm2, %v4062_v49 }
  0xad   : > { %3519 = vmatmul.mubr.msk.f32.gmra.mrb[14].mxu0 %vm540_vm2, %v2411_v25  ;;  %3409 = vmatmul.mubr.msk.f32.gmra.mrb[10].mxu1 %vm540_vm2, %v4076_v52 }
  0xae   : > { %3411 = vmatprep.mubr.msk.f32.mxu1 %vm540_vm2, %v4078_v53 }
  0xb1   : > { %3412 = vmatmul.mubr.msk.f32.gmra.mrb[12].mxu1 %vm540_vm2, %v4092_v56 }
  0xb2   : > { %3414 = vmatprep.mubr.msk.f32.mxu1 %vm540_vm2, %v2178_v21 }
  0xb5   : > { %3415 = vmatmul.mubr.msk.f32.gmra.mrb[14].mxu1 %vm540_vm2, %v2179_v22 }
 0x15c   : > { %v3369_v26 = vpop.f32.mrb[0].mxu1 }
 0x15d   : > { %v1380_v27 = vpop.f32.mrb[1].mxu1 }
 0x160   : > { %v3372_v28 = vpop.f32.mrb[2].mxu1 }
 0x161   : > { %v1390_v29 = vpop.f32.mrb[3].mxu1 }
 0x164   : > { %v3499_v30 = vpop.f32.mrb[0].mxu0  ;;  %v3375_v33 = vpop.f32.mrb[4].mxu1 }
 0x165   : > { %v3523_v31 = vadd.f32 %v3499_v30, %v3369_v26  ;;  %v2531_v32 = vpop.f32.mrb[1].mxu0  ;;  %v1400_v35 = vpop.f32.mrb[5].mxu1 }
 0x166   : > { %v3524_v34 = vadd.f32 %v2531_v32, %v1380_v27 }
 0x167   : > { %2627 = vst [vmem:[%s4361_s10 + $0x8] sm:$0xff] %v3523_v31  ;;  %v2665_v36 = vmul.f32 %v3523_v31, %v3523_v31 }
 0x168   : > { %2626 = vst [vmem:[%s4361_s10] sm:$0xff] %v3524_v34  ;;  %v2642_v37 = vadd.f32 %v3524_v34, %v3523_v31  ;;  %v2664_v38 = vmul.f32 %v3524_v34, %v3524_v34  ;;  %v3502_v39 = vpop.f32.mrb[2].mxu0  ;;  %v3378_v42 = vpop.f32.mrb[6].mxu1 }
 0x169   : > { %v3525_v40 = vadd.f32 %v3502_v39, %v3372_v28  ;;  %v2541_v41 = vpop.f32.mrb[3].mxu0  ;;  %v1410_v45 = vpop.f32.mrb[7].mxu1 }
 0x16a   : > { %v2680_v43 = vadd.f32 %v2665_v36, %v2664_v38  ;;  %v3526_v44 = vadd.f32 %v2541_v41, %v1390_v29 }
 0x16b   : > { %2629 = vst [vmem:[%s4361_s10 + $0x18] sm:$0xff] %v3525_v40  ;;  %v2667_v51 = vmul.f32 %v3525_v40, %v3525_v40 }
 0x16c   : > { %2628 = vst [vmem:[%s4361_s10 + $0x10] sm:$0xff] %v3526_v44  ;;  %v2643_v46 = vadd.f32 %v3526_v44, %v2642_v37  ;;  %v2666_v47 = vmul.f32 %v3526_v44, %v3526_v44  ;;  %v3505_v48 = vpop.f32.mrb[4].mxu0 }
 0x16d   : > { %v3527_v49 = vadd.f32 %v3505_v48, %v3375_v33  ;;  %v2551_v50 = vpop.f32.mrb[5].mxu0 }
 0x16e   : > { %v2681_v52 = vadd.f32 %v2680_v43, %v2666_v47  ;;  %v3528_v53 = vadd.f32 %v2551_v50, %v1400_v35  ;;  %v2644_v54 = vadd.f32 %v3525_v40, %v2643_v46 }
 0x16f   : > { %2631 = vst [vmem:[%s4361_s10 + $0x28] sm:$0xff] %v3527_v49  ;;  %v2669_v61 = vmul.f32 %v3527_v49, %v3527_v49 }
 0x170   : > { %2630 = vst [vmem:[%s4361_s10 + $0x20] sm:$0xff] %v3528_v53  ;;  %v2645_v55 = vadd.f32 %v3528_v53, %v2644_v54  ;;  %v2668_v56 = vmul.f32 %v3528_v53, %v3528_v53  ;;  %v2682_v57 = vadd.f32 %v2681_v52, %v2667_v51  ;;  %v3508_v58 = vpop.f32.mrb[6].mxu0 }
 0x171   : > { %v3529_v59 = vadd.f32 %v3508_v58, %v3378_v42  ;;  %v2561_v60 = vpop.f32.mrb[7].mxu0 }
 0x172   : > { %v2683_v62 = vadd.f32 %v2682_v57, %v2668_v56  ;;  %v3530_v63 = vadd.f32 %v2561_v60, %v1410_v45  ;;  %v2646_v1 = vadd.f32 %v3527_v49, %v2645_v55 }
 0x173   : > { %2633 = vst [vmem:[%s4361_s10 + $0x38] sm:$0xff] %v3529_v59  ;;  %v2671_v7 = vmul.f32 %v3529_v59, %v3529_v59 }
 0x174   : > { %2632 = vst [vmem:[%s4361_s10 + $0x30] sm:$0xff] %v3530_v63  ;;  %v2647_v2 = vadd.f32 %v3530_v63, %v2646_v1  ;;  %v2670_v3 = vmul.f32 %v3530_v63, %v3530_v63  ;;  %v2684_v4 = vadd.f32 %v2683_v62, %v2669_v61  ;;  %v3511_v5 = vpop.f32.mrb[8].mxu0 }
 0x175   : > { %v2571_v6 = vpop.f32.mrb[9].mxu0 }
 0x176   : > { %v2685_v8 = vadd.f32 %v2684_v4, %v2670_v3  ;;  %v2648_v9 = vadd.f32 %v3529_v59, %v2647_v2 }
 0x178   : > { %v3514_v10 = vpop.f32.mrb[10].mxu0  ;;  %v2686_v11 = vadd.f32 %v2685_v8, %v2671_v7 }
 0x179   : > { %v2581_v12 = vpop.f32.mrb[11].mxu0 }
 0x17c   : > { %v3517_v13 = vpop.f32.mrb[12].mxu0  ;;  %v3407_v15 = vpop.f32.mrb[8].mxu1 }
 0x17d   : > { %v2591_v14 = vpop.f32.mrb[13].mxu0  ;;  %v3531_v16 = vadd.f32 %v3511_v5, %v3407_v15  ;;  %v1650_v17 = vpop.f32.mrb[9].mxu1 }
 0x17e   : > { %v3532_v18 = vadd.f32 %v2571_v6, %v1650_v17 }
 0x17f   : > { %2635 = vst [vmem:[%s4361_s10 + $0x48] sm:$0xff] %v3531_v16  ;;  %v2673_v25 = vmul.f32 %v3531_v16, %v3531_v16 }
 0x180   : > { %v3520_v19 = vpop.f32.mrb[14].mxu0  ;;  %2634 = vst [vmem:[%s4361_s10 + $0x40] sm:$0xff] %v3532_v18  ;;  %v2649_v21 = vadd.f32 %v3532_v18, %v2648_v9  ;;  %v2672_v22 = vmul.f32 %v3532_v18, %v3532_v18  ;;  %v3410_v23 = vpop.f32.mrb[10].mxu1 }
 0x181   : > { %v2601_v20 = vpop.f32.mrb[15].mxu0  ;;  %v3533_v24 = vadd.f32 %v3514_v10, %v3410_v23  ;;  %v1660_v0 = vpop.f32.mrb[11].mxu1 }
 0x182   : > { %v2687_v26 = vadd.f32 %v2686_v11, %v2672_v22  ;;  %v3534_v27 = vadd.f32 %v2581_v12, %v1660_v0  ;;  %v2650_v28 = vadd.f32 %v3531_v16, %v2649_v21 }
 0x183   : > { %2637 = vst [vmem:[%s4361_s10 + $0x58] sm:$0xff] %v3533_v24  ;;  %v2675_v35 = vmul.f32 %v3533_v24, %v3533_v24 }
 0x184   : > { %2636 = vst [vmem:[%s4361_s10 + $0x50] sm:$0xff] %v3534_v27  ;;  %v2651_v29 = vadd.f32 %v3534_v27, %v2650_v28  ;;  %v2674_v30 = vmul.f32 %v3534_v27, %v3534_v27  ;;  %v2688_v31 = vadd.f32 %v2687_v26, %v2673_v25  ;;  %v3413_v32 = vpop.f32.mrb[12].mxu1 }
 0x185   : > { %v3535_v33 = vadd.f32 %v3517_v13, %v3413_v32  ;;  %v1670_v34 = vpop.f32.mrb[13].mxu1 }
 0x186   : > { %v2689_v36 = vadd.f32 %v2688_v31, %v2674_v30  ;;  %v3536_v37 = vadd.f32 %v2591_v14, %v1670_v34  ;;  %v2652_v38 = vadd.f32 %v3533_v24, %v2651_v29 }
 0x187   : > { %2639 = vst [vmem:[%s4361_s10 + $0x68] sm:$0xff] %v3535_v33  ;;  %v2677_v45 = vmul.f32 %v3535_v33, %v3535_v33 }
 0x188   : > { %2638 = vst [vmem:[%s4361_s10 + $0x60] sm:$0xff] %v3536_v37  ;;  %v2653_v39 = vadd.f32 %v3536_v37, %v2652_v38  ;;  %v2676_v40 = vmul.f32 %v3536_v37, %v3536_v37  ;;  %v2690_v41 = vadd.f32 %v2689_v36, %v2675_v35  ;;  %v3416_v42 = vpop.f32.mrb[14].mxu1 }
 0x189   : > { %v3537_v43 = vadd.f32 %v3520_v19, %v3416_v42  ;;  %v1680_v44 = vpop.f32.mrb[15].mxu1 }
 0x18a   : > { %v2691_v46 = vadd.f32 %v2690_v41, %v2676_v40  ;;  %v3538_v47 = vadd.f32 %v2601_v20, %v1680_v44  ;;  %v2654_v48 = vadd.f32 %v3535_v33, %v2653_v39 }
 0x18b   : > { %2641 = vst [vmem:[%s4361_s10 + $0x78] sm:$0xff] %v3537_v43  ;;  %v2679_v52 = vmul.f32 %v3537_v43, %v3537_v43 }
 0x18c   : > { %2640 = vst [vmem:[%s4361_s10 + $0x70] sm:$0xff] %v3538_v47  ;;  %v2655_v49 = vadd.f32 %v3538_v47, %v2654_v48  ;;  %v2678_v50 = vmul.f32 %v3538_v47, %v3538_v47  ;;  %v2692_v51 = vadd.f32 %v2691_v46, %v2677_v45 }
 0x18e   : > { %v2656_v53 = vadd.f32 %v3537_v43, %v2655_v49  ;;  %v2693_v54 = vadd.f32 %v2692_v51, %v2678_v50 }
 0x190   : > { %v2657_v55 = vrot.slane %v2656_v53, 4  ;;  %v2694_v56 = vadd.f32 %v2693_v54, %v2679_v52 }
 0x192   : > { %v2658_v57 = vadd.f32 %v2657_v55, %v2656_v53  ;;  %v2695_v58 = vrot.slane %v2694_v56, 4 }
 0x194   : > { %v2659_v59 = vrot.slane %v2658_v57, 2  ;;  %v2696_v60 = vadd.f32 %v2695_v58, %v2694_v56 }
 0x196   : > { %v2660_v61 = vadd.f32 %v2659_v59, %v2658_v57  ;;  %v2697_v62 = vrot.slane %v2696_v60, 2 }
 0x198   : > { %v2661_v63 = vrot.slane %v2660_v61, 1  ;;  %v2698_v1 = vadd.f32 %v2697_v62, %v2696_v60 }
 0x19a   : > { %v2662_v2 = vadd.f32 %v2661_v63, %v2660_v61  ;;  %v2699_v3 = vrot.slane %v2698_v1, 1 }
 0x19c   : > { %2663 = vst [vmem:[%s503_s13] sm:$0x1] %v2662_v2  ;;  %v2700_v4 = vadd.f32 %v2699_v3, %v2698_v1 }
 0x19e   : > { %2701 = vst [vmem:[%s510_s15] sm:$0x1] %v2700_v4 }
 0x19f PF: > { %s19_s4 = sadd.s32 1, %s3742_s4   ;;  %s4414_s27 = smov %s3734_s29 }
 0x1a0   : > { %p16_p12 = scmp.ge.s32.totalorder %s19_s4, 6   ;;  %s4415_s28 = smov %s3738_s30 }
 0x1a1   : > { %s4416_s29 = smov %s4419_s5  ;;  %s4417_s30 = smov %s4423_s9 }
 0x1a2   :  { %18 = sbr.rel (!%p16_p12) target bundleno = 3 (0x3), region = 115 }

// kernel: double_conv.3
= control target key start
LH: loop header
LB: loop body
LE: loop exit
PB: predicated region body
PF: predicated region fallthrough
CT: control target
= control target key end

     0   :  { %s4205_s27 = smov 0   ;;  %s4207_s28 = smov 0   ;;  %s5173_s0 = inlined_call_operand.vmem [shape: f32[2,16,16,128], index: 0, kind: input, shape index: {}, may-alias: {0,1,2}]   ;;  %s5174_s1 = inlined_call_operand.vmem [shape: f32[2,16,16,128], index: 1, kind: input, shape index: {}, may-alias: {0,1,2}]   ;;  %s5175_s2 = inlined_call_operand.vmem [shape: f32[2,16,16,128], index: 2, kind: input, shape index: {}, may-alias: {0,1,2}]   ;;  %s5176_s3 = inlined_call_operand.vmem [shape: f32[9,128,128], index: 3, kind: input, shape index: {}]   ;;  %s5177_s4 = inlined_call_operand.vmem [shape: f32[1,128], index: 4, kind: input, shape index: {}]   ;;  %s5178_s5 = inlined_call_operand.vmem [shape: f32[1,128], index: 5, kind: input, shape index: {}]   ;;  %s5179_s6 = inlined_call_operand.vmem [shape: f32[2,16,16,128], index: 6, kind: output, shape index: {0}]   ;;  %s5180_s7 = inlined_call_operand.vmem [shape: f32[2,2,1,128], index: 7, kind: output, shape index: {1}]   ;;  %s5181_s8 = inlined_call_operand.vmem [shape: f32[2,2,1,128], index: 8, kind: output, shape index: {2}]  }
   0x1   :  { %5183 = sst [smem:[#allocation3_spill]] %s5173_s0  ;;  %s4209_s29 = smov 0  }
   0x2   :  { %s4211_s30 = smov 0   ;;  %s4213_s9 = smov 0  }
   0x3 LB: > { %s28_s10 = sadd.s32 1, %s4149_s29  ;;  %s31_s11 = sadd.s32 1, %s4153_s30  ;;  %s4157_s9 = sphi %s4213_s9, %s19_s9   ;;  %s4153_s30 = sphi %s4211_s30, %s5194_s30   ;;  %s4149_s29 = sphi %s4209_s29, %s5193_s29   ;;  %s4145_s28 = sphi %s4207_s28, %s5192_s28   ;;  %s4141_s27 = sphi %s4205_s27, %s5191_s27  }
   0x4   : > { %p29_p0 = scmp.ge.s32.totalorder %s28_s10, 2  ;;  %p2682_p1 = scmp.ge.s32.totalorder %s4157_s9, 1 }
   0x5   : > { %p357_p2 = scmp.lt.s32.totalorder %s4157_s9, 5 }
   0x6   : > { %s5196_s10 = smov (%p29_p0, %s28_s10), 0  ;;  %s5198_s11 = smov (!%p29_p0, %s31_s11), %s4153_s30 }
   0x7   : > { %p358_p3 = pnand %p2682_p1, %p357_p2  ;;  %p33_p4 = scmp.ge.s32.totalorder %s5198_s11, 2 }
   0x8   : > { %v2712_v0 = vld [vmem:[%s5176_s3 + $0x80] sm:$0xff] (!%p358_p3)  ;;  %v2713_v1 = vld [vmem:[%s5176_s3 + $0x88] sm:$0xff] (!%p358_p3)  ;;  %s4249_s18 = sshll.u32 (!%p358_p3), %s4141_s27, 3  ;;  %p442_p5 = scmp.lt.s32.totalorder (!%p358_p3), %s4145_s28, 1  ;;  %v2714_v5 = vld [vmem:[%s5176_s3 + $0x90] sm:$0xff] (!%p358_p3)  ;;  %v4159_v7 = vmov (!%p358_p3), 0.0  }
   0x9   : > { %s5200_s11 = smov (%p33_p4, %s5198_s11), 0  ;;  %361 = sbr.rel (%p358_p3) target bundleno = 436 (0x1b4), region = 44 }
   0xa   : > { %v2760_v2 = vld [vmem:[%s5176_s3 + $0x200] sm:$0xff] (!%p358_p3)  ;;  %v3642_v3 = vpack.c.bf16 (!%p358_p3), %v2713_v1, %v2712_v0  ;;  %v2761_v4 = vld [vmem:[%s5176_s3 + $0x208] sm:$0xff] (!%p358_p3)  ;;  %v2715_v6 = vld [vmem:[%s5176_s3 + $0x98] sm:$0xff] (!%p358_p3)  ;;  %p444_p6 = scmp.lt.s32.totalorder (!%p358_p3), %s4249_s18, 15  ;;  %s4263_s25 = sadd.s32 (!%p358_p3), 4294967295, %s4249_s18 }
   0xb   : > { %513 = vst [vmem:[#allocation2] sm:$0x1] (!%p358_p3), %v4159_v7  ;;  %514 = vst [vmem:[#allocation2 + $0x18] sm:$0x1] (!%p358_p3), %v4159_v7  ;;  %v3770_v8 = vpack.c.bf16 (!%p358_p3), %v2761_v4, %v2760_v2  ;;  %v3646_v9 = vpack.c.bf16 (!%p358_p3), %v2715_v6, %v2714_v5  ;;  %v2762_v10 = vld [vmem:[%s5176_s3 + $0x210] sm:$0xff] (!%p358_p3)  ;;  %v2763_v11 = vld [vmem:[%s5176_s3 + $0x218] sm:$0xff] (!%p358_p3) }
   0xc   : > { %515 = vst [vmem:[#allocation2 + $0x30] sm:$0x1] (!%p358_p3), %v4159_v7  ;;  %516 = vst [vmem:[#allocation2 + $0x48] sm:$0x1] (!%p358_p3), %v4159_v7  ;;  %v2716_v12 = vld [vmem:[%s5176_s3 + $0xa0] sm:$0xff] (!%p358_p3)  ;;  %3643 = vmatprep.subr.bf16.mxu1 (!%p358_p3), %v3642_v3  ;;  %v3774_v13 = vpack.c.bf16 (!%p358_p3), %v2763_v11, %v2762_v10  ;;  %v2717_v14 = vld [vmem:[%s5176_s3 + $0xa8] sm:$0xff] (!%p358_p3) }
   0xd   : > { %517 = vst [vmem:[#allocation2 + $0x60] sm:$0x1] (!%p358_p3), %v4159_v7  ;;  %518 = vst [vmem:[#allocation2 + $0x78] sm:$0x1] (!%p358_p3), %v4159_v7  ;;  %v2764_v15 = vld [vmem:[%s5176_s3 + $0x220] sm:$0xff] (!%p358_p3)  ;;  %v2765_v16 = vld [vmem:[%s5176_s3 + $0x228] sm:$0xff] (!%p358_p3)  ;;  %3771 = vmatprep.subr.bf16.mxu0 (!%p358_p3), %v3770_v8  ;;  %3645 = vmatpush3.bf16.msra.mxu1 (!%p358_p3), %v3642_v3  ;;  %v3650_v17 = vpack.c.bf16 (!%p358_p3), %v2717_v14, %v2716_v12 }
   0xe   : > { %519 = vst [vmem:[#allocation2 + $0x90] sm:$0x1] (!%p358_p3), %v4159_v7  ;;  %520 = vst [vmem:[#allocation2 + $0xa8] sm:$0x1] (!%p358_p3), %v4159_v7  ;;  %3773 = vmatpush3.bf16.msra.mxu0 (!%p358_p3), %v3770_v8  ;;  %3647 = vmatprep.subr.bf16.mxu1 (!%p358_p3), %v3646_v9  ;;  %p454_p7 = scmp.gt.s32.totalorder (!%p358_p3), %s4263_s25, 0  ;;  %v3778_v18 = vpack.c.bf16 (!%p358_p3), %v2765_v16, %v2764_v15  ;;  %v2718_v19 = vld [vmem:[%s5176_s3 + $0xb0] sm:$0xff] (!%p358_p3) }
   0xf   : > { %521 = vst [vmem:[#allocation2 + $0xc0] sm:$0x1] (!%p358_p3), %v4159_v7  ;;  %522 = vst [vmem:[#allocation2 + $0xd8] sm:$0x1] (!%p358_p3), %v4159_v7  ;;  %3775 = vmatprep.subr.bf16.mxu0 (!%p358_p3), %v3774_v13  ;;  %v2719_v20 = vld [vmem:[%s5176_s3 + $0xb8] sm:$0xff] (!%p358_p3)  ;;  %v2766_v21 = vld [vmem:[%s5176_s3 + $0x230] sm:$0xff] (!%p358_p3) }
  0x10   : > { %523 = vst [vmem:[#allocation2 + $0x11] sm:$0x1] %v4159_v7  ;;  %524 = vst [vmem:[#allocation2 + $0x29] sm:$0x1] %v4159_v7  ;;  %s5202_s28 = smov (!%p442_p5, %s4145_s28), 1  ;;  %v2767_v22 = vld [vmem:[%s5176_s3 + $0x238] sm:$0xff]  ;;  %v3654_v23 = vpack.c.bf16 %v2719_v20, %v2718_v19 }
  0x11   : > { %525 = vst [vmem:[#allocation2 + $0x41] sm:$0x1] %v4159_v7  ;;  %526 = vst [vmem:[#allocation2 + $0x59] sm:$0x1] %v4159_v7  ;;  %s445_s24 = scalar_select %p444_p6, %s4249_s18, 15  ;;  %3649 = vmatpush3.bf16.msra.mxu1 %v3646_v9  ;;  %v2720_v24 = vld [vmem:[%s5176_s3 + $0xc0] sm:$0xff]  ;;  %v3782_v25 = vpack.c.bf16 %v2767_v22, %v2766_v21 }
  0x12   : > { %527 = vst [vmem:[#allocation2 + $0x71] sm:$0x1] %v4159_v7  ;;  %528 = vst [vmem:[#allocation2 + $0x89] sm:$0x1] %v4159_v7  ;;  %s4292_s26 = sshll.u32 %s5202_s28, 5  ;;  %p2689_p8 = scmp.lt.s32.totalorder %s4263_s25, 15  ;;  %3777 = vmatpush3.bf16.msra.mxu0 %v3774_v13  ;;  %3651 = vmatprep.subr.bf16.mxu1 %v3650_v17 }
  0x13   : > { %529 = vst [vmem:[#allocation2 + $0xa1] sm:$0x1] %v4159_v7  ;;  %530 = vst [vmem:[#allocation2 + $0xb9] sm:$0x1] %v4159_v7  ;;  %s2684_s12 = sshll.u32 %s445_s24, 1  ;;  %s5184_s0 = sld [smem:[#allocation3_spill]]  ;;  %3779 = vmatprep.subr.bf16.mxu0 %v3778_v18 }
  0x14   : > { %531 = vst [vmem:[#allocation2 + $0xd1] sm:$0x1] %v4159_v7  ;;  %532 = vst [vmem:[#allocation2 + $0xe9] sm:$0x1] %v4159_v7  ;;  %s4302_s17 = sadd.s32 %s4292_s26, %s2684_s12  ;;  %p553_p9 = scmp.gt.s32.totalorder %s4141_s27, 0  ;;  %v2721_v26 = vld [vmem:[%s5176_s3 + $0xc8] sm:$0xff] }
  0x15   : > { %s5182_s23 = sshll.u32 %s4302_s17, 3  ;;  %v2768_v27 = vld [vmem:[%s5176_s3 + $0x240] sm:$0xff]  ;;  %v2769_v29 = vld [vmem:[%s5176_s3 + $0x248] sm:$0xff]  ;;  %3653 = vmatpush3.bf16.msra.mxu1 %v3650_v17  ;;  %v2722_v32 = vld [vmem:[%s5176_s3 + $0xd0] sm:$0xff]  ;;  %v3658_v36 = vpack.c.bf16 %v2721_v26, %v2720_v24  ;;  %p499_p11 = scmp.lt.s32.totalorder %s4141_s27, 1 }
  0x16   : > { %s455_s16 = scalar_select %p454_p7, %s4263_s25, 0  ;;  %v4335_v28 = vld [vmem:[%s5177_s4] ss:$0 sm:$0xff]  ;;  %v2723_v33 = vld [vmem:[%s5176_s3 + $0xd8] sm:$0xff]  ;;  %3781 = vmatpush3.bf16.msra.mxu0 %v3778_v18  ;;  %3655 = vmatprep.subr.bf16.mxu1 %v3654_v23  ;;  %v2770_v37 = vld [vmem:[%s5176_s3 + $0x250] sm:$0xff]  ;;  %v3786_v41 = vpack.c.bf16 %v2769_v29, %v2768_v27 }
  0x17   : > { %v4345_v30 = vld [vmem:[%s5178_s5] ss:$0 sm:$0xff]  ;;  %s4356_s25 = scalar_select %p553_p9, 1, 0  ;;  %v2771_v38 = vld [vmem:[%s5176_s3 + $0x258] sm:$0xff]  ;;  %3783 = vmatprep.subr.bf16.mxu0 %v3782_v25  ;;  %v4372_v45 = vpack.c.bf16 %v2723_v33, %v2722_v32  ;;  %v2725_v55 = vld [vmem:[%s5176_s3 + $0xe8] sm:$0xff] }
  0x18   : > { %s5204_s16 = smov (!%p2689_p8, %s455_s16), 15  ;;  %v4377_v49 = vpack.c.bf16 %v2771_v38, %v2770_v37  ;;  %v2724_v50 = vld [vmem:[%s5176_s3 + $0xe0] sm:$0xff]  ;;  %v2773_v4 = vld [vmem:[%s5176_s3 + $0x268] sm:$0xff]  ;;  %v2726_v20 = vld [vmem:[%s5176_s3 + $0xf0] sm:$0xff]  ;;  %s5190_s13 = sshll.u32 %s4302_s17, 3 }
  0x19   : > { %s4317_s12 = scalar_lea.vmem %s5184_s0, %s5182_s23  ;;  %s2694_s14 = sshll.u32 %s5204_s16, 1  ;;  %3657 = vmatpush3.bf16.msra.mxu1 %v3654_v23  ;;  %v555_v57 = vstv %s4356_s25  ;;  %v2772_v3 = vld [vmem:[%s5176_s3 + $0x260] sm:$0xff]  ;;  %v3666_v9 = vpack.c.bf16 %v2725_v55, %v2724_v50  ;;  %v2727_v21 = vld [vmem:[%s5176_s3 + $0xf8] sm:$0xff]  ;;  %v2774_v26 = vld [vmem:[%s5176_s3 + $0x270] sm:$0xff] }
  0x1a   : > { %v578_v31 = vld [vmem:[%s4317_s12] sm:$0xff]  ;;  %v579_v35 = vld [vmem:[%s4317_s12 + $0x8] sm:$0xff]  ;;  %v580_v40 = vld [vmem:[%s4317_s12 + $0x10] sm:$0xff]  ;;  %s462_s15 = sadd.s32 %s2694_s14, %s4292_s26  ;;  %3785 = vmatpush3.bf16.msra.mxu0 %v3782_v25  ;;  %3659 = vmatprep.subr.bf16.mxu1 %v3658_v36  ;;  %vm4427_vm0 = vcmp.eq.s32.totalorder %v555_v57, 1  ;;  %v3794_v19 = vpack.c.bf16 %v2773_v4, %v2772_v3  ;;  %s5210_s27 = smov (!%p499_p11, %s4141_s27), 1 }
  0x1b   : > { %v594_v34 = vmul.f32 %v4335_v28, %v578_v31  ;;  %v595_v39 = vmul.f32 %v4335_v28, %v579_v35  ;;  %v596_v43 = vmul.f32 %v4335_v28, %v580_v40  ;;  %v581_v44 = vld [vmem:[%s4317_s12 + $0x18] sm:$0xff]  ;;  %s2696_s19 = sshll.u32 %s462_s15, 3  ;;  %v582_v48 = vld [vmem:[%s4317_s12 + $0x20] sm:$0xff]  ;;  %v583_v54 = vld [vmem:[%s4317_s12 + $0x28] sm:$0xff]  ;;  %3787 = vmatprep.subr.bf16.mxu0 %v3786_v41  ;;  %s2849_s15 = sadd.s32 8, %s4249_s18 }
  0x1c   : > { %v597_v47 = vmul.f32 %v4335_v28, %v581_v44  ;;  %s464_s0 = scalar_lea.vmem %s5174_s1, %s2696_s19  ;;  %v598_v53 = vmul.f32 %v4335_v28, %v582_v48  ;;  %v599_v61 = vmul.f32 %v4335_v28, %v583_v54  ;;  %v584_v2 = vld [vmem:[%s4317_s12 + $0x30] sm:$0xff]  ;;  %v585_v8 = vld [vmem:[%s4317_s12 + $0x38] sm:$0xff]  ;;  %v586_v13 = vld [vmem:[%s4317_s12 + $0x40] sm:$0xff]  ;;  %p4558_p10 = scmp.lt.s32.totalorder %s2849_s15, 15 }
  0x1d   : > { %v610_v42 = vadd.f32 %v4345_v30, %v594_v34  ;;  %v611_v46 = vadd.f32 %v4345_v30, %v595_v39  ;;  %v612_v52 = vadd.f32 %v4345_v30, %v596_v43  ;;  %v533_v56 = vld [vmem:[%s464_s0] sm:$0xff]  ;;  %v534_v58 = vld [vmem:[%s464_s0 + $0x8] sm:$0xff]  ;;  %v600_v7 = vmul.f32 %v4335_v28, %v584_v2  ;;  %3661 = vmatpush3.bf16.msra.mxu1 %v3658_v36  ;;  %v588_v25 = vld [vmem:[%s4317_s12 + $0x50] sm:$0xff]  ;;  %s4653_s14 = scalar_select %p499_p11, 1, 0 }
  0x1e   : > { %v613_v60 = vadd.f32 %v4345_v30, %v597_v47  ;;  %v541_v62 = vmul.f32 %v4335_v28, %v533_v56  ;;  %v542_v63 = vmul.f32 %v4335_v28, %v534_v58  ;;  %v614_v1 = vadd.f32 %v4345_v30, %v598_v53  ;;  %3789 = vmatpush3.bf16.msra.mxu0 %v3786_v41  ;;  %v587_v18 = vld [vmem:[%s4317_s12 + $0x48] sm:$0xff]  ;;  %v2775_v27 = vld [vmem:[%s5176_s3 + $0x278] sm:$0xff]  ;;  %v590_v38 = vld [vmem:[%s4317_s12 + $0x60] sm:$0xff]  ;;  %s5206_s15 = smov (!%p4558_p10, %s2849_s15), 15  ;;  %s5114_s19 = scalar_lea.vmem %s5179_s6, %s5190_s13 }
  0x1f   : > { %v4385_v51 = vmax.f32 %v610_v42, 0.0  ;;  %v4394_v59 = vmax.f32 %v611_v46, 0.0  ;;  %v4402_v0 = vmax.f32 %v612_v52, 0.0  ;;  %v615_v6 = vadd.f32 %v4345_v30, %v599_v61  ;;  %3663 = vmatprep.subr.bf16.mxu1 %v4372_v45  ;;  %3791 = vmatprep.subr.bf16.mxu0 %v4377_v49  ;;  %v589_v33 = vld [vmem:[%s4317_s12 + $0x58] sm:$0xff]  ;;  %v591_v43 = vld [vmem:[%s4317_s12 + $0x68] sm:$0xff]  ;;  %v592_v50 = vld [vmem:[%s4317_s12 + $0x70] sm:$0xff] }
  0x20   : > { %v4413_v5 = vmax.f32 %v613_v60, 0.0  ;;  %v549_v10 = vadd.f32 %v4345_v30, %v541_v62  ;;  %v4420_v11 = vadd.f32 %v4345_v30, %v542_v63  ;;  %v4423_v12 = vmax.f32 %v614_v1, 0.0  ;;  %v676_v46 = vld [vmem:[%s5176_s3 + $0x8] sm:$0xff]  ;;  %v2776_v52 = vld [vmem:[%s5176_s3 + $0x280] sm:$0xff]  ;;  %v593_v57 = vld [vmem:[%s4317_s12 + $0x78] sm:$0xff]  ;;  %s5208_s15 = smov (!%p4558_p10, %s5206_s15), 15 }
  0x21   : > { %643 = vst [vmem:[#allocation2 + $0x19] sm:$0xff] %v4385_v51  ;;  %3394 = vmatprep.mubr.f32.mxu0 %v4385_v51  ;;  %644 = vst [vmem:[#allocation2 + $0x21] sm:$0xff] %v4394_v59  ;;  %v4432_v15 = vmax.f32 %v615_v6, 0.0  ;;  %v616_v16 = vadd.f32 %v4345_v30, %v600_v7  ;;  %v601_v17 = vmul.f32 %v4335_v28, %v585_v8  ;;  %3665 = vmatpush3.bf16.msra.mxu1 %v4372_v45  ;;  %v675_v45 = vld [vmem:[%s5176_s3] sm:$0xff]  ;;  %v2777_v53 = vld [vmem:[%s5176_s3 + $0x288] sm:$0xff]  ;;  %s2701_s0 = sshll.u32 %s5208_s15, 1 }
  0x22   : > { %645 = vst [vmem:[#allocation2 + $0x31] sm:$0xff] %v4402_v0  ;;  %646 = vst [vmem:[#allocation2 + $0x39] sm:$0xff] %v4413_v5  ;;  %v551_v22 = vmax.f32 %v549_v10, 0.0  ;;  %v552_v23 = vmax.f32 %v4420_v11, 0.0  ;;  %v602_v24 = vmul.f32 %v4335_v28, %v586_v13  ;;  %v603_v32 = vmul.f32 %v4335_v28, %v587_v18  ;;  %3793 = vmatpush3.bf16.msra.mxu0 %v4377_v49  ;;  %v677_v7 = vld [vmem:[%s5176_s3 + $0x10] sm:$0xff]  ;;  %v678_v8 = vld [vmem:[%s5176_s3 + $0x18] sm:$0xff]  ;;  %s479_s15 = sadd.s32 %s2701_s0, %s4292_s26 }
  0x23   : > { %647 = vst [vmem:[#allocation2 + $0x49] sm:$0xff] %v4423_v12  ;;  %648 = vst [vmem:[#allocation2 + $0x51] sm:$0xff] %v4432_v15  ;;  %v4455_v29 = vmax.f32 %v616_v16, 0.0  ;;  %v617_v31 = vadd.f32 %v4345_v30, %v601_v17  ;;  %v604_v37 = vmul.f32 %v4335_v28, %v588_v25  ;;  %3667 = vmatprep.subr.bf16.mxu1 %v3666_v9  ;;  %3795 = vmatprep.subr.bf16.mxu0 %v3794_v19  ;;  %v2778_v13 = vld [vmem:[%s5176_s3 + $0x290] sm:$0xff]  ;;  %v2779_v16 = vld [vmem:[%s5176_s3 + $0x298] sm:$0xff]  ;;  %s2703_s26 = sshll.u32 %s479_s15, 3 }
  0x24   : > { %v557_v34 = vsel %vm4427_vm0, %v551_v22, 0.0  ;;  %v558_v35 = vsel %vm4427_vm0, %v552_v23, 0.0  ;;  %v618_v36 = vadd.f32 %v4345_v30, %v602_v24  ;;  %v3670_v39 = vpack.c.bf16 %v2727_v21, %v2726_v20  ;;  %4115 = vmatprep.mubr.msk.f32.mxu1 %vm4427_vm0, %v551_v22  ;;  %v679_v21 = vld [vmem:[%s5176_s3 + $0x20] sm:$0xff]  ;;  %v680_v22 = vld [vmem:[%s5176_s3 + $0x28] sm:$0xff]  ;;  %v681_v25 = vld [vmem:[%s5176_s3 + $0x30] sm:$0xff]  ;;  %s481_s16 = scalar_lea.vmem %s5175_s2, %s2703_s26  ;;  %s2708_s17 = sshll.u32 %s5202_s28, 1 }
  0x25   : > { %559 = vst [vmem:[#allocation2 + $0x1] sm:$0xff] %v557_v34  ;;  %560 = vst [vmem:[#allocation2 + $0x9] sm:$0xff] %v558_v35  ;;  %v4472_v40 = vmax.f32 %v617_v31, 0.0  ;;  %v619_v41 = vadd.f32 %v4345_v30, %v603_v32  ;;  %v605_v42 = vmul.f32 %v4335_v28, %v589_v33  ;;  %v3798_v44 = vpack.c.bf16 %v2775_v27, %v2774_v26  ;;  %v2780_v11 = vld [vmem:[%s5176_s3 + $0x2a0] sm:$0xff]  ;;  %v2781_v14 = vld [vmem:[%s5176_s3 + $0x2a8] sm:$0xff] }
  0x26   : > { %649 = vst [vmem:[#allocation2 + $0x61] sm:$0xff] %v4455_v29  ;;  %v4485_v47 = vmax.f32 %v618_v36, 0.0  ;;  %v620_v48 = vadd.f32 %v4345_v30, %v604_v37  ;;  %v606_v49 = vmul.f32 %v4335_v28, %v590_v38  ;;  %v607_v56 = vmul.f32 %v4335_v28, %v591_v43  ;;  %3669 = vmatpush3.bf16.msra.mxu1 %v3666_v9  ;;  %v682_v26 = vld [vmem:[%s5176_s3 + $0x38] sm:$0xff]  ;;  %v683_v32 = vld [vmem:[%s5176_s3 + $0x40] sm:$0xff]  ;;  %v684_v33 = vld [vmem:[%s5176_s3 + $0x48] sm:$0xff] }
  0x27   : > { %650 = vst [vmem:[#allocation2 + $0x69] sm:$0xff] %v4472_v40  ;;  %v4497_v54 = vmax.f32 %v619_v41, 0.0  ;;  %v621_v55 = vadd.f32 %v4345_v30, %v605_v42  ;;  %v608_v61 = vmul.f32 %v4335_v28, %v592_v50  ;;  %3797 = vmatpush3.bf16.msra.mxu0 %v3794_v19  ;;  %3671 = vmatprep.subr.bf16.mxu1 %v3670_v39  ;;  %v685_v36 = vld [vmem:[%s5176_s3 + $0x50] sm:$0xff]  ;;  %v686_v37 = vld [vmem:[%s5176_s3 + $0x58] sm:$0xff]  ;;  %v687_v43 = vld [vmem:[%s5176_s3 + $0x60] sm:$0xff] }
  0x28   : > { %651 = vst [vmem:[#allocation2 + $0x79] sm:$0xff] %v4485_v47  ;;  %v4503_v58 = vmax.f32 %v620_v48, 0.0  ;;  %v622_v60 = vadd.f32 %v4345_v30, %v606_v49  ;;  %v3674_v62 = vpack.c.bf16 %v676_v46, %v675_v45  ;;  %v623_v1 = vadd.f32 %v4345_v30, %v607_v56  ;;  %3799 = vmatprep.subr.bf16.mxu0 %v3798_v44  ;;  %v2786_v38 = vld [vmem:[%s5176_s3 + $0x2d0] sm:$0xff]  ;;  %v2788_v45 = vld [vmem:[%s5176_s3 + $0x2e0] sm:$0xff]  ;;  %v2789_v46 = vld [vmem:[%s5176_s3 + $0x2e8] sm:$0xff] }
  0x29   : > { %652 = vst [vmem:[#allocation2 + $0x81] sm:$0xff] %v4497_v54  ;;  %v4508_v63 = vmax.f32 %v621_v55, 0.0  ;;  %v609_v2 = vmul.f32 %v4335_v28, %v593_v57  ;;  %v3802_v3 = vpack.c.bf16 %v2777_v53, %v2776_v52  ;;  %v624_v6 = vadd.f32 %v4345_v30, %v608_v61  ;;  %v689_v50 = vld [vmem:[%s5176_s3 + $0x70] sm:$0xff]  ;;  %v690_v52 = vld [vmem:[%s5176_s3 + $0x78] sm:$0xff]  ;;  %v2729_v61 = vld [vmem:[%s5176_s3 + $0x108] sm:$0xff] }
  0x2a   : > { %653 = vst [vmem:[#allocation2 + $0x91] sm:$0xff] %v4503_v58  ;;  %v4513_v4 = vmax.f32 %v622_v60, 0.0  ;;  %v4523_v9 = vmax.f32 %v623_v1, 0.0  ;;  %3673 = vmatpush3.bf16.msra.mxu1 %v3670_v39  ;;  %v3678_v19 = vpack.c.bf16 %v678_v8, %v677_v7  ;;  %v3806_v20 = vpack.c.bf16 %v2779_v16, %v2778_v13  ;;  %v2787_v39 = vld [vmem:[%s5176_s3 + $0x2d8] sm:$0xff]  ;;  %v2790_v53 = vld [vmem:[%s5176_s3 + $0x2f0] sm:$0xff]  ;;  %v2728_v60 = vld [vmem:[%s5176_s3 + $0x100] sm:$0xff] }
  0x2b   : > { %654 = vst [vmem:[#allocation2 + $0x99] sm:$0xff] %v4508_v63  ;;  %v625_v10 = vadd.f32 %v4345_v30, %v609_v2  ;;  %v4533_v17 = vmax.f32 %v624_v6, 0.0  ;;  %3801 = vmatpush3.bf16.msra.mxu0 %v3798_v44  ;;  %3675 = vmatprep.subr.bf16.mxu1 %v3674_v62  ;;  %v3810_v24 = vpack.c.bf16 %v2781_v14, %v2780_v11  ;;  %v688_v44 = vld [vmem:[%s5176_s3 + $0x68] sm:$0xff]  ;;  %v2791_v55 = vld [vmem:[%s5176_s3 + $0x2f8] sm:$0xff]  ;;  %v561_v2 = vld [vmem:[%s481_s16] sm:$0xff]  ;;  %v571_v6 = vstv %s4653_s14 }
  0x2c   : > { %655 = vst [vmem:[#allocation2 + $0xa9] sm:$0xff] %v4513_v4  ;;  %656 = vst [vmem:[#allocation2 + $0xb1] sm:$0xff] %v4523_v9  ;;  %3803 = vmatprep.subr.bf16.mxu0 %v3802_v3  ;;  %v3686_v27 = vpack.c.bf16 %v682_v26, %v681_v25  ;;  %v3690_v34 = vpack.c.bf16 %v684_v33, %v683_v32  ;;  %v3694_v41 = vpack.c.bf16 %v686_v37, %v685_v36  ;;  %v2793_v1 = vld [vmem:[%s5176_s3 + $0x308] sm:$0xff]  ;;  %v659_v8 = vld [vmem:[#allocation2] sm:$0xff] }
  0x2d   : > { %v4536_v18 = vmax.f32 %v625_v10, 0.0  ;;  %657 = vst [vmem:[#allocation2 + $0xc1] sm:$0xff] %v4533_v17  ;;  %4116 = vmatmul.mubr.msk.f32.vlgmr.msra.gmra.mrb[0].mxu1 %vm4427_vm0, %v552_v23  ;;  %v3682_v23 = vpack.c.bf16 %v680_v22, %v679_v21  ;;  %v3822_v42 = vpack.c.bf16 %v2787_v39, %v2786_v38  ;;  %v3698_v48 = vpack.c.bf16 %v688_v44, %v687_v43  ;;  %v562_v7 = vld [vmem:[%s481_s16 + $0x8] sm:$0xff]  ;;  %v4680_v16 = vld [vmem:[#allocation2 + $0x1a] sm:$0xff]  ;;  %v2794_v11 = vld [vmem:[%s5176_s3 + $0x310] sm:$0xff]  ;;  %s502_s16 = sadd.s32 %s2708_s17, %s5210_s27 }
  0x2e   : > { %3395 = vmatmul.mubr.f32.vlgmr.msra.gmra.mrb[0].mxu0 %v4394_v59  ;;  %3677 = vmatpush3.bf16.msra.mxu1 %v3674_v62  ;;  %v3826_v49 = vpack.c.bf16 %v2789_v46, %v2788_v45  ;;  %v3702_v56 = vpack.c.bf16 %v690_v52, %v689_v50  ;;  %v3830_v57 = vpack.c.bf16 %v2791_v55, %v2790_v53  ;;  %v2792_v62 = vld [vmem:[%s5176_s3 + $0x300] sm:$0xff]  ;;  %v2731_v21 = vld [vmem:[%s5176_s3 + $0x118] sm:$0xff]  ;;  %vm4698_vm1 = vcmp.eq.s32.totalorder %v571_v6, 1  ;;  %v2733_v33 = vld [vmem:[%s5176_s3 + $0x128] sm:$0xff]  ;;  %s503_s23 = scalar_lea.vmem %s5180_s7, %s502_s16  ;;  %s510_s12 = scalar_lea.vmem %s5181_s8, %s502_s16 }
  0x2f   : > { %658 = vst [vmem:[#allocation2 + $0xc9] sm:$0xff] %v4536_v18  ;;  %3805 = vmatpush3.bf16.msra.mxu0 %v3802_v3  ;;  %3173 = vmatprep.mubr.f32.mxu1 %v4385_v51  ;;  %v2782_v51 = vld [vmem:[%s5176_s3 + $0x2b0] sm:$0xff]  ;;  %v563_v3 = vmul.f32 %v4335_v28, %v561_v2  ;;  %v3706_v10 = vpack.c.bf16 %v2729_v61, %v2728_v60  ;;  %v2795_v14 = vld [vmem:[%s5176_s3 + $0x318] sm:$0xff]  ;;  %v4705_v25 = vld [vmem:[#allocation2 + $0x22] sm:$0xff] }
  0x30   : > { %3397 = vmatprep.mubr.f32.mxu0 %v4402_v0  ;;  %3679 = vmatprep.subr.bf16.mxu1 %v3678_v19  ;;  %v564_v13 = vmul.f32 %v4335_v28, %v562_v7  ;;  %v660_v28 = vld [vmem:[#allocation2 + $0x8] sm:$0xff]  ;;  %v2732_v32 = vld [vmem:[%s5176_s3 + $0x120] sm:$0xff]  ;;  %v4741_v38 = vld [vmem:[#allocation2 + $0x30] sm:$0xff] }
  0x31   : > { %3174 = vmatmul.mubr.f32.gmra.mrb[2].mxu1 %v4394_v59  ;;  %3807 = vmatprep.subr.bf16.mxu0 %v3806_v20  ;;  %v2783_v59 = vld [vmem:[%s5176_s3 + $0x2b8] sm:$0xff]  ;;  %v4689_v22 = vadd.f32 %v4345_v30, %v563_v3  ;;  %v3714_v39 = vpack.c.bf16 %v2733_v33, %v2732_v32  ;;  %v2734_v43 = vld [vmem:[%s5176_s3 + $0x130] sm:$0xff]  ;;  %v4765_v50 = vld [vmem:[#allocation2 + $0x48] sm:$0xff] }
  0x32   : > { %3398 = vmatmul.mubr.f32.gmra.mrb[2].mxu0 %v4413_v5  ;;  %3681 = vmatpush3.bf16.msra.mxu1 %v3678_v19  ;;  %v3814_v31 = vpack.c.bf16 %v2783_v59, %v2782_v51  ;;  %v3834_v19 = vpack.c.bf16 %v2793_v1, %v2792_v62  ;;  %v4709_v51 = vld [vmem:[#allocation2 + $0x18] sm:$0xff]  ;;  %v2798_v46 = vld [vmem:[%s5176_s3 + $0x330] sm:$0xff]  ;;  %v4768_v53 = vld [vmem:[#allocation2 + $0x62] sm:$0xff] }
  0x33   : > { %3809 = vmatpush3.bf16.msra.mxu0 %v3806_v20  ;;  %3176 = vmatprep.mubr.f32.mxu1 %v4402_v0  ;;  %v2784_v0 = vld [vmem:[%s5176_s3 + $0x2c0] sm:$0xff]  ;;  %v2730_v20 = vld [vmem:[%s5176_s3 + $0x110] sm:$0xff]  ;;  %v567_v26 = vmax.f32 %v4689_v22, 0.0  ;;  %v2735_v44 = vld [vmem:[%s5176_s3 + $0x138] sm:$0xff] }
  0x34   : > { %3400 = vmatprep.mubr.f32.mxu0 %v4423_v12  ;;  %3683 = vmatprep.subr.bf16.mxu1 %v3682_v23  ;;  %v3710_v59 = vpack.c.bf16 %v2731_v21, %v2730_v20  ;;  %v4738_v37 = vld [vmem:[#allocation2 + $0x3a] sm:$0xff]  ;;  %v3718_v52 = vpack.c.bf16 %v2735_v44, %v2734_v43  ;;  %v4777_v60 = vld [vmem:[#allocation2 + $0x50] sm:$0xff]  ;;  %v2801_v62 = vld [vmem:[%s5176_s3 + $0x348] sm:$0xff] }
  0x35   : > { %3177 = vmatmul.mubr.f32.gmra.mrb[4].mxu1 %v4413_v5  ;;  %3811 = vmatprep.subr.bf16.mxu0 %v3810_v24  ;;  %v2785_v5 = vld [vmem:[%s5176_s3 + $0x2c8] sm:$0xff]  ;;  %v4753_v45 = vld [vmem:[#allocation2 + $0x38] sm:$0xff]  ;;  %v2800_v61 = vld [vmem:[%s5176_s3 + $0x340] sm:$0xff] }
  0x36   : > { %3401 = vmatmul.mubr.f32.gmra.mrb[4].mxu0 %v4432_v15  ;;  %3685 = vmatpush3.bf16.msra.mxu1 %v3682_v23  ;;  %v3818_v35 = vpack.c.bf16 %v2785_v5, %v2784_v0  ;;  %v573_v0 = vsel %vm4698_vm1, %v567_v26, 0.0  ;;  %v4725_v5 = vld [vmem:[#allocation2 + $0x20] sm:$0xff]  ;;  %v4786_v1 = vld [vmem:[#allocation2 + $0x6a] sm:$0xff]  ;;  %v3850_v7 = vpack.c.bf16 %v2801_v62, %v2800_v61  ;;  %v2803_v20 = vld [vmem:[%s5176_s3 + $0x358] sm:$0xff] }
  0x37   : > { %3813 = vmatpush3.bf16.msra.mxu0 %v3810_v24  ;;  %3179 = vmatprep.mubr.f32.mxu1 %v4423_v12  ;;  %v4703_v24 = vadd.f32 %v4345_v30, %v564_v13  ;;  %v3838_v30 = vpack.c.bf16 %v2795_v14, %v2794_v11  ;;  %576 = vst [vmem:[#allocation2 + $0xd9] sm:$0xff] %v573_v0  ;;  %v4789_v2 = vld [vmem:[#allocation2 + $0x60] sm:$0xff]  ;;  %v4801_v13 = vld [vmem:[#allocation2 + $0x68] sm:$0xff]  ;;  %v4816_v14 = vld [vmem:[#allocation2 + $0x92] sm:$0xff] }
  0x38   : > { %3403 = vmatprep.mubr.f32.mxu0 %v4455_v29  ;;  %3687 = vmatprep.subr.bf16.mxu1 %v3686_v27  ;;  %v4792_v6 = vld [vmem:[#allocation2 + $0x7a] sm:$0xff]  ;;  %v4810_v21 = vld [vmem:[#allocation2 + $0x82] sm:$0xff]  ;;  %v2742_v44 = vld [vmem:[%s5176_s3 + $0x170] sm:$0xff] }
  0x39   : > { %3180 = vmatmul.mubr.f32.gmra.mrb[6].mxu1 %v4432_v15  ;;  %3815 = vmatprep.subr.bf16.mxu0 %v3814_v31  ;;  %v2741_v32 = vld [vmem:[%s5176_s3 + $0x168] sm:$0xff]  ;;  %v4825_v33 = vld [vmem:[#allocation2 + $0x80] sm:$0xff] }
  0x3a   : > { %3404 = vmatmul.mubr.f32.gmra.mrb[6].mxu0 %v4472_v40  ;;  %3689 = vmatpush3.bf16.msra.mxu1 %v3686_v27  ;;  %v568_v27 = vmax.f32 %v4703_v24, 0.0  ;;  %v2804_v0 = vld [vmem:[%s5176_s3 + $0x360] sm:$0xff] }
  0x3b   : > { %3817 = vmatpush3.bf16.msra.mxu0 %v3814_v31  ;;  %3182 = vmatprep.mubr.f32.mxu1 %v4455_v29  ;;  %v4712_v31 = vld [vmem:[#allocation2 + $0x32] sm:$0xff]  ;;  %v4864_v62 = vld [vmem:[#allocation2 + $0xc2] sm:$0xff] }
  0x3c   : > { %3406 = vmatprep.mubr.f32.mxu0 %v4485_v47  ;;  %3691 = vmatprep.subr.bf16.mxu1 %v3690_v34  ;;  %v574_v36 = vsel %vm4698_vm1, %v568_v27, 0.0 }
  0x3d   : > { %3183 = vmatmul.mubr.f32.gmra.mrb[8].mxu1 %v4472_v40  ;;  %3819 = vmatprep.subr.bf16.mxu0 %v3818_v35  ;;  %577 = vst [vmem:[#allocation2 + $0xe1] sm:$0xff] %v574_v36  ;;  %v4837_v36 = vld [vmem:[#allocation2 + $0x90] sm:$0xff] }
  0x3e   : > { %3407 = vmatmul.mubr.f32.gmra.mrb[8].mxu0 %v4497_v54  ;;  %3693 = vmatpush3.bf16.msra.mxu1 %v3690_v34  ;;  %v2796_v34 = vld [vmem:[%s5176_s3 + $0x320] sm:$0xff] }
  0x3f   : > { %3821 = vmatpush3.bf16.msra.mxu0 %v3818_v35  ;;  %3185 = vmatprep.mubr.f32.mxu1 %v4485_v47  ;;  %v2797_v35 = vld [vmem:[%s5176_s3 + $0x328] sm:$0xff] }
  0x40   : > { %3409 = vmatprep.mubr.f32.mxu0 %v4503_v58  ;;  %3695 = vmatprep.subr.bf16.mxu1 %v3694_v41 }
  0x41   : > { %3186 = vmatmul.mubr.f32.gmra.mrb[10].mxu1 %v4497_v54  ;;  %3823 = vmatprep.subr.bf16.mxu0 %v3822_v42 }
  0x42   : > { %3410 = vmatmul.mubr.f32.gmra.mrb[10].mxu0 %v4508_v63  ;;  %3697 = vmatpush3.bf16.msra.mxu1 %v3694_v41  ;;  %v4744_v41 = vld [vmem:[#allocation2 + $0x4a] sm:$0xff] }
  0x43   : > { %3825 = vmatpush3.bf16.msra.mxu0 %v3822_v42  ;;  %3188 = vmatprep.mubr.f32.mxu1 %v4503_v58  ;;  %v3842_v42 = vpack.c.bf16 %v2797_v35, %v2796_v34  ;;  %v2805_v34 = vld [vmem:[%s5176_s3 + $0x368] sm:$0xff]  ;;  %v4834_v35 = vld [vmem:[#allocation2 + $0x9a] sm:$0xff] }
  0x44   : > { %3412 = vmatprep.mubr.f32.mxu0 %v4513_v4  ;;  %3699 = vmatprep.subr.bf16.mxu1 %v3698_v48  ;;  %v3858_v43 = vpack.c.bf16 %v2805_v34, %v2804_v0  ;;  %v2746_v0 = vld [vmem:[%s5176_s3 + $0x190] sm:$0xff]  ;;  %v2747_v34 = vld [vmem:[%s5176_s3 + $0x198] sm:$0xff] }
  0x45   : > { %3189 = vmatmul.mubr.f32.gmra.mrb[12].mxu1 %v4508_v63  ;;  %3827 = vmatprep.subr.bf16.mxu0 %v3826_v49 }
  0x46   : > { %3413 = vmatmul.mubr.f32.gmra.mrb[12].mxu0 %v4523_v9  ;;  %3701 = vmatpush3.bf16.msra.mxu1 %v3698_v48  ;;  %v2799_v48 = vld [vmem:[%s5176_s3 + $0x338] sm:$0xff] }
  0x47   : > { %3829 = vmatpush3.bf16.msra.mxu0 %v3826_v49  ;;  %3191 = vmatprep.mubr.f32.mxu1 %v4513_v4  ;;  %v4762_v49 = vld [vmem:[#allocation2 + $0x52] sm:$0xff]  ;;  %v3846_v55 = vpack.c.bf16 %v2799_v48, %v2798_v46 }
  0x48   : > { %3415 = vmatprep.mubr.f32.mxu0 %v4533_v17  ;;  %3703 = vmatprep.subr.bf16.mxu1 %v3702_v56  ;;  %v2743_v46 = vld [vmem:[%s5176_s3 + $0x178] sm:$0xff] }
  0x49   : > { %3192 = vmatmul.mubr.f32.gmra.mrb[14].mxu1 %v4523_v9  ;;  %3831 = vmatprep.subr.bf16.mxu0 %v3830_v57  ;;  %v4849_v48 = vld [vmem:[#allocation2 + $0x98] sm:$0xff]  ;;  %v3734_v61 = vpack.c.bf16 %v2743_v46, %v2742_v44  ;;  %v3742_v46 = vpack.c.bf16 %v2747_v34, %v2746_v0  ;;  %v2752_v0 = vld [vmem:[%s5176_s3 + $0x1c0] sm:$0xff]  ;;  %v2753_v34 = vld [vmem:[%s5176_s3 + $0x1c8] sm:$0xff] }
  0x4a   : > { %3416 = vmatmul.mubr.f32.gmra.mrb[14].mxu0 %v4536_v18  ;;  %3705 = vmatpush3.bf16.msra.mxu1 %v3702_v56  ;;  %v2736_v56 = vld [vmem:[%s5176_s3 + $0x140] sm:$0xff]  ;;  %v2811_v44 = vld [vmem:[%s5176_s3 + $0x398] sm:$0xff] }
  0x4b   : > { %3833 = vmatpush3.bf16.msra.mxu0 %v3830_v57  ;;  %3226 = vmatprep.mubr.f32.mxu1 %v659_v8  ;;  %v2737_v57 = vld [vmem:[%s5176_s3 + $0x148] sm:$0xff]  ;;  %v2738_v8 = vld [vmem:[%s5176_s3 + $0x150] sm:$0xff] }
  0x4c   : > { %3450 = vmatprep.mubr.f32.mxu0 %v4680_v16  ;;  %3707 = vmatprep.subr.bf16.mxu1 %v3706_v10  ;;  %v3722_v3 = vpack.c.bf16 %v2737_v57, %v2736_v56  ;;  %v4858_v56 = vld [vmem:[#allocation2 + $0xb2] sm:$0xff]  ;;  %v4861_v57 = vld [vmem:[#allocation2 + $0xa8] sm:$0xff] }
  0x4d   : > { %3227 = vmatmul.mubr.f32.vlgmr.msra.gmra.mrb[0].mxu1 %v660_v28  ;;  %3835 = vmatprep.subr.bf16.mxu0 %v3834_v19  ;;  %v4813_v28 = vld [vmem:[#allocation2 + $0x78] sm:$0xff] }
  0x4e   : > { %3451 = vmatmul.mubr.f32.vlgmr.msra.gmra.mrb[0].mxu0 %v4705_v25  ;;  %3709 = vmatpush3.bf16.msra.mxu1 %v3706_v10  ;;  %v2739_v10 = vld [vmem:[%s5176_s3 + $0x158] sm:$0xff] }
  0x4f   : > { %3837 = vmatpush3.bf16.msra.mxu0 %v3834_v19  ;;  %3229 = vmatprep.mubr.f32.mxu1 %v4709_v51  ;;  %v2802_v19 = vld [vmem:[%s5176_s3 + $0x350] sm:$0xff]  ;;  %v3726_v11 = vpack.c.bf16 %v2739_v10, %v2738_v8  ;;  %v2745_v8 = vld [vmem:[%s5176_s3 + $0x188] sm:$0xff] }
  0x50   : > { %3453 = vmatprep.mubr.f32.mxu0 %v4712_v31  ;;  %3711 = vmatprep.subr.bf16.mxu1 %v3710_v59  ;;  %v4873_v10 = vld [vmem:[#allocation2 + $0xb0] sm:$0xff] }
  0x51   : > { %3230 = vmatmul.mubr.f32.gmra.mrb[2].mxu1 %v4725_v5  ;;  %3839 = vmatprep.subr.bf16.mxu0 %v3838_v30 }
  0x52   : > { %3454 = vmatmul.mubr.f32.gmra.mrb[2].mxu0 %v4738_v37  ;;  %3713 = vmatpush3.bf16.msra.mxu1 %v3710_v59  ;;  %v3854_v59 = vpack.c.bf16 %v2803_v20, %v2802_v19  ;;  %v2808_v19 = vld [vmem:[%s5176_s3 + $0x380] sm:$0xff]  ;;  %v2809_v20 = vld [vmem:[%s5176_s3 + $0x388] sm:$0xff] }
  0x53   : > { %3841 = vmatpush3.bf16.msra.mxu0 %v3838_v30  ;;  %3232 = vmatprep.mubr.f32.mxu1 %v4741_v38  ;;  %v2740_v30 = vld [vmem:[%s5176_s3 + $0x160] sm:$0xff] }
  0x54   : > { %3456 = vmatprep.mubr.f32.mxu0 %v4744_v41  ;;  %3715 = vmatprep.subr.bf16.mxu1 %v3714_v39 }
  0x55   : > { %3233 = vmatmul.mubr.f32.gmra.mrb[4].mxu1 %v4753_v45  ;;  %3843 = vmatprep.subr.bf16.mxu0 %v3842_v42 }
  0x56   : > { %3457 = vmatmul.mubr.f32.gmra.mrb[4].mxu0 %v4762_v49  ;;  %3717 = vmatpush3.bf16.msra.mxu1 %v3714_v39  ;;  %v3730_v39 = vpack.c.bf16 %v2741_v32, %v2740_v30  ;;  %v3866_v32 = vpack.c.bf16 %v2809_v20, %v2808_v19  ;;  %v2750_v20 = vld [vmem:[%s5176_s3 + $0x1b0] sm:$0xff] }
  0x57   : > { %3845 = vmatpush3.bf16.msra.mxu0 %v3842_v42  ;;  %3235 = vmatprep.mubr.f32.mxu1 %v4765_v50  ;;  %v4840_v42 = vld [vmem:[#allocation2 + $0xaa] sm:$0xff] }
  0x58   : > { %3459 = vmatprep.mubr.f32.mxu0 %v4768_v53  ;;  %3719 = vmatprep.subr.bf16.mxu1 %v3718_v52 }
  0x59   : > { %3236 = vmatmul.mubr.f32.gmra.mrb[6].mxu1 %v4777_v60  ;;  %3847 = vmatprep.subr.bf16.mxu0 %v3846_v55 }
  0x5a   : > { %3460 = vmatmul.mubr.f32.gmra.mrb[6].mxu0 %v4786_v1  ;;  %3721 = vmatpush3.bf16.msra.mxu1 %v3718_v52  ;;  %v2806_v52 = vld [vmem:[%s5176_s3 + $0x370] sm:$0xff] }
  0x5b   : > { %3849 = vmatpush3.bf16.msra.mxu0 %v3846_v55  ;;  %3238 = vmatprep.mubr.f32.mxu1 %v4789_v2  ;;  %v2807_v55 = vld [vmem:[%s5176_s3 + $0x378] sm:$0xff] }
  0x5c   : > { %3462 = vmatprep.mubr.f32.mxu0 %v4792_v6  ;;  %3723 = vmatprep.subr.bf16.mxu1 %v3722_v3 }
  0x5d   : > { %3239 = vmatmul.mubr.f32.gmra.mrb[8].mxu1 %v4801_v13  ;;  %3851 = vmatprep.subr.bf16.mxu0 %v3850_v7 }
  0x5e   : > { %3463 = vmatmul.mubr.f32.gmra.mrb[8].mxu0 %v4810_v21  ;;  %3725 = vmatpush3.bf16.msra.mxu1 %v3722_v3  ;;  %v3862_v3 = vpack.c.bf16 %v2807_v55, %v2806_v52  ;;  %v2748_v55 = vld [vmem:[%s5176_s3 + $0x1a0] sm:$0xff] }
  0x5f   : > { %3853 = vmatpush3.bf16.msra.mxu0 %v3850_v7  ;;  %3241 = vmatprep.mubr.f32.mxu1 %v4813_v28  ;;  %v2744_v7 = vld [vmem:[%s5176_s3 + $0x180] sm:$0xff] }
  0x60   : > { %3465 = vmatprep.mubr.f32.mxu0 %v4816_v14  ;;  %3727 = vmatprep.subr.bf16.mxu1 %v3726_v11  ;;  %v3738_v30 = vpack.c.bf16 %v2745_v8, %v2744_v7  ;;  %v2813_v7 = vld [vmem:[%s5176_s3 + $0x3a8] sm:$0xff] }
  0x61   : > { %3242 = vmatmul.mubr.f32.gmra.mrb[10].mxu1 %v4825_v33  ;;  %3855 = vmatprep.subr.bf16.mxu0 %v3854_v59 }
  0x62   : > { %3466 = vmatmul.mubr.f32.gmra.mrb[10].mxu0 %v4834_v35  ;;  %3729 = vmatpush3.bf16.msra.mxu1 %v3726_v11  ;;  %v4882_v11 = vld [vmem:[#allocation2 + $0xca] sm:$0xff] }
  0x63   : > { %3857 = vmatpush3.bf16.msra.mxu0 %v3854_v59  ;;  %3244 = vmatprep.mubr.f32.mxu1 %v4837_v36  ;;  %v1014_v59 = vld [vmem:[#allocation2 + $0x2] sm:$0xff] }
  0x64   : > { %3468 = vmatprep.mubr.f32.mxu0 %v4840_v42  ;;  %3731 = vmatprep.subr.bf16.mxu1 %v3730_v39 }
  0x65   : > { %3245 = vmatmul.mubr.f32.gmra.mrb[12].mxu1 %v4849_v48  ;;  %3859 = vmatprep.subr.bf16.mxu0 %v3858_v43 }
  0x66   : > { %3469 = vmatmul.mubr.f32.gmra.mrb[12].mxu0 %v4858_v56  ;;  %3733 = vmatpush3.bf16.msra.mxu1 %v3730_v39  ;;  %v1015_v39 = vld [vmem:[#allocation2 + $0xa] sm:$0xff] }
  0x67   : > { %3861 = vmatpush3.bf16.msra.mxu0 %v3858_v43  ;;  %3247 = vmatprep.mubr.f32.mxu1 %v4861_v57  ;;  %v2810_v43 = vld [vmem:[%s5176_s3 + $0x390] sm:$0xff] }
  0x68   : > { %3471 = vmatprep.mubr.f32.mxu0 %v4864_v62  ;;  %3735 = vmatprep.subr.bf16.mxu1 %v3734_v61  ;;  %v3870_v52 = vpack.c.bf16 %v2811_v44, %v2810_v43  ;;  %v2817_v43 = vld [vmem:[%s5176_s3 + $0x3c8] sm:$0xff]  ;;  %v3754_v44 = vpack.c.bf16 %v2753_v34, %v2752_v0  ;;  %v2758_v0 = vld [vmem:[%s5176_s3 + $0x1f0] sm:$0xff]  ;;  %v2759_v34 = vld [vmem:[%s5176_s3 + $0x1f8] sm:$0xff] }
  0x69   : > { %3248 = vmatmul.mubr.f32.gmra.mrb[14].mxu1 %v4873_v10  ;;  %3863 = vmatprep.subr.bf16.mxu0 %v3862_v3 }
  0x6a   : > { %3472 = vmatmul.mubr.f32.gmra.mrb[14].mxu0 %v4882_v11  ;;  %3737 = vmatpush3.bf16.msra.mxu1 %v3734_v61  ;;  %v2749_v61 = vld [vmem:[%s5176_s3 + $0x1a8] sm:$0xff] }
  0x6b   : > { %3865 = vmatpush3.bf16.msra.mxu0 %v3862_v3  ;;  %3282 = vmatprep.mubr.f32.mxu1 %v1014_v59  ;;  %v2812_v3 = vld [vmem:[%s5176_s3 + $0x3a0] sm:$0xff]  ;;  %v3746_v8 = vpack.c.bf16 %v2749_v61, %v2748_v55  ;;  %v2751_v59 = vld [vmem:[%s5176_s3 + $0x1b8] sm:$0xff]  ;;  %v2818_v61 = vld [vmem:[%s5176_s3 + $0x3d0] sm:$0xff] }
  0x6c   : > { %3506 = vmatprep.mubr.f32.mxu0 %v4741_v38  ;;  %3739 = vmatprep.subr.bf16.mxu1 %v3738_v30  ;;  %v3874_v19 = vpack.c.bf16 %v2813_v7, %v2812_v3  ;;  %v2755_v55 = vld [vmem:[%s5176_s3 + $0x1d8] sm:$0xff] }
  0x6d   : > { %3283 = vmatmul.mubr.f32.vlgmr.msra.gmra.mrb[0].mxu1 %v1015_v39  ;;  %3867 = vmatprep.subr.bf16.mxu0 %v3866_v32  ;;  %v2816_v39 = vld [vmem:[%s5176_s3 + $0x3c0] sm:$0xff]  ;;  %v2819_v3 = vld [vmem:[%s5176_s3 + $0x3d8] sm:$0xff] }
  0x6e   : > { %3507 = vmatmul.mubr.f32.vlgmr.msra.gmra.mrb[0].mxu0 %v4753_v45  ;;  %3741 = vmatpush3.bf16.msra.mxu1 %v3738_v30  ;;  %v3750_v30 = vpack.c.bf16 %v2751_v59, %v2750_v20  ;;  %v2757_v20 = vld [vmem:[%s5176_s3 + $0x1e8] sm:$0xff]  ;;  %v2820_v59 = vld [vmem:[%s5176_s3 + $0x3e0] sm:$0xff] }
  0x6f   : > { %3869 = vmatpush3.bf16.msra.mxu0 %v3866_v32  ;;  %3285 = vmatprep.mubr.f32.mxu1 %v4680_v16  ;;  %v2814_v16 = vld [vmem:[%s5176_s3 + $0x3b0] sm:$0xff] }
  0x70   : > { %3509 = vmatprep.mubr.f32.mxu0 %v4765_v50  ;;  %3743 = vmatprep.subr.bf16.mxu1 %v3742_v46 }
  0x71   : > { %3286 = vmatmul.mubr.f32.gmra.mrb[2].mxu1 %v4705_v25  ;;  %3871 = vmatprep.subr.bf16.mxu0 %v3870_v52  ;;  %v2815_v25 = vld [vmem:[%s5176_s3 + $0x3b8] sm:$0xff] }
  0x72   : > { %3510 = vmatmul.mubr.f32.gmra.mrb[2].mxu0 %v4777_v60  ;;  %3745 = vmatpush3.bf16.msra.mxu1 %v3742_v46  ;;  %v3878_v32 = vpack.c.bf16 %v2815_v25, %v2814_v16  ;;  %v3882_v46 = vpack.c.bf16 %v2817_v43, %v2816_v39  ;;  %v2821_v16 = vld [vmem:[%s5176_s3 + $0x3e8] sm:$0xff]  ;;  %v2822_v39 = vld [vmem:[%s5176_s3 + $0x3f0] sm:$0xff]  ;;  %v2823_v43 = vld [vmem:[%s5176_s3 + $0x3f8] sm:$0xff] }
  0x73   : > { %3873 = vmatpush3.bf16.msra.mxu0 %v3870_v52  ;;  %3288 = vmatprep.mubr.f32.mxu1 %v4712_v31  ;;  %v2754_v52 = vld [vmem:[%s5176_s3 + $0x1d0] sm:$0xff] }
  0x74   : > { %3512 = vmatprep.mubr.f32.mxu0 %v4789_v2  ;;  %3747 = vmatprep.subr.bf16.mxu1 %v3746_v8  ;;  %v3758_v7 = vpack.c.bf16 %v2755_v55, %v2754_v52  ;;  %v1805_v52 = vld [vmem:[#allocation2 + $0xd8] sm:$0xff]  ;;  %v3894_v55 = vpack.c.bf16 %v2823_v43, %v2822_v39 }
  0x75   : > { %3289 = vmatmul.mubr.f32.gmra.mrb[4].mxu1 %v4738_v37  ;;  %3875 = vmatprep.subr.bf16.mxu0 %v3874_v19 }
  0x76   : > { %3513 = vmatmul.mubr.f32.gmra.mrb[4].mxu0 %v4801_v13  ;;  %3749 = vmatpush3.bf16.msra.mxu1 %v3746_v8  ;;  %v3886_v8 = vpack.c.bf16 %v2819_v3, %v2818_v61  ;;  %v2824_v61 = vld [vmem:[%s5176_s3 + $0x400] sm:$0xff]  ;;  %v2825_v3 = vld [vmem:[%s5176_s3 + $0x408] sm:$0xff] }
  0x77   : > { %3877 = vmatpush3.bf16.msra.mxu0 %v3874_v19  ;;  %3291 = vmatprep.mubr.f32.mxu1 %v4744_v41  ;;  %v2756_v19 = vld [vmem:[%s5176_s3 + $0x1e0] sm:$0xff] }
  0x78   : > { %3515 = vmatprep.mubr.f32.mxu0 %v4813_v28  ;;  %3751 = vmatprep.subr.bf16.mxu1 %v3750_v30  ;;  %v3762_v25 = vpack.c.bf16 %v2757_v20, %v2756_v19  ;;  %v1985_v19 = vld [vmem:[#allocation2 + $0x31] sm:$0xff] }
  0x79   : > { %3292 = vmatmul.mubr.f32.gmra.mrb[6].mxu1 %v4762_v49  ;;  %3879 = vmatprep.subr.bf16.mxu0 %v3878_v32  ;;  %v2826_v20 = vld [vmem:[%s5176_s3 + $0x410] sm:$0xff] }
  0x7a   : > { %3516 = vmatmul.mubr.f32.gmra.mrb[6].mxu0 %v4825_v33  ;;  %3753 = vmatpush3.bf16.msra.mxu1 %v3750_v30  ;;  %v4980_v30 = vld [vmem:[#allocation2 + $0xc0] sm:$0xff] }
  0x7b   : > { %3881 = vmatpush3.bf16.msra.mxu0 %v3878_v32  ;;  %3294 = vmatprep.mubr.f32.mxu1 %v4768_v53  ;;  %v3890_v32 = vpack.c.bf16 %v2821_v16, %v2820_v59  ;;  %v2827_v59 = vld [vmem:[%s5176_s3 + $0x418] sm:$0xff] }
  0x7c   : > { %3518 = vmatprep.mubr.f32.mxu0 %v4837_v36  ;;  %3755 = vmatprep.subr.bf16.mxu1 %v3754_v44  ;;  %v1986_v16 = vld [vmem:[#allocation2 + $0x39] sm:$0xff] }
  0x7d   : > { %3295 = vmatmul.mubr.f32.gmra.mrb[8].mxu1 %v4786_v1  ;;  %3883 = vmatprep.subr.bf16.mxu0 %v3882_v46 }
  0x7e   : > { %3519 = vmatmul.mubr.f32.gmra.mrb[8].mxu0 %v4849_v48  ;;  %3757 = vmatpush3.bf16.msra.mxu1 %v3754_v44  ;;  %v4996_v44 = vld [vmem:[#allocation2 + $0xc8] sm:$0xff] }
  0x7f   : > { %3885 = vmatpush3.bf16.msra.mxu0 %v3882_v46  ;;  %3297 = vmatprep.mubr.f32.mxu1 %v4792_v6  ;;  %v3766_v46 = vpack.c.bf16 %v2759_v34, %v2758_v0  ;;  %v2829_v0 = vld [vmem:[%s5176_s3 + $0x428] sm:$0xff]  ;;  %v2831_v34 = vld [vmem:[%s5176_s3 + $0x438] sm:$0xff] }
  0x80   : > { %3521 = vmatprep.mubr.f32.mxu0 %v4861_v57  ;;  %3759 = vmatprep.subr.bf16.mxu1 %v3758_v7 }
  0x81   : > { %3298 = vmatmul.mubr.f32.gmra.mrb[10].mxu1 %v4810_v21  ;;  %3887 = vmatprep.subr.bf16.mxu0 %v3886_v8 }
  0x82   : > { %3522 = vmatmul.mubr.f32.gmra.mrb[10].mxu0 %v4873_v10  ;;  %3761 = vmatpush3.bf16.msra.mxu1 %v3758_v7  ;;  %v1806_v7 = vld [vmem:[#allocation2 + $0xe0] sm:$0xff] }
  0x83   : > { %3889 = vmatpush3.bf16.msra.mxu0 %v3886_v8  ;;  %3300 = vmatprep.mubr.f32.mxu1 %v4816_v14  ;;  %v3898_v8 = vpack.c.bf16 %v2825_v3, %v2824_v61 }
  0x84   : > { %3524 = vmatprep.mubr.f32.mxu0 %v4980_v30  ;;  %3763 = vmatprep.subr.bf16.mxu1 %v3762_v25 }
  0x85   : > { %3301 = vmatmul.mubr.f32.gmra.mrb[12].mxu1 %v4834_v35  ;;  %3891 = vmatprep.subr.bf16.mxu0 %v3890_v32 }
  0x86   : > { %3525 = vmatmul.mubr.f32.gmra.mrb[12].mxu0 %v4996_v44  ;;  %3765 = vmatpush3.bf16.msra.mxu1 %v3762_v25  ;;  %v3902_v25 = vpack.c.bf16 %v2827_v59, %v2826_v20 }
  0x87   : > { %3893 = vmatpush3.bf16.msra.mxu0 %v3890_v32  ;;  %3303 = vmatprep.mubr.f32.mxu1 %v4840_v42  ;;  %v2828_v32 = vld [vmem:[%s5176_s3 + $0x420] sm:$0xff] }
  0x88   : > { %3527 = vmatprep.mubr.f32.mxu0 %v1805_v52  ;;  %3767 = vmatprep.subr.bf16.mxu1 %v3766_v46 }
  0x89   : > { %3304 = vmatmul.mubr.f32.gmra.mrb[14].mxu1 %v4858_v56  ;;  %3895 = vmatprep.subr.bf16.mxu0 %v3894_v55 }
  0x8a   : > { %3528 = vmatmul.mubr.f32.gmra.mrb[14].mxu0 %v1806_v7  ;;  %3769 = vmatpush3.bf16.msra.mxu1 %v3766_v46 }
  0x8b   : > { %3897 = vmatpush3.bf16.msra.mxu0 %v3894_v55  ;;  %3338 = vmatprep.mubr.f32.mxu1 %v4709_v51  ;;  %v3906_v51 = vpack.c.bf16 %v2829_v0, %v2828_v32 }
  0x8c   : > { %3562 = vmatprep.mubr.f32.mxu0 %v1985_v19  ;;  %3899 = vmatprep.subr.bf16.mxu0 %v3898_v8 }
  0x8d   : > { %3339 = vmatmul.mubr.f32.vlgmr.msra.gmra.mrb[0].mxu1 %v4725_v5  ;;  %3930 = vmatprep.subr.bf16.mxu1 %v3898_v8  ;;  %v2830_v5 = vld [vmem:[%s5176_s3 + $0x430] sm:$0xff] }
  0x8e   : > { %3563 = vmatmul.mubr.f32.vlgmr.msra.gmra.mrb[0].mxu0 %v1986_v16  ;;  %3938 = vmatpush3.bf16.msra.mxu1 %v3898_v8 }
  0x8f   : > { %3901 = vmatpush3.bf16.msra.mxu0 %v3898_v8  ;;  %3341 = vmatprep.mubr.f32.mxu1 %v4741_v38  ;;  %v2832_v38 = vld [vmem:[%s5176_s3 + $0x440] sm:$0xff] }
  0x90   : > { %3565 = vmatprep.mubr.f32.mxu0 %v4423_v12  ;;  %3903 = vmatprep.subr.bf16.mxu0 %v3902_v25  ;;  %v3910_v12 = vpack.c.bf16 %v2831_v34, %v2830_v5 }
  0x91   : > { %3342 = vmatmul.mubr.f32.gmra.mrb[2].mxu1 %v4753_v45  ;;  %3931 = vmatprep.subr.bf16.mxu1 %v3902_v25  ;;  %v2833_v45 = vld [vmem:[%s5176_s3 + $0x448] sm:$0xff] }
  0x92   : > { %3566 = vmatmul.mubr.f32.gmra.mrb[2].mxu0 %v4432_v15  ;;  %3939 = vmatpush3.bf16.msra.mxu1 %v3902_v25  ;;  %v3914_v15 = vpack.c.bf16 %v2833_v45, %v2832_v38 }
  0x93   : > { %3905 = vmatpush3.bf16.msra.mxu0 %v3902_v25  ;;  %3344 = vmatprep.mubr.f32.mxu1 %v4765_v50  ;;  %v2835_v50 = vld [vmem:[%s5176_s3 + $0x458] sm:$0xff] }
  0x94   : > { %3568 = vmatprep.mubr.f32.mxu0 %v4455_v29  ;;  %3907 = vmatprep.subr.bf16.mxu0 %v3906_v51  ;;  %v2834_v29 = vld [vmem:[%s5176_s3 + $0x450] sm:$0xff] }
  0x95   : > { %3345 = vmatmul.mubr.f32.gmra.mrb[4].mxu1 %v4777_v60  ;;  %3932 = vmatprep.subr.bf16.mxu1 %v3906_v51  ;;  %v2837_v60 = vld [vmem:[%s5176_s3 + $0x468] sm:$0xff] }
  0x96   : > { %3569 = vmatmul.mubr.f32.gmra.mrb[4].mxu0 %v4472_v40  ;;  %3940 = vmatpush3.bf16.msra.mxu1 %v3906_v51  ;;  %v3918_v40 = vpack.c.bf16 %v2835_v50, %v2834_v29 }
  0x97   : > { %3909 = vmatpush3.bf16.msra.mxu0 %v3906_v51  ;;  %3347 = vmatprep.mubr.f32.mxu1 %v4789_v2  ;;  %v2839_v2 = vld [vmem:[%s5176_s3 + $0x478] sm:$0xff] }
  0x98   : > { %3571 = vmatprep.mubr.f32.mxu0 %v4485_v47  ;;  %3911 = vmatprep.subr.bf16.mxu0 %v3910_v12  ;;  %v2836_v47 = vld [vmem:[%s5176_s3 + $0x460] sm:$0xff] }
  0x99   : > { %3348 = vmatmul.mubr.f32.gmra.mrb[6].mxu1 %v4801_v13  ;;  %3933 = vmatprep.subr.bf16.mxu1 %v3910_v12 }
  0x9a   : > { %3572 = vmatmul.mubr.f32.gmra.mrb[6].mxu0 %v4497_v54  ;;  %3941 = vmatpush3.bf16.msra.mxu1 %v3910_v12  ;;  %v3922_v54 = vpack.c.bf16 %v2837_v60, %v2836_v47 }
  0x9b   : > { %3913 = vmatpush3.bf16.msra.mxu0 %v3910_v12  ;;  %3350 = vmatprep.mubr.f32.mxu1 %v4813_v28 }
  0x9c   : > { %3574 = vmatprep.mubr.f32.mxu0 %v4503_v58  ;;  %3915 = vmatprep.subr.bf16.mxu0 %v3914_v15  ;;  %v2838_v58 = vld [vmem:[%s5176_s3 + $0x470] sm:$0xff] }
  0x9d   : > { %3351 = vmatmul.mubr.f32.gmra.mrb[8].mxu1 %v4825_v33  ;;  %3934 = vmatprep.subr.bf16.mxu1 %v3914_v15 }
  0x9e   : > { %3575 = vmatmul.mubr.f32.gmra.mrb[8].mxu0 %v4508_v63  ;;  %3942 = vmatpush3.bf16.msra.mxu1 %v3914_v15  ;;  %v3926_v63 = vpack.c.bf16 %v2839_v2, %v2838_v58 }
  0x9f   : > { %3917 = vmatpush3.bf16.msra.mxu0 %v3914_v15  ;;  %3353 = vmatprep.mubr.f32.mxu1 %v4837_v36 }
  0xa0   : > { %3577 = vmatprep.mubr.f32.mxu0 %v4513_v4  ;;  %3919 = vmatprep.subr.bf16.mxu0 %v3918_v40  ;;  %v2193_v4 = vld [vmem:[#allocation2 + $0xda] sm:$0xff] }
  0xa1   : > { %3354 = vmatmul.mubr.f32.gmra.mrb[10].mxu1 %v4849_v48  ;;  %3935 = vmatprep.subr.bf16.mxu1 %v3918_v40 }
  0xa2   : > { %3578 = vmatmul.mubr.f32.gmra.mrb[10].mxu0 %v4523_v9  ;;  %3943 = vmatpush3.bf16.msra.mxu1 %v3918_v40  ;;  %v2194_v9 = vld [vmem:[#allocation2 + $0xe2] sm:$0xff] }
  0xa3   : > { %3921 = vmatpush3.bf16.msra.mxu0 %v3918_v40  ;;  %3356 = vmatprep.mubr.f32.mxu1 %v4861_v57 }
  0xa4   : > { %3580 = vmatprep.mubr.f32.mxu0 %v4533_v17  ;;  %3923 = vmatprep.subr.bf16.mxu0 %v3922_v54 }
  0xa5   : > { %3357 = vmatmul.mubr.f32.gmra.mrb[12].mxu1 %v4873_v10  ;;  %3936 = vmatprep.subr.bf16.mxu1 %v3922_v54 }
  0xa6   : > { %3581 = vmatmul.mubr.f32.gmra.mrb[12].mxu0 %v4536_v18  ;;  %3944 = vmatpush3.bf16.msra.mxu1 %v3922_v54 }
  0xa7   : > { %3925 = vmatpush3.bf16.msra.mxu0 %v3922_v54  ;;  %3359 = vmatprep.mubr.f32.mxu1 %v4980_v30 }
  0xa8   : > { %4117 = vmatprep.mubr.msk.f32.mxu0 %vm4698_vm1, %v567_v26  ;;  %3927 = vmatprep.subr.bf16.mxu0 %v3926_v63 }
  0xa9   : > { %3360 = vmatmul.mubr.f32.gmra.mrb[14].mxu1 %v4996_v44  ;;  %3937 = vmatprep.subr.bf16.mxu1 %v3926_v63 }
  0xaa   : > { %4118 = vmatmul.mubr.msk.f32.gmra.mrb[14].mxu0 %vm4698_vm1, %v568_v27  ;;  %3945 = vmatpush3.bf16.msra.mxu1 %v3926_v63 }
  0xab   : > { %3929 = vmatpush3.bf16.msra.mxu0 %v3926_v63  ;;  %3618 = vmatprep.mubr.f32.mxu0 %v4712_v31 }
  0xac   : > { %3630 = vmatprep.mubr.f32.mxu1 %v4816_v14 }
  0xad   : > { %3631 = vmatmul.mubr.f32.vlgmr.msra.gmra.mrb[16].mxu1 %v4834_v35 }
  0xae   : > { %3619 = vmatmul.mubr.f32.vlgmr.msra.gmra.mrb[0].mxu0 %v4738_v37  ;;  %3633 = vmatprep.mubr.f32.mxu1 %v4840_v42 }
  0xaf   : > { %3621 = vmatprep.mubr.f32.mxu0 %v4744_v41 }
  0xb1   : > { %3634 = vmatmul.mubr.f32.gmra.mrb[18].mxu1 %v4858_v56 }
  0xb2   : > { %3622 = vmatmul.mubr.f32.gmra.mrb[2].mxu0 %v4762_v49  ;;  %3636 = vmatprep.mubr.f32.mxu1 %v4864_v62 }
  0xb3   : > { %3624 = vmatprep.mubr.f32.mxu0 %v4768_v53 }
  0xb5   : > { %3637 = vmatmul.mubr.f32.gmra.mrb[20].mxu1 %v4882_v11 }
  0xb6   : > { %3625 = vmatmul.mubr.f32.gmra.mrb[4].mxu0 %v4786_v1  ;;  %3639 = vmatprep.mubr.f32.mxu1 %v2193_v4 }
  0xb7   : > { %3627 = vmatprep.mubr.f32.mxu0 %v4792_v6 }
  0xb9   : > { %3640 = vmatmul.mubr.f32.gmra.mrb[22].mxu1 %v2194_v9 }
  0xba   : > { %3628 = vmatmul.mubr.f32.gmra.mrb[6].mxu0 %v4810_v21 }
 0x160   : > { %v3340_v17 = vpop.f32.mrb[0].mxu1 }
 0x161   : > { %v1307_v18 = vpop.f32.mrb[1].mxu1 }
 0x164   : > { %v3343_v22 = vpop.f32.mrb[2].mxu1 }
 0x165   : > { %v1317_v23 = vpop.f32.mrb[3].mxu1 }
 0x168   : > { %v5101_v24 = vpop.f32.mrb[4].mxu1 }
 0x169   : > { %v5103_v26 = vpop.f32.mrb[5].mxu1 }
 0x16c   : > { %v5105_v27 = vpop.f32.mrb[6].mxu1 }
 0x16d   : > { %v5107_v31 = vpop.f32.mrb[7].mxu1 }
 0x170   : > { %v3352_v37 = vpop.f32.mrb[8].mxu1 }
 0x171   : > { %v3576_v41 = vpop.f32.mrb[8].mxu0  ;;  %v1347_v49 = vpop.f32.mrb[9].mxu1 }
 0x172   : > { %v3954_v53 = vadd.f32 %v3576_v41, %v3352_v37  ;;  %v2124_v1 = vpop.f32.mrb[9].mxu0 }
 0x173   : > { %v3956_v6 = vadd.f32 %v2124_v1, %v1347_v49 }
 0x174   : > { %v3355_v13 = vpop.f32.mrb[10].mxu1 }
 0x175   : > { %v3579_v21 = vpop.f32.mrb[10].mxu0  ;;  %v1357_v28 = vpop.f32.mrb[11].mxu1 }
 0x176   : > { %v3958_v14 = vadd.f32 %v3579_v21, %v3355_v13  ;;  %v2134_v33 = vpop.f32.mrb[11].mxu0 }
 0x177   : > { %v3960_v35 = vadd.f32 %v2134_v33, %v1357_v28 }
 0x178   : > { %v3358_v36 = vpop.f32.mrb[12].mxu1 }
 0x179   : > { %v3582_v42 = vpop.f32.mrb[12].mxu0  ;;  %v1367_v48 = vpop.f32.mrb[13].mxu1 }
 0x17a   : > { %v3962_v56 = vadd.f32 %v3582_v42, %v3358_v36  ;;  %v2144_v57 = vpop.f32.mrb[13].mxu0 }
 0x17b   : > { %v3964_v62 = vadd.f32 %v2144_v57, %v1367_v48 }
 0x17c   : > { %v3361_v10 = vpop.f32.mrb[14].mxu1 }
 0x17d   : > { %v3585_v11 = vpop.f32.mrb[14].mxu0  ;;  %v1377_v30 = vpop.f32.mrb[15].mxu1 }
 0x17e   : > { %v3966_v39 = vadd.f32 %v3585_v11, %v3361_v10  ;;  %v2154_v43 = vpop.f32.mrb[15].mxu0 }
 0x17f   : > { %v3968_v44 = vadd.f32 %v2154_v43, %v1377_v30 }
 0x180   : > { %v3632_v46 = vpop.f32.mrb[16].mxu1 }
 0x181   : > { %v3620_v52 = vpop.f32.mrb[0].mxu0  ;;  %v5116_v55 = vadd.f32 %v3954_v53, %v3632_v46  ;;  %v2318_v61 = vpop.f32.mrb[17].mxu1 }
 0x182   : > { %v3946_v3 = vadd.f32 %v3620_v52, %v3340_v17  ;;  %v2278_v7 = vpop.f32.mrb[1].mxu0  ;;  %v5118_v8 = vadd.f32 %v3956_v6, %v2318_v61 }
 0x183   : > { %2382 = vst [vmem:[%s5114_s19 + $0x48] sm:$0xff] %v5116_v55  ;;  %v3947_v19 = vadd.f32 %v2278_v7, %v1307_v18 }
 0x184   : > { %2374 = vst [vmem:[%s5114_s19 + $0x8] sm:$0xff] %v3946_v3  ;;  %v2412_v20 = vmul.f32 %v3946_v3, %v3946_v3  ;;  %2381 = vst [vmem:[%s5114_s19 + $0x40] sm:$0xff] %v5118_v8  ;;  %v3635_v59 = vpop.f32.mrb[18].mxu1 }
 0x185   : > { %2373 = vst [vmem:[%s5114_s19] sm:$0xff] %v3947_v19  ;;  %v2389_v16 = vadd.f32 %v3947_v19, %v3946_v3  ;;  %v2411_v25 = vmul.f32 %v3947_v19, %v3947_v19  ;;  %v3623_v32 = vpop.f32.mrb[2].mxu0  ;;  %v3959_v0 = vadd.f32 %v3958_v14, %v3635_v59  ;;  %v2328_v51 = vpop.f32.mrb[19].mxu1 }
 0x186   : > { %v3948_v5 = vadd.f32 %v3623_v32, %v3343_v22  ;;  %v2288_v34 = vpop.f32.mrb[3].mxu0  ;;  %v3961_v12 = vadd.f32 %v3960_v35, %v2328_v51 }
 0x187   : > { %v2427_v38 = vadd.f32 %v2412_v20, %v2411_v25  ;;  %2384 = vst [vmem:[%s5114_s19 + $0x58] sm:$0xff] %v3959_v0  ;;  %v3949_v45 = vadd.f32 %v2288_v34, %v1317_v23  ;;  %v2422_v43 = vmul.f32 %v3959_v0, %v3959_v0 }
 0x188   : > { %2376 = vst [vmem:[%s5114_s19 + $0x18] sm:$0xff] %v3948_v5  ;;  %2383 = vst [vmem:[%s5114_s19 + $0x50] sm:$0xff] %v3961_v12  ;;  %v3638_v15 = vpop.f32.mrb[20].mxu1  ;;  %v2414_v63 = vmul.f32 %v3948_v5, %v3948_v5  ;;  %v2421_v11 = vmul.f32 %v3961_v12, %v3961_v12 }
 0x189   : > { %2375 = vst [vmem:[%s5114_s19 + $0x10] sm:$0xff] %v3949_v45  ;;  %v2390_v29 = vadd.f32 %v3949_v45, %v2389_v16  ;;  %v2413_v50 = vmul.f32 %v3949_v45, %v3949_v45  ;;  %v3626_v40 = vpop.f32.mrb[4].mxu0  ;;  %v3963_v47 = vadd.f32 %v3962_v56, %v3638_v15  ;;  %v2338_v60 = vpop.f32.mrb[21].mxu1 }
 0x18a   : > { %v3950_v54 = vadd.f32 %v3626_v40, %v5101_v24  ;;  %v2298_v58 = vpop.f32.mrb[5].mxu0  ;;  %v3965_v2 = vadd.f32 %v3964_v62, %v2338_v60  ;;  %v2420_v62 = vmul.f32 %v5116_v55, %v5116_v55 }
 0x18b   : > { %v2428_v4 = vadd.f32 %v2427_v38, %v2413_v50  ;;  %2386 = vst [vmem:[%s5114_s19 + $0x68] sm:$0xff] %v3963_v47  ;;  %v3951_v9 = vadd.f32 %v2298_v58, %v5103_v26  ;;  %v2391_v17 = vadd.f32 %v3948_v5, %v2390_v29  ;;  %v2424_v7 = vmul.f32 %v3963_v47, %v3963_v47 }
 0x18c   : > { %2378 = vst [vmem:[%s5114_s19 + $0x28] sm:$0xff] %v3950_v54  ;;  %2385 = vst [vmem:[%s5114_s19 + $0x60] sm:$0xff] %v3965_v2  ;;  %v3641_v18 = vpop.f32.mrb[22].mxu1  ;;  %v2416_v26 = vmul.f32 %v3950_v54, %v3950_v54  ;;  %v2423_v52 = vmul.f32 %v3965_v2, %v3965_v2 }
 0x18d   : > { %2377 = vst [vmem:[%s5114_s19 + $0x20] sm:$0xff] %v3951_v9  ;;  %v2392_v22 = vadd.f32 %v3951_v9, %v2391_v17  ;;  %v2415_v23 = vmul.f32 %v3951_v9, %v3951_v9  ;;  %v2429_v37 = vadd.f32 %v2428_v4, %v2414_v63  ;;  %v3629_v24 = vpop.f32.mrb[6].mxu0  ;;  %v3967_v41 = vadd.f32 %v3966_v39, %v3641_v18  ;;  %v2348_v49 = vpop.f32.mrb[23].mxu1 }
 0x18e   : > { %v3952_v53 = vadd.f32 %v3629_v24, %v5105_v27  ;;  %v2308_v1 = vpop.f32.mrb[7].mxu0  ;;  %v3969_v6 = vadd.f32 %v3968_v44, %v2348_v49  ;;  %v2419_v27 = vmul.f32 %v5118_v8, %v5118_v8 }
 0x18f   : > { %v2430_v13 = vadd.f32 %v2429_v37, %v2415_v23  ;;  %2388 = vst [vmem:[%s5114_s19 + $0x78] sm:$0xff] %v3967_v41  ;;  %v3953_v21 = vadd.f32 %v2308_v1, %v5107_v31  ;;  %v2393_v28 = vadd.f32 %v3950_v54, %v2392_v22 }
 0x190   : > { %2380 = vst [vmem:[%s5114_s19 + $0x38] sm:$0xff] %v3952_v53  ;;  %2387 = vst [vmem:[%s5114_s19 + $0x70] sm:$0xff] %v3969_v6  ;;  %v2418_v36 = vmul.f32 %v3952_v53, %v3952_v53  ;;  %v2425_v59 = vmul.f32 %v3969_v6, %v3969_v6 }
 0x191   : > { %2379 = vst [vmem:[%s5114_s19 + $0x30] sm:$0xff] %v3953_v21  ;;  %v2394_v14 = vadd.f32 %v3953_v21, %v2393_v28  ;;  %v2417_v33 = vmul.f32 %v3953_v21, %v3953_v21  ;;  %v2431_v35 = vadd.f32 %v2430_v13, %v2416_v26 }
 0x193   : > { %v2395_v42 = vadd.f32 %v3952_v53, %v2394_v14  ;;  %v2432_v48 = vadd.f32 %v2431_v35, %v2417_v33 }
 0x195   : > { %v2396_v56 = vadd.f32 %v5118_v8, %v2395_v42  ;;  %v2433_v57 = vadd.f32 %v2432_v48, %v2418_v36 }
 0x197   : > { %v2397_v31 = vadd.f32 %v5116_v55, %v2396_v56  ;;  %v2434_v10 = vadd.f32 %v2433_v57, %v2419_v27  ;;  %v2426_v55 = vmul.f32 %v3967_v41, %v3967_v41 }
 0x199   : > { %v2435_v30 = vadd.f32 %v2434_v10, %v2420_v62  ;;  %v2398_v39 = vadd.f32 %v3961_v12, %v2397_v31 }
 0x19b   : > { %v2399_v44 = vadd.f32 %v3959_v0, %v2398_v39  ;;  %v2436_v46 = vadd.f32 %v2435_v30, %v2421_v11 }
 0x19d   : > { %v2400_v61 = vadd.f32 %v3965_v2, %v2399_v44  ;;  %v2437_v3 = vadd.f32 %v2436_v46, %v2422_v43 }
 0x19f   : > { %v2401_v8 = vadd.f32 %v3963_v47, %v2400_v61  ;;  %v2438_v19 = vadd.f32 %v2437_v3, %v2423_v52 }
 0x1a1   : > { %v2402_v20 = vadd.f32 %v3969_v6, %v2401_v8  ;;  %v2439_v16 = vadd.f32 %v2438_v19, %v2424_v7 }
 0x1a3   : > { %v2403_v25 = vadd.f32 %v3967_v41, %v2402_v20  ;;  %v2440_v32 = vadd.f32 %v2439_v16, %v2425_v59 }
 0x1a5   : > { %v2404_v51 = vrot.slane %v2403_v25, 4  ;;  %v2441_v5 = vadd.f32 %v2440_v32, %v2426_v55 }
 0x1a7   : > { %v2405_v0 = vadd.f32 %v2404_v51, %v2403_v25  ;;  %v2442_v34 = vrot.slane %v2441_v5, 4 }
 0x1a9   : > { %v2406_v12 = vrot.slane %v2405_v0, 2  ;;  %v2443_v38 = vadd.f32 %v2442_v34, %v2441_v5 }
 0x1ab   : > { %v2407_v45 = vadd.f32 %v2406_v12, %v2405_v0  ;;  %v2444_v15 = vrot.slane %v2443_v38, 2 }
 0x1ad   : > { %v2408_v29 = vrot.slane %v2407_v45, 1  ;;  %v2445_v50 = vadd.f32 %v2444_v15, %v2443_v38 }
 0x1af   : > { %v2409_v40 = vadd.f32 %v2408_v29, %v2407_v45  ;;  %v2446_v47 = vrot.slane %v2445_v50, 1 }
 0x1b1   : > { %2410 = vst [vmem:[%s503_s23] sm:$0x1] %v2409_v40  ;;  %v2447_v60 = vadd.f32 %v2446_v47, %v2445_v50 }
 0x1b3   : > { %2448 = vst [vmem:[%s510_s12] sm:$0x1] %v2447_v60 }
 0x1b4 PF: > { %s19_s9 = sadd.s32 1, %s4157_s9   ;;  %s5191_s27 = smov %s4149_s29 }
 0x1b5   : > { %p16_p12 = scmp.ge.s32.totalorder %s19_s9, 6   ;;  %s5192_s28 = smov %s4153_s30 }
 0x1b6   : > { %s5193_s29 = smov %s5196_s10  ;;  %s5194_s30 = smov %s5200_s11 }
 0x1b7   :  { %18 = sbr.rel (!%p16_p12) target bundleno = 3 (0x3), region = 115 }

</bundles_post_ra>
